<compile_context>
chip_gen: v5e
topology: v5e:2x2
jax: 0.10.0
libtpu: 0.0.40
codegen_flags: <defaults>
</compile_context>

<pallas_src>
import functools

import numpy as np
import jax
import jax.numpy as jnp
from jax.experimental import pallas as pl
from jax.experimental.pallas import tpu as pltpu

KSIZE = 7        # fixed 7x7x7 window
PAD = 3          # conv padding -> same-size output
OUT_C = 5        # weight.unsqueeze(0).expand(5, 5, 7, 7, 7) requires channel == 5


def _gauss_taps(sigma):
    # Taps exactly as the PyTorch module builds them: indices 0..6 (NOT centred).
    g = np.exp(-(np.arange(KSIZE, dtype=np.float64) ** 2) / (2.0 * float(sigma) ** 2))
    taps = [float(v) for v in g]
    center_fix = float(1.0 - g[PAD] ** 3)     # weight[3, 3, 3] is overridden to 1
    return taps, center_fix


def _gauss_tile_kernel(x_ref, halo_ref, o_ref, sp_ref, *, taps, center_fix, td, h, w):
    """One (batch, D-tile) grid step.

    x_ref   : (1, 5, td, h, w)   input tile (auto-pipelined)
    halo_ref: (1, 1, 6, h, w)    channel-summed D halo: 3 planes before + 3 after tile
    o_ref   : (1, 5, td, h, w)   output tile
    sp_ref  : (td+6, h+6, w+6)   f32 scratch: zero-padded channel-sum slab
    """
    tdh = td + 2 * PAD
    hp, wp = h + 2 * PAD, w + 2 * PAD

    # Zero only the H/W halo strips; everything else in the slab is overwritten
    # below, so every grid step is self-contained (both grid axes stay "parallel").
    sp_ref[:, 0:PAD, :] = jnp.zeros((tdh, PAD, wp), jnp.float32)
    sp_ref[:, PAD + h:, :] = jnp.zeros((tdh, PAD, wp), jnp.float32)
    sp_ref[:, :, 0:PAD] = jnp.zeros((tdh, hp, PAD), jnp.float32)
    sp_ref[:, :, PAD + w:] = jnp.zeros((tdh, hp, PAD), jnp.float32)

    # Channel sum of the main tile (the 5x5 channel contraction collapses to this).
    s = x_ref[0, 0].astype(jnp.float32)
    for c in range(1, OUT_C):
        s = s + x_ref[0, c].astype(jnp.float32)          # (td, h, w)
    sp_ref[PAD:PAD + td, PAD:PAD + h, PAD:PAD + w] = s

    # D halo planes (channel-summed in the wrapper; zeros at the volume boundaries).
    halo = halo_ref[0, 0].astype(jnp.float32)            # (6, h, w)
    sp_ref[0:PAD, PAD:PAD + h, PAD:PAD + w] = halo[0:PAD]
    sp_ref[PAD + td:, PAD:PAD + h, PAD:PAD + w] = halo[PAD:]

    sp = sp_ref[...]                                     # (td+6, hp, wp)

    # Separable 7-tap passes: D (leading axis) -> H (sublanes) -> W (lanes).
    # NOTE: the off-aligned H/W tap slices lower to sublane/lane shifts (XLU has
    # slack while HBM-bound); switch to pltpu.roll + full-width accumulation only
    # if a bundle dump shows relayout copies here.
    acc_d = taps[0] * sp[0:td]
    for i in range(1, KSIZE):
        acc_d = acc_d + taps[i] * sp[i:i + td]           # (td, hp, wp)
    acc_h = taps[0] * acc_d[:, 0:h, :]
    for j in range(1, KSIZE):
        acc_h = acc_h + taps[j] * acc_d[:, j:j + h, :]   # (td, h, wp)
    acc_w = taps[0] * acc_h[:, :, 0:w]
    for k in range(1, KSIZE):
        acc_w = acc_w + taps[k] * acc_h[:, :, k:k + w]   # (td, h, w)

    # Centre-tap override (weight[3,3,3] = 1 instead of g[3]^3); `s` is exactly the
    # centre sample of the padded slab for this tile and is already in registers.
    y = (acc_w + center_fix * s).astype(o_ref.dtype)

    # All 5 output channels are identical (weight shared across o and c): plain
    # per-channel stores, no 5x broadcast temp. With D-tiling the 5-wide output
    # block stays small, so a separate channel grid axis (5x more grid-step
    # overhead) is not worth it.
    # TODO(synk): if the consumer accepts a (N, 1, D, H, W) result + lazy broadcast,
    # drop 4 of these stores and cut ~40% of the remaining HBM traffic.
    for o in range(OUT_C):
        o_ref[0, o] = y


def _round_up(a, m):
    return (a + m - 1) // m * m


def _choose_d_tile(d, target):
    """Largest divisor of d that is <= target (whole volume if d is awkward)."""
    if d <= target:
        return d
    for t in range(int(target), 0, -1):
        if d % t == 0:
            if t <= PAD:          # degenerate (e.g. prime d): fall back to one tile
                break
            return t
    # TODO(synk): support ragged last D-tiles (masked edge stores) instead of falling
    # back to a single whole-volume block when D has no good divisor.
    return d


def gauss_smoothing(x, sigma, *, d_tile=None):
    """x: (N, 5, D, H, W) -> (N, 5, D, H, W); equals F.conv3d(x, gauss_weight, padding=3)."""
    N, C, D, H, W = x.shape
    if C != OUT_C:
        raise ValueError("GaussSmoothing requires channel == 5 "
                         "(weight.unsqueeze(0).expand(5, 5, 7, 7, 7)).")
    taps, center_fix = _gauss_taps(sigma)

    # Per-generation VMEM budget: ~48 MiB limit on v7x (64 MiB physical),
    # ~96 MiB on v5e/v6e (128 MiB physical).
    try:
        vmem_cap = int(pltpu.get_tpu_info().vmem_capacity_bytes)
    except Exception:
        vmem_cap = 64 * 1024 * 1024                      # v7x-safe fallback
    vmem_limit = min(vmem_cap * 3 // 4, 100 * 1024 * 1024)

    if d_tile is None:
        # Rough per-D-plane VMEM cost of one grid step with (8, 128) layout padding:
        # double-buffered input + output blocks (5 channels each), the padded slab
        # and the separable-pass intermediates. Aim for about half the limit.
        hr, wr = _round_up(H, 8), _round_up(W, 128)
        hpr, wpr = _round_up(H + 2 * PAD, 8), _round_up(W + 2 * PAD, 128)
        per_plane = 4 * (2 * OUT_C * hr * wr             # input block, double buffered
                         + 2 * OUT_C * hr * wr           # output block, double buffered
                         + 4 * hpr * wpr)                # slab + pass intermediates
        fixed = 4 * (2 * PAD * hpr * wpr + 4 * 2 * PAD * hr * wr)
        d_tile = max(8, min(64, (vmem_limit // 2 - fixed) // per_plane))
    TD = _choose_d_tile(D, d_tile)
    n_dt = D // TD

    # 3-plane D halos for every tile, channel-summed in the wrapper. This is the only
    # HBM side traffic besides x and the output (~6/TD of one volume) and it keeps the
    # overlapping-window reads on the auto-pipelined BlockSpec path.
    if n_dt == 1:
        halo = jnp.zeros((N, 1, 2 * PAD, H, W), jnp.float32)
    else:
        xr = x.reshape(N, OUT_C, n_dt, TD, H, W)
        zeros3 = jnp.zeros((N, OUT_C, 1, PAD, H, W), x.dtype)
        front = jnp.concatenate([zeros3, xr[:, :, :-1, TD - PAD:]], axis=2)
        back = jnp.concatenate([xr[:, :, 1:, :PAD], zeros3], axis=2)
        halo = jnp.sum(jnp.concatenate([front, back], axis=3).astype(jnp.float32),
                       axis=1)                           # (N, n_dt, 6, H, W)

    kernel = functools.partial(_gauss_tile_kernel, taps=taps, center_fix=center_fix,
                               td=TD, h=H, w=W)

    # TODO(synk): if production W is far from a multiple of 128, add a layout pass that
    # runs the D/H taps on a (td, Hp*Wp)-flattened view so vregs and stores stay
    # lane-dense (largest remaining lever once HBM traffic is minimal).
    return pl.pallas_call(
        kernel,
        out_shape=jax.ShapeDtypeStruct((N, OUT_C, D, H, W), x.dtype),
        grid_spec=pltpu.PrefetchScalarGridSpec(
            num_scalar_prefetch=0,
            grid=(N, n_dt),
            in_specs=[
                pl.BlockSpec((1, OUT_C, TD, H, W), lambda n, j: (n, 0, j, 0, 0)),
                pl.BlockSpec((1, 1, 2 * PAD, H, W), lambda n, j: (n, j, 0, 0, 0)),
            ],
            out_specs=pl.BlockSpec((1, OUT_C, TD, H, W), lambda n, j: (n, 0, j, 0, 0)),
            scratch_shapes=[
                pltpu.VMEM((TD + 2 * PAD, H + 2 * PAD, W + 2 * PAD), jnp.float32)],
        ),
        compiler_params=pltpu.CompilerParams(
            dimension_semantics=("parallel", "parallel"),
            vmem_limit_bytes=int(vmem_limit),
        ),
    )(x, halo)


if __name__ == "__main__":
    key = jax.random.PRNGKey(0)
    N, C, D, H, W = 2, 5, 16, 8, 16
    sigma = 1.5
    x = jax.random.normal(key, (N, C, D, H, W), dtype=jnp.float32)

    # Reference: the exact PyTorch weight, applied with a dense conv3d.
    ii, jj, kk = np.meshgrid(np.arange(KSIZE), np.arange(KSIZE), np.arange(KSIZE),
                             indexing="ij")
    Kw = np.exp(-(ii ** 2 + jj ** 2 + kk ** 2) / (2.0 * sigma ** 2))
    Kw[PAD, PAD, PAD] = 1.0
    weight = np.broadcast_to(Kw, (OUT_C, OUT_C, KSIZE, KSIZE, KSIZE)).astype(np.float32)
    ref = jax.lax.conv_general_dilated(
        x, jnp.asarray(weight),
        window_strides=(1, 1, 1),
        padding=((PAD, PAD), (PAD, PAD), (PAD, PAD)),
        dimension_numbers=("NCDHW", "OIDHW", "NCDHW"),
        precision=jax.lax.Precision.HIGHEST)

    # Exercise both the single-tile path (TD == D) and the multi-tile D-halo path.
    for dt in (None, 8):
        y = jax.block_until_ready(gauss_smoothing(x, sigma, d_tile=dt))
        assert y.shape == (N, OUT_C, D, H, W), y.shape
        max_err = float(jnp.max(jnp.abs(y - ref)))
        assert np.allclose(np.asarray(y), np.asarray(ref), atol=2e-3, rtol=2e-4), (dt, max_err)
    print("KERNEL_OK")
</pallas_src>

<mosaic_0001>
module attributes {stable_mosaic.version = 11 : i64} {
  func.func @_gauss_tile_kernel(%arg0: i32, %arg1: i32, %arg2: memref<1x5x16x8x16xf32, #tpu.memory_space<vmem>>, %arg3: memref<1x1x6x8x16xf32, #tpu.memory_space<vmem>>, %arg4: memref<1x5x16x8x16xf32, #tpu.memory_space<vmem>>, %arg5: memref<22x14x22xf32, #tpu.memory_space<vmem>>) attributes {dimension_semantics = [#tpu.dimension_semantics<parallel>, #tpu.dimension_semantics<parallel>], iteration_bounds = array<i64: 2, 1>, scalar_prefetch = 0 : i64, scratch_operands = 1 : i64, tpu.core_type = #tpu.core_type<tc>, window_params = [{transform_indices = @transform_0, window_bounds = array<i64: 1, 5, 16, 8, 16>}, {transform_indices = @transform_1, window_bounds = array<i64: 1, 1, 6, 8, 16>}, {transform_indices = @transform_2, window_bounds = array<i64: 1, 5, 16, 8, 16>}]} {
    %cst = arith.constant 0.000000e+00 : f32
    %0 = vector.broadcast %cst : f32 to vector<22x3x22xf32>
    %c0 = arith.constant 0 : index
    %c0_0 = arith.constant 0 : index
    %c0_1 = arith.constant 0 : index
    %1 = vector.load %arg5[%c0, %c0_0, %c0_1] : memref<22x14x22xf32, #tpu.memory_space<vmem>>, vector<22x3x22xf32>
    tpu.vector_store %arg5[%c0, %c0_0, %c0_1], %0 {strides = array<i32>} : memref<22x14x22xf32, #tpu.memory_space<vmem>>, vector<22x3x22xf32>,
    %cst_2 = arith.constant 0.000000e+00 : f32
    %2 = vector.broadcast %cst_2 : f32 to vector<22x3x22xf32>
    %c0_3 = arith.constant 0 : index
    %c11 = arith.constant 11 : index
    %c0_4 = arith.constant 0 : index
    %3 = vector.load %arg5[%c0_3, %c11, %c0_4] : memref<22x14x22xf32, #tpu.memory_space<vmem>>, vector<22x3x22xf32>
    tpu.vector_store %arg5[%c0_3, %c11, %c0_4], %2 {strides = array<i32>} : memref<22x14x22xf32, #tpu.memory_space<vmem>>, vector<22x3x22xf32>,
    %cst_5 = arith.constant 0.000000e+00 : f32
    %4 = vector.broadcast %cst_5 : f32 to vector<22x14x3xf32>
    %c0_6 = arith.constant 0 : index
    %c0_7 = arith.constant 0 : index
    %c0_8 = arith.constant 0 : index
    %5 = vector.load %arg5[%c0_6, %c0_7, %c0_8] : memref<22x14x22xf32, #tpu.memory_space<vmem>>, vector<22x14x3xf32>
    tpu.vector_store %arg5[%c0_6, %c0_7, %c0_8], %4 {strides = array<i32>} : memref<22x14x22xf32, #tpu.memory_space<vmem>>, vector<22x14x3xf32>,
    %cst_9 = arith.constant 0.000000e+00 : f32
    %6 = vector.broadcast %cst_9 : f32 to vector<22x14x3xf32>
    %c0_10 = arith.constant 0 : index
    %c0_11 = arith.constant 0 : index
    %c19 = arith.constant 19 : index
    %7 = vector.load %arg5[%c0_10, %c0_11, %c19] : memref<22x14x22xf32, #tpu.memory_space<vmem>>, vector<22x14x3xf32>
    tpu.vector_store %arg5[%c0_10, %c0_11, %c19], %6 {strides = array<i32>} : memref<22x14x22xf32, #tpu.memory_space<vmem>>, vector<22x14x3xf32>,
    %c0_12 = arith.constant 0 : index
    %c0_13 = arith.constant 0 : index
    %c0_14 = arith.constant 0 : index
    %c0_15 = arith.constant 0 : index
    %c0_16 = arith.constant 0 : index
    %8 = vector.load %arg2[%c0_12, %c0_13, %c0_14, %c0_15, %c0_16] : memref<1x5x16x8x16xf32, #tpu.memory_space<vmem>>, vector<1x1x16x8x16xf32>
    %9 = vector.shape_cast %8 : vector<1x1x16x8x16xf32> to vector<16x8x16xf32>
    %c0_17 = arith.constant 0 : index
    %c1 = arith.constant 1 : index
    %c0_18 = arith.constant 0 : index
    %c0_19 = arith.constant 0 : index
    %c0_20 = arith.constant 0 : index
    %10 = vector.load %arg2[%c0_17, %c1, %c0_18, %c0_19, %c0_20] : memref<1x5x16x8x16xf32, #tpu.memory_space<vmem>>, vector<1x1x16x8x16xf32>
    %11 = vector.shape_cast %10 : vector<1x1x16x8x16xf32> to vector<16x8x16xf32>
    %12 = arith.addf %9, %11 : vector<16x8x16xf32>
    %c0_21 = arith.constant 0 : index
    %c2 = arith.constant 2 : index
    %c0_22 = arith.constant 0 : index
    %c0_23 = arith.constant 0 : index
    %c0_24 = arith.constant 0 : index
    %13 = vector.load %arg2[%c0_21, %c2, %c0_22, %c0_23, %c0_24] : memref<1x5x16x8x16xf32, #tpu.memory_space<vmem>>, vector<1x1x16x8x16xf32>
    %14 = vector.shape_cast %13 : vector<1x1x16x8x16xf32> to vector<16x8x16xf32>
    %15 = arith.addf %12, %14 : vector<16x8x16xf32>
    %c0_25 = arith.constant 0 : index
    %c3 = arith.constant 3 : index
    %c0_26 = arith.constant 0 : index
    %c0_27 = arith.constant 0 : index
    %c0_28 = arith.constant 0 : index
    %16 = vector.load %arg2[%c0_25, %c3, %c0_26, %c0_27, %c0_28] : memref<1x5x16x8x16xf32, #tpu.memory_space<vmem>>, vector<1x1x16x8x16xf32>
    %17 = vector.shape_cast %16 : vector<1x1x16x8x16xf32> to vector<16x8x16xf32>
    %18 = arith.addf %15, %17 : vector<16x8x16xf32>
    %c0_29 = arith.constant 0 : index
    %c4 = arith.constant 4 : index
    %c0_30 = arith.constant 0 : index
    %c0_31 = arith.constant 0 : index
    %c0_32 = arith.constant 0 : index
    %19 = vector.load %arg2[%c0_29, %c4, %c0_30, %c0_31, %c0_32] : memref<1x5x16x8x16xf32, #tpu.memory_space<vmem>>, vector<1x1x16x8x16xf32>
    %20 = vector.shape_cast %19 : vector<1x1x16x8x16xf32> to vector<16x8x16xf32>
    %21 = arith.addf %18, %20 : vector<16x8x16xf32>
    %c3_33 = arith.constant 3 : index
    %c3_34 = arith.constant 3 : index
    %c3_35 = arith.constant 3 : index
    %22 = vector.load %arg5[%c3_33, %c3_34, %c3_35] : memref<22x14x22xf32, #tpu.memory_space<vmem>>, vector<16x8x16xf32>
    tpu.vector_store %arg5[%c3_33, %c3_34, %c3_35], %21 {strides = array<i32>} : memref<22x14x22xf32, #tpu.memory_space<vmem>>, vector<16x8x16xf32>,
    %c0_36 = arith.constant 0 : index
    %c0_37 = arith.constant 0 : index
    %c0_38 = arith.constant 0 : index
    %c0_39 = arith.constant 0 : index
    %c0_40 = arith.constant 0 : index
    %23 = vector.load %arg3[%c0_36, %c0_37, %c0_38, %c0_39, %c0_40] : memref<1x1x6x8x16xf32, #tpu.memory_space<vmem>>, vector<1x1x6x8x16xf32>
    %24 = vector.shape_cast %23 : vector<1x1x6x8x16xf32> to vector<6x8x16xf32>
    %25 = vector.extract_strided_slice %24 {offsets = [0, 0, 0], sizes = [3, 8, 16], strides = [1, 1, 1]} : vector<6x8x16xf32> to vector<3x8x16xf32>
    %c0_41 = arith.constant 0 : index
    %c3_42 = arith.constant 3 : index
    %c3_43 = arith.constant 3 : index
    %26 = vector.load %arg5[%c0_41, %c3_42, %c3_43] : memref<22x14x22xf32, #tpu.memory_space<vmem>>, vector<3x8x16xf32>
    tpu.vector_store %arg5[%c0_41, %c3_42, %c3_43], %25 {strides = array<i32>} : memref<22x14x22xf32, #tpu.memory_space<vmem>>, vector<3x8x16xf32>,
    %27 = vector.extract_strided_slice %24 {offsets = [3, 0, 0], sizes = [3, 8, 16], strides = [1, 1, 1]} : vector<6x8x16xf32> to vector<3x8x16xf32>
    %c19_44 = arith.constant 19 : index
    %c3_45 = arith.constant 3 : index
    %c3_46 = arith.constant 3 : index
    %28 = vector.load %arg5[%c19_44, %c3_45, %c3_46] : memref<22x14x22xf32, #tpu.memory_space<vmem>>, vector<3x8x16xf32>
    tpu.vector_store %arg5[%c19_44, %c3_45, %c3_46], %27 {strides = array<i32>} : memref<22x14x22xf32, #tpu.memory_space<vmem>>, vector<3x8x16xf32>,
    %c0_47 = arith.constant 0 : index
    %c0_48 = arith.constant 0 : index
    %c0_49 = arith.constant 0 : index
    %29 = vector.load %arg5[%c0_47, %c0_48, %c0_49] : memref<22x14x22xf32, #tpu.memory_space<vmem>>, vector<22x14x22xf32>
    %30 = vector.extract_strided_slice %29 {offsets = [0, 0, 0], sizes = [16, 14, 22], strides = [1, 1, 1]} : vector<22x14x22xf32> to vector<16x14x22xf32>
    %cst_50 = arith.constant 1.000000e+00 : f32
    %31 = vector.broadcast %cst_50 : f32 to vector<16x14x22xf32>
    %32 = arith.mulf %31, %30 : vector<16x14x22xf32>
    %33 = vector.extract_strided_slice %29 {offsets = [1, 0, 0], sizes = [16, 14, 22], strides = [1, 1, 1]} : vector<22x14x22xf32> to vector<16x14x22xf32>
    %cst_51 = arith.constant 0.800737381 : f32
    %34 = vector.broadcast %cst_51 : f32 to vector<16x14x22xf32>
    %35 = arith.mulf %34, %33 : vector<16x14x22xf32>
    %36 = arith.addf %32, %35 : vector<16x14x22xf32>
    %37 = vector.extract_strided_slice %29 {offsets = [2, 0, 0], sizes = [16, 14, 22], strides = [1, 1, 1]} : vector<22x14x22xf32> to vector<16x14x22xf32>
    %cst_52 = arith.constant 0.411112279 : f32
    %38 = vector.broadcast %cst_52 : f32 to vector<16x14x22xf32>
    %39 = arith.mulf %38, %37 : vector<16x14x22xf32>
    %40 = arith.addf %36, %39 : vector<16x14x22xf32>
    %41 = vector.extract_strided_slice %29 {offsets = [3, 0, 0], sizes = [16, 14, 22], strides = [1, 1, 1]} : vector<22x14x22xf32> to vector<16x14x22xf32>
    %cst_53 = arith.constant 0.135335281 : f32
    %42 = vector.broadcast %cst_53 : f32 to vector<16x14x22xf32>
    %43 = arith.mulf %42, %41 : vector<16x14x22xf32>
    %44 = arith.addf %40, %43 : vector<16x14x22xf32>
    %45 = vector.extract_strided_slice %29 {offsets = [4, 0, 0], sizes = [16, 14, 22], strides = [1, 1, 1]} : vector<22x14x22xf32> to vector<16x14x22xf32>
    %cst_54 = arith.constant 2.856550e-02 : f32
    %46 = vector.broadcast %cst_54 : f32 to vector<16x14x22xf32>
    %47 = arith.mulf %46, %45 : vector<16x14x22xf32>
    %48 = arith.addf %44, %47 : vector<16x14x22xf32>
    %49 = vector.extract_strided_slice %29 {offsets = [5, 0, 0], sizes = [16, 14, 22], strides = [1, 1, 1]} : vector<22x14x22xf32> to vector<16x14x22xf32>
    %cst_55 = arith.constant 0.00386592024 : f32
    %50 = vector.broadcast %cst_55 : f32 to vector<16x14x22xf32>
    %51 = arith.mulf %50, %49 : vector<16x14x22xf32>
    %52 = arith.addf %48, %51 : vector<16x14x22xf32>
    %53 = vector.extract_strided_slice %29 {offsets = [6, 0, 0], sizes = [16, 14, 22], strides = [1, 1, 1]} : vector<22x14x22xf32> to vector<16x14x22xf32>
    %cst_56 = arith.constant 3.35462624E-4 : f32
    %54 = vector.broadcast %cst_56 : f32 to vector<16x14x22xf32>
    %55 = arith.mulf %54, %53 : vector<16x14x22xf32>
    %56 = arith.addf %52, %55 : vector<16x14x22xf32>
    %57 = vector.extract_strided_slice %56 {offsets = [0, 0, 0], sizes = [16, 8, 22], strides = [1, 1, 1]} : vector<16x14x22xf32> to vector<16x8x22xf32>
    %cst_57 = arith.constant 1.000000e+00 : f32
    %58 = vector.broadcast %cst_57 : f32 to vector<16x8x22xf32>
    %59 = arith.mulf %58, %57 : vector<16x8x22xf32>
    %60 = vector.extract_strided_slice %56 {offsets = [0, 1, 0], sizes = [16, 8, 22], strides = [1, 1, 1]} : vector<16x14x22xf32> to vector<16x8x22xf32>
    %cst_58 = arith.constant 0.800737381 : f32
    %61 = vector.broadcast %cst_58 : f32 to vector<16x8x22xf32>
    %62 = arith.mulf %61, %60 : vector<16x8x22xf32>
    %63 = arith.addf %59, %62 : vector<16x8x22xf32>
    %64 = vector.extract_strided_slice %56 {offsets = [0, 2, 0], sizes = [16, 8, 22], strides = [1, 1, 1]} : vector<16x14x22xf32> to vector<16x8x22xf32>
    %cst_59 = arith.constant 0.411112279 : f32
    %65 = vector.broadcast %cst_59 : f32 to vector<16x8x22xf32>
    %66 = arith.mulf %65, %64 : vector<16x8x22xf32>
    %67 = arith.addf %63, %66 : vector<16x8x22xf32>
    %68 = vector.extract_strided_slice %56 {offsets = [0, 3, 0], sizes = [16, 8, 22], strides = [1, 1, 1]} : vector<16x14x22xf32> to vector<16x8x22xf32>
    %cst_60 = arith.constant 0.135335281 : f32
    %69 = vector.broadcast %cst_60 : f32 to vector<16x8x22xf32>
    %70 = arith.mulf %69, %68 : vector<16x8x22xf32>
    %71 = arith.addf %67, %70 : vector<16x8x22xf32>
    %72 = vector.extract_strided_slice %56 {offsets = [0, 4, 0], sizes = [16, 8, 22], strides = [1, 1, 1]} : vector<16x14x22xf32> to vector<16x8x22xf32>
    %cst_61 = arith.constant 2.856550e-02 : f32
    %73 = vector.broadcast %cst_61 : f32 to vector<16x8x22xf32>
    %74 = arith.mulf %73, %72 : vector<16x8x22xf32>
    %75 = arith.addf %71, %74 : vector<16x8x22xf32>
    %76 = vector.extract_strided_slice %56 {offsets = [0, 5, 0], sizes = [16, 8, 22], strides = [1, 1, 1]} : vector<16x14x22xf32> to vector<16x8x22xf32>
    %cst_62 = arith.constant 0.00386592024 : f32
    %77 = vector.broadcast %cst_62 : f32 to vector<16x8x22xf32>
    %78 = arith.mulf %77, %76 : vector<16x8x22xf32>
    %79 = arith.addf %75, %78 : vector<16x8x22xf32>
    %80 = vector.extract_strided_slice %56 {offsets = [0, 6, 0], sizes = [16, 8, 22], strides = [1, 1, 1]} : vector<16x14x22xf32> to vector<16x8x22xf32>
    %cst_63 = arith.constant 3.35462624E-4 : f32
    %81 = vector.broadcast %cst_63 : f32 to vector<16x8x22xf32>
    %82 = arith.mulf %81, %80 : vector<16x8x22xf32>
    %83 = arith.addf %79, %82 : vector<16x8x22xf32>
    %84 = vector.extract_strided_slice %83 {offsets = [0, 0, 0], sizes = [16, 8, 16], strides = [1, 1, 1]} : vector<16x8x22xf32> to vector<16x8x16xf32>
    %cst_64 = arith.constant 1.000000e+00 : f32
    %85 = vector.broadcast %cst_64 : f32 to vector<16x8x16xf32>
    %86 = arith.mulf %85, %84 : vector<16x8x16xf32>
    %87 = vector.extract_strided_slice %83 {offsets = [0, 0, 1], sizes = [16, 8, 16], strides = [1, 1, 1]} : vector<16x8x22xf32> to vector<16x8x16xf32>
    %cst_65 = arith.constant 0.800737381 : f32
    %88 = vector.broadcast %cst_65 : f32 to vector<16x8x16xf32>
    %89 = arith.mulf %88, %87 : vector<16x8x16xf32>
    %90 = arith.addf %86, %89 : vector<16x8x16xf32>
    %91 = vector.extract_strided_slice %83 {offsets = [0, 0, 2], sizes = [16, 8, 16], strides = [1, 1, 1]} : vector<16x8x22xf32> to vector<16x8x16xf32>
    %cst_66 = arith.constant 0.411112279 : f32
    %92 = vector.broadcast %cst_66 : f32 to vector<16x8x16xf32>
    %93 = arith.mulf %92, %91 : vector<16x8x16xf32>
    %94 = arith.addf %90, %93 : vector<16x8x16xf32>
    %95 = vector.extract_strided_slice %83 {offsets = [0, 0, 3], sizes = [16, 8, 16], strides = [1, 1, 1]} : vector<16x8x22xf32> to vector<16x8x16xf32>
    %cst_67 = arith.constant 0.135335281 : f32
    %96 = vector.broadcast %cst_67 : f32 to vector<16x8x16xf32>
    %97 = arith.mulf %96, %95 : vector<16x8x16xf32>
    %98 = arith.addf %94, %97 : vector<16x8x16xf32>
    %99 = vector.extract_strided_slice %83 {offsets = [0, 0, 4], sizes = [16, 8, 16], strides = [1, 1, 1]} : vector<16x8x22xf32> to vector<16x8x16xf32>
    %cst_68 = arith.constant 2.856550e-02 : f32
    %100 = vector.broadcast %cst_68 : f32 to vector<16x8x16xf32>
    %101 = arith.mulf %100, %99 : vector<16x8x16xf32>
    %102 = arith.addf %98, %101 : vector<16x8x16xf32>
    %103 = vector.extract_strided_slice %83 {offsets = [0, 0, 5], sizes = [16, 8, 16], strides = [1, 1, 1]} : vector<16x8x22xf32> to vector<16x8x16xf32>
    %cst_69 = arith.constant 0.00386592024 : f32
    %104 = vector.broadcast %cst_69 : f32 to vector<16x8x16xf32>
    %105 = arith.mulf %104, %103 : vector<16x8x16xf32>
    %106 = arith.addf %102, %105 : vector<16x8x16xf32>
    %107 = vector.extract_strided_slice %83 {offsets = [0, 0, 6], sizes = [16, 8, 16], strides = [1, 1, 1]} : vector<16x8x22xf32> to vector<16x8x16xf32>
    %cst_70 = arith.constant 3.35462624E-4 : f32
    %108 = vector.broadcast %cst_70 : f32 to vector<16x8x16xf32>
    %109 = arith.mulf %108, %107 : vector<16x8x16xf32>
    %110 = arith.addf %106, %109 : vector<16x8x16xf32>
    %cst_71 = arith.constant 0.997521221 : f32
    %111 = vector.broadcast %cst_71 : f32 to vector<16x8x16xf32>
    %112 = arith.mulf %111, %21 : vector<16x8x16xf32>
    %113 = arith.addf %110, %112 : vector<16x8x16xf32>
    %c0_72 = arith.constant 0 : index
    %c0_73 = arith.constant 0 : index
    %c0_74 = arith.constant 0 : index
    %c0_75 = arith.constant 0 : index
    %c0_76 = arith.constant 0 : index
    %114 = vector.load %arg4[%c0_72, %c0_73, %c0_74, %c0_75, %c0_76] : memref<1x5x16x8x16xf32, #tpu.memory_space<vmem>>, vector<1x1x16x8x16xf32>
    %115 = vector.shape_cast %114 : vector<1x1x16x8x16xf32> to vector<16x8x16xf32>
    %116 = vector.shape_cast %113 : vector<16x8x16xf32> to vector<1x1x16x8x16xf32>
    tpu.vector_store %arg4[%c0_72, %c0_73, %c0_74, %c0_75, %c0_76], %116 {strides = array<i32>} : memref<1x5x16x8x16xf32, #tpu.memory_space<vmem>>, vector<1x1x16x8x16xf32>,
    %c0_77 = arith.constant 0 : index
    %c1_78 = arith.constant 1 : index
    %c0_79 = arith.constant 0 : index
    %c0_80 = arith.constant 0 : index
    %c0_81 = arith.constant 0 : index
    %117 = vector.load %arg4[%c0_77, %c1_78, %c0_79, %c0_80, %c0_81] : memref<1x5x16x8x16xf32, #tpu.memory_space<vmem>>, vector<1x1x16x8x16xf32>
    %118 = vector.shape_cast %117 : vector<1x1x16x8x16xf32> to vector<16x8x16xf32>
    %119 = vector.shape_cast %113 : vector<16x8x16xf32> to vector<1x1x16x8x16xf32>
    tpu.vector_store %arg4[%c0_77, %c1_78, %c0_79, %c0_80, %c0_81], %119 {strides = array<i32>} : memref<1x5x16x8x16xf32, #tpu.memory_space<vmem>>, vector<1x1x16x8x16xf32>,
    %c0_82 = arith.constant 0 : index
    %c2_83 = arith.constant 2 : index
    %c0_84 = arith.constant 0 : index
    %c0_85 = arith.constant 0 : index
    %c0_86 = arith.constant 0 : index
    %120 = vector.load %arg4[%c0_82, %c2_83, %c0_84, %c0_85, %c0_86] : memref<1x5x16x8x16xf32, #tpu.memory_space<vmem>>, vector<1x1x16x8x16xf32>
    %121 = vector.shape_cast %120 : vector<1x1x16x8x16xf32> to vector<16x8x16xf32>
    %122 = vector.shape_cast %113 : vector<16x8x16xf32> to vector<1x1x16x8x16xf32>
    tpu.vector_store %arg4[%c0_82, %c2_83, %c0_84, %c0_85, %c0_86], %122 {strides = array<i32>} : memref<1x5x16x8x16xf32, #tpu.memory_space<vmem>>, vector<1x1x16x8x16xf32>,
    %c0_87 = arith.constant 0 : index
    %c3_88 = arith.constant 3 : index
    %c0_89 = arith.constant 0 : index
    %c0_90 = arith.constant 0 : index
    %c0_91 = arith.constant 0 : index
    %123 = vector.load %arg4[%c0_87, %c3_88, %c0_89, %c0_90, %c0_91] : memref<1x5x16x8x16xf32, #tpu.memory_space<vmem>>, vector<1x1x16x8x16xf32>
    %124 = vector.shape_cast %123 : vector<1x1x16x8x16xf32> to vector<16x8x16xf32>
    %125 = vector.shape_cast %113 : vector<16x8x16xf32> to vector<1x1x16x8x16xf32>
    tpu.vector_store %arg4[%c0_87, %c3_88, %c0_89, %c0_90, %c0_91], %125 {strides = array<i32>} : memref<1x5x16x8x16xf32, #tpu.memory_space<vmem>>, vector<1x1x16x8x16xf32>,
    %c0_92 = arith.constant 0 : index
    %c4_93 = arith.constant 4 : index
    %c0_94 = arith.constant 0 : index
    %c0_95 = arith.constant 0 : index
    %c0_96 = arith.constant 0 : index
    %126 = vector.load %arg4[%c0_92, %c4_93, %c0_94, %c0_95, %c0_96] : memref<1x5x16x8x16xf32, #tpu.memory_space<vmem>>, vector<1x1x16x8x16xf32>
    %127 = vector.shape_cast %126 : vector<1x1x16x8x16xf32> to vector<16x8x16xf32>
    %128 = vector.shape_cast %113 : vector<16x8x16xf32> to vector<1x1x16x8x16xf32>
    tpu.vector_store %arg4[%c0_92, %c4_93, %c0_94, %c0_95, %c0_96], %128 {strides = array<i32>} : memref<1x5x16x8x16xf32, #tpu.memory_space<vmem>>, vector<1x1x16x8x16xf32>,
    return
  }
  func.func @transform_0(%arg0: i32, %arg1: i32) -> (i32, i32, i32, i32, i32) {
    %c0_i32 = arith.constant 0 : i32
    %c0_i32_0 = arith.constant 0 : i32
    %c0_i32_1 = arith.constant 0 : i32
    %c0_i32_2 = arith.constant 0 : i32
    return %arg0, %c0_i32, %arg1, %c0_i32_0, %c0_i32_1 : i32, i32, i32, i32, i32
  }
  func.func @transform_1(%arg0: i32, %arg1: i32) -> (i32, i32, i32, i32, i32) {
    %c0_i32 = arith.constant 0 : i32
    %c0_i32_0 = arith.constant 0 : i32
    %c0_i32_1 = arith.constant 0 : i32
    %c0_i32_2 = arith.constant 0 : i32
    return %arg0, %arg1, %c0_i32, %c0_i32_0, %c0_i32_1 : i32, i32, i32, i32, i32
  }
  func.func @transform_2(%arg0: i32, %arg1: i32) -> (i32, i32, i32, i32, i32) {
    %c0_i32 = arith.constant 0 : i32
    %c0_i32_0 = arith.constant 0 : i32
    %c0_i32_1 = arith.constant 0 : i32
    %c0_i32_2 = arith.constant 0 : i32
    return %arg0, %c0_i32, %arg1, %c0_i32_0, %c0_i32_1 : i32, i32, i32, i32, i32
  }
}

</mosaic_0001>

<bundles_post_ra>
// kernel: tpu_custom_call.1
= control target key start
LH: loop header
LB: loop body
LE: loop exit
PB: predicated region body
PF: predicated region fallthrough
CT: control target
= control target key end

     0   :  { %7 = vsyncpa [#allocation4], 0  ;;  %s5027_s0 = inlined_call_operand.hbm [shape: f32[2,5,16,8,16], index: 0, kind: input, shape index: {}]   ;;  %s5028_s1 = inlined_call_operand.hbm [shape: f32[2,1,6,8,16], index: 1, kind: input, shape index: {}]   ;;  %s5029_s2 = inlined_call_operand.hbm [shape: f32[2,5,16,8,16], index: 2, kind: output, shape index: {}]  }
   0x1   :  { %9 = vsyncpa [#allocation4 + $0x1], 0 }
   0x2   :  { %10 = vsyncpa [#allocation7], 0 }
   0x3   :  { %12 = vsyncpa [#allocation7 + $0x1], 0 }
   0x4   :  { %13 = vsyncpa [#allocation5], 0 }
   0x5   :  { %15 = vsyncpa [#allocation5 + $0x1], 0  ;;  %s3155_s9 = smov 0   ;;  %s3157_s10 = smov 0  }
   0x6   :  { %s3159_s11 = smov 0   ;;  %s3161_s12 = smov 0  }
   0x7   :  { %s3163_s13 = smov 0   ;;  %s3165_s14 = smov 0  }
   0x8 LB: > { %s2756_s15 = sadd.s32 4294967295, %s3126_s14   ;;  %s2757_s16 = sadd.s32 4294967294, %s3126_s14   ;;  %s3126_s14 = sphi %s3165_s14, %s21_s14   ;;  %s3122_s13 = sphi %s3163_s13, %s5178_s13   ;;  %s3118_s12 = sphi %s3161_s12, %s5177_s12   ;;  %s3114_s11 = sphi %s3159_s11, %s5176_s11   ;;  %s3110_s10 = sphi %s3157_s10, %s5175_s10   ;;  %s3106_s9 = sphi %s3155_s9, %s5174_s9  }
   0x9   : > { %s33_s17 = sadd.s32 1, %s3122_s13  ;;  %s42_s18 = sadd.s32 1, %s3114_s11 }
   0xa   : > { %p35_p0 = scmp.ge.s32.totalorder %s33_s17, 2  ;;  %p49_p1 = scmp.ne.s32.totalorder %s3114_s11, %s3110_s10 }
   0xb   : > { %p50_p2 = scmp.eq.s32.totalorder %s3126_s14, 0  ;;  %p55_p3 = scmp.ne.s32.totalorder %s3110_s10, %s3106_s9 }
   0xc   : > { %s5180_s17 = smov (%p35_p0, %s33_s17), 0  ;;  %p56_p5 = scmp.eq.s32.totalorder %s2756_s15, 0 }
   0xd   : > { %p3196_p4 = por %p50_p2, %p49_p1  ;;  %s37_s20 = ssub.s32 %s3122_s13, %s5180_s17 }
   0xe   : > { %p109_p6 = scmp.eq.s32.totalorder %s2756_s15, 1  ;;  %p40_p7 = scmp.eq.s32.totalorder %s37_s20, 0 }
   0xf   : > { %p3202_p8 = por %p56_p5, %p55_p3  ;;  %p115_p10 = scmp.eq.s32.totalorder %s2757_s16, 1 }
  0x10   : > { %p3206_p9 = por %p109_p6, %p49_p1  ;;  %p2759_p12 = scmp.ge.s32.totalorder %s3126_s14, 2 }
  0x11   : > { %s3211_s23 = scalar_select %p40_p7, %s3114_s11, %s42_s18  }
  0x12   : > { %p3213_p11 = por %p115_p10, %p55_p3  ;;  %p2918_p13 = scmp.lt.s32.totalorder %s3126_s14, 2 }
  0x13   : > { %s3220_s25 = sand.u32 1, %s3114_s11   ;;  %s2895_s27 = smul.u32 640, %s3122_s13 }
  0x14   : > { %s2894_s26 = smul.u32 640, %s3220_s25  ;;  %p3226_p0 = pnand %p2918_p13, %p3196_p4 }
  0x15   : > { %s146_s3 = scalar_lea.hbm %s5027_s0, %s2895_s27  ;;  %p2762_p1 = scmp.ge.s32.totalorder %s3126_s14, 1 }
  0x16   : > { %s139_s4 = scalar_lea.vmem [#allocation3], %s2894_s26  ;;  %s147_s6 = sshll.u32 %s146_s3, 4  ;;  %s148_s6 = int_to_ptr.hbm [resolvable:$true] %s147_s6 }
  0x17   : > { %s149_s5 = sshll.u32 %s139_s4, 4  ;;  %s136_s7 = scalar_lea.sflag [#allocation4], %s3220_s25  ;;  %s150_s5 = int_to_ptr.vmem [resolvable:$true] %s149_s5 }
  0x18   : > { %s3128_s8 = smov 128   ;;  %s3129_s15 = smov 8  }
  0x19   : > { %2910 = dma.hbm_to_vmem [thread:$0]  (!%p3226_p0), %s148_s6, 10240, %s150_s5, %s136_s7, %s3128_s8, %s3128_s8, %s3129_s15  }
  0x1a   : > { %p181_p2 = scmp.lt.s32.totalorder %s3126_s14, 3  ;;  %s2896_s16 = smul.u32 48, %s3220_s25 }
  0x1b   : > { %s2897_s18 = smul.u32 48, %s3122_s13  ;;  %s160_s3 = scalar_lea.sflag [#allocation7], %s3220_s25 }
  0x1c   : > { %p182_p3 = pnand %p2762_p1, %p181_p2  ;;  %s163_s27 = scalar_lea.vmem [#allocation6], %s2896_s16 }
  0x1d   : > { %s170_s26 = scalar_lea.hbm %s5028_s1, %s2897_s18  ;;  %s173_s29 = sshll.u32 %s163_s27, 4  ;;  %s174_s29 = int_to_ptr.vmem [resolvable:$true] %s173_s29 }
  0x1e   : > { %s171_s30 = sshll.u32 %s170_s26, 4  ;;  %185 = sbr.rel (%p182_p3) target bundleno = 811 (0x32b), region = 28  ;;  %s172_s30 = int_to_ptr.hbm [resolvable:$true] %s171_s30 }
  0x1f   : > { %2913 = dma.hbm_to_vmem [thread:$0]  (!%p3226_p0), %s172_s30, 768, %s174_s29, %s160_s3, %s3128_s8, %s3128_s8, %s3129_s15  }
  0x23   : > { %s3247_s4 = sand.u32 1, %s3110_s10  }
  0x24   : > { %s2898_s5 = smul.u32 640, %s3247_s4  ;;  %s188_s6 = scalar_lea.sflag [#allocation4], %s3247_s4 }
  0x26   : > { %s3253_s7 = scalar_lea.vmem [#allocation3], %s2898_s5 }
  0x27   : > { %3093 = dma.done.wait (%p3202_p8), %s188_s6, 10240  }
  0x28   : > { %3095 = vsyncadd (%p3202_p8), %s188_s6, 4294957056  ;;  %s2899_s25 = smul.u32 48, %s3247_s4  ;;  %s198_s28 = scalar_lea.sflag [#allocation7], %s3247_s4 }
  0x2a   : > { %s3261_s8 = scalar_lea.vmem [#allocation6], %s2899_s25 }
  0x2b   : > { %3097 = dma.done.wait (%p3202_p8), %s198_s28, 768  }
  0x2c   : > { %3099 = vsyncadd (%p3202_p8), %s198_s28, 4294966528  ;;  %v369_v0 = vld [vmem:[%s3253_s7 + $0x10] sm:$0xff]  ;;  %v367_v4 = vld [vmem:[%s3253_s7] sm:$0xff]  ;;  %s3130_s21 = smov 3   ;;  %vm230_vm0 = vcmask 174080   ;;  %vm275_vm1 = vcmask 23552  }
  0x2d   : > { %v2765_v1 = vld [vmem:[%s3253_s7 + $0x90] sm:$0xff]  ;;  %v2763_v6 = vld [vmem:[%s3253_s7 + $0x80] sm:$0xff]  ;;  %v370_v10 = vld [vmem:[%s3253_s7 + $0x18] sm:$0xff]  ;;  %vm277_vm2 = vcmask 21504   ;;  %vm321_vm3 = vcmask 179352   ;;  %vm323_vm4 = vcmask 177304  }
  0x2e   : > { %v2781_v2 = vld [vmem:[%s3253_s7 + $0x110] sm:$0xff]  ;;  %v402_v3 = vadd.f32 %v2765_v1, %v369_v0  ;;  %v2779_v7 = vld [vmem:[%s3253_s7 + $0x100] sm:$0xff]  ;;  %v400_v9 = vadd.f32 %v2763_v6, %v367_v4  ;;  %v2766_v11 = vld [vmem:[%s3253_s7 + $0x98] sm:$0xff]  ;;  %vm580_vm5 = vcmask 154648   ;;  %vm1126_vm6 = vcmask 1046528   ;;  %s3132_s15 = smov 125  }
  0x2f   : > { %v2797_v5 = vld [vmem:[%s3253_s7 + $0x190] sm:$0xff]  ;;  %v2795_v13 = vld [vmem:[%s3253_s7 + $0x180] sm:$0xff]  ;;  %v403_v14 = vadd.f32 %v2766_v11, %v370_v10  ;;  %v2782_v15 = vld [vmem:[%s3253_s7 + $0x118] sm:$0xff]  ;;  %vm1271_vm7 = vcmask 1045504   ;;  %vm1416_vm8 = vcmask 1044480   ;;  %vm1561_vm9 = vcmask 1043456  }
  0x30   : > { %v435_v8 = vadd.f32 %v2781_v2, %v402_v3  ;;  %v2813_v12 = vld [vmem:[%s3253_s7 + $0x210] sm:$0xff]  ;;  %v433_v17 = vadd.f32 %v2779_v7, %v400_v9  ;;  %v368_v18 = vld [vmem:[%s3253_s7 + $0x8] sm:$0xff]  ;;  %v2811_v21 = vld [vmem:[%s3253_s7 + $0x200] sm:$0xff]  ;;  %vm1706_vm10 = vcmask 1042432   ;;  %vm1851_vm11 = vcmask 1041408   ;;  %s3133_s16 = smov 126  }
  0x31   : > { %v2764_v19 = vld [vmem:[%s3253_s7 + $0x88] sm:$0xff]  ;;  %v436_v22 = vadd.f32 %v2782_v15, %v403_v14  ;;  %v2798_v23 = vld [vmem:[%s3253_s7 + $0x198] sm:$0xff]  ;;  %v373_v31 = vld [vmem:[%s3253_s7 + $0x30] sm:$0xff]  ;;  %s3134_s18 = smov 127   ;;  %s3135_s19 = smov 124   ;;  %vm2540_vm12 = vcmask 130048  }
  0x32   : > { %v468_v16 = vadd.f32 %v2797_v5, %v435_v8  ;;  %v2780_v20 = vld [vmem:[%s3253_s7 + $0x108] sm:$0xff]  ;;  %v401_v24 = vadd.f32 %v2764_v19, %v368_v18  ;;  %v374_v25 = vld [vmem:[%s3253_s7 + $0x38] sm:$0xff]  ;;  %v466_v27 = vadd.f32 %v2795_v13, %v433_v17  ;;  %v2769_v32 = vld [vmem:[%s3253_s7 + $0xb0] sm:$0xff]  ;;  %s3136_s20 = smov 123   ;;  %s3137_s26 = smov 122  }
  0x33   : > { %v2770_v28 = vld [vmem:[%s3253_s7 + $0xb8] sm:$0xff]  ;;  %v2796_v30 = vld [vmem:[%s3253_s7 + $0x188] sm:$0xff]  ;;  %v469_v34 = vadd.f32 %v2798_v23, %v436_v22  ;;  %v371_v38 = vld [vmem:[%s3253_s7 + $0x20] sm:$0xff]  ;;  %v406_v42 = vadd.f32 %v2769_v32, %v373_v31  ;;  %s4791_s27 = scalar_lea.vmem [#allocation8], %s2898_s5  ;;  %s2900_s29 = smul.u32 640, %s3118_s12 }
  0x34   : > { %v3285_v26 = vadd.f32 %v2813_v12, %v468_v16  ;;  %v434_v29 = vadd.f32 %v2780_v20, %v401_v24  ;;  %v3293_v33 = vadd.f32 %v2811_v21, %v466_v27  ;;  %v2814_v35 = vld [vmem:[%s3253_s7 + $0x218] sm:$0xff]  ;;  %v407_v36 = vadd.f32 %v2770_v28, %v374_v25  ;;  %v2767_v39 = vld [vmem:[%s3253_s7 + $0xa0] sm:$0xff]  ;;  %v2812_v44 = vld [vmem:[%s3253_s7 + $0x208] sm:$0xff]  ;;  %s2640_s12 = sshll.u32 %s4791_s27, 4  ;;  %s2641_s12 = int_to_ptr.vmem [resolvable:$true] %s2640_s12 }
  0x35   : > { %v2786_v37 = vld [vmem:[%s3253_s7 + $0x138] sm:$0xff]  ;;  %v2783_v40 = vld [vmem:[%s3253_s7 + $0x120] sm:$0xff]  ;;  %v404_v43 = vadd.f32 %v2767_v39, %v371_v38  ;;  %v2785_v45 = vld [vmem:[%s3253_s7 + $0x130] sm:$0xff]  ;;  %v3305_v47 = vadd.f32 %v2814_v35, %v469_v34  ;;  %s2639_s5 = scalar_lea.hbm %s5029_s2, %s2900_s29 }
  0x36   : > { %5066 = vst [vmem:[#allocation12_spill] sm:$0xff] %v3285_v26  ;;  %535 = vrot.lane.b32.xlu1 %v3285_v26, %s3130_s21  ;;  %531 = vrot.lane.b32.xlu0 %v3293_v33, %s3130_s21  ;;  %v467_v41 = vadd.f32 %v2796_v30, %v434_v29  ;;  %v2799_v46 = vld [vmem:[%s3253_s7 + $0x1a0] sm:$0xff]  ;;  %v440_v48 = vadd.f32 %v2786_v37, %v407_v36  ;;  %v2802_v49 = vld [vmem:[%s3253_s7 + $0x1b8] sm:$0xff]  ;;  %s2642_s6 = sshll.u32 %s2639_s5, 4  ;;  %s2643_s6 = int_to_ptr.hbm [resolvable:$true] %s2642_s6 }
  0x37   : > { %5067 = vst [vmem:[#allocation13_spill] sm:$0xff] %v3293_v33  ;;  %v437_v50 = vadd.f32 %v2783_v40, %v404_v43  ;;  %v2815_v51 = vld [vmem:[%s3253_s7 + $0x220] sm:$0xff]  ;;  %v377_v52 = vld [vmem:[%s3253_s7 + $0x50] sm:$0xff]  ;;  %v439_v55 = vadd.f32 %v2785_v45, %v406_v42  ;;  %v372_v57 = vld [vmem:[%s3253_s7 + $0x28] sm:$0xff]  ;;  %s3054_s25 = sshra.s32 %s2643_s6, 4  ;;  %s3055_s25 = int_to_ptr.hbm [resolvable:$true] %s3054_s25 }
  0x38   : > { %5068 = vst [vmem:[#allocation14_spill] sm:$0xff] %v3305_v47  ;;  %v2773_v53 = vld [vmem:[%s3253_s7 + $0xd0] sm:$0xff]  ;;  %v3311_v54 = vadd.f32 %v2812_v44, %v467_v41  ;;  %v2768_v58 = vld [vmem:[%s3253_s7 + $0xa8] sm:$0xff]  ;;  %v473_v0 = vadd.f32 %v2802_v49, %v440_v48  ;;  %v2818_v4 = vld [vmem:[%s3253_s7 + $0x238] sm:$0xff]  ;;  %s3056_s28 = scalar_lea.hbm %s3055_s25, 640  ;;  %p3061_p7 = scmp.lt.s32.totalorder %s3055_s25, %s5029_s2 }
  0x39   : > { %v470_v56 = vadd.f32 %v2799_v46, %v437_v50  ;;  %v2784_v59 = vld [vmem:[%s3253_s7 + $0x128] sm:$0xff]  ;;  %v2801_v60 = vld [vmem:[%s3253_s7 + $0x1b0] sm:$0xff]  ;;  %v405_v63 = vadd.f32 %v2768_v58, %v372_v57  ;;  %v410_v2 = vadd.f32 %v2773_v53, %v377_v52  ;;  %v375_v19 = vld [vmem:[%s3253_s7 + $0x40] sm:$0xff]  ;;  %p3057_p4 = scmp.ne.s32.totalorder %s3055_s25, %s3056_s28 }
  0x3a   : > { %5069 = vst [vmem:[#allocation15_spill] sm:$0xff] %v3311_v54  ;;  %v376_v61 = vld [vmem:[%s3253_s7 + $0x48] sm:$0xff]  ;;  %v2789_v5 = vld [vmem:[%s3253_s7 + $0x150] sm:$0xff]  ;;  %v472_v7 = vadd.f32 %v2801_v60, %v439_v55  ;;  %v3333_v13 = vadd.f32 %v2818_v4, %v473_v0  ;;  %v2771_v20 = vld [vmem:[%s3253_s7 + $0xc0] sm:$0xff] }
  0x3b   : > { %v2772_v62 = vld [vmem:[%s3253_s7 + $0xc8] sm:$0xff]  ;;  %v3321_v1 = vadd.f32 %v2815_v51, %v470_v56  ;;  %v438_v6 = vadd.f32 %v2784_v59, %v405_v63  ;;  %v2817_v9 = vld [vmem:[%s3253_s7 + $0x230] sm:$0xff]  ;;  %v443_v14 = vadd.f32 %v2789_v5, %v410_v2  ;;  %v379_v24 = vld [vmem:[%s3253_s7 + $0x60] sm:$0xff]  ;;  %v408_v27 = vadd.f32 %v2771_v20, %v375_v19  ;;  %p3058_p5 = pnand %p3057_p4, %p3206_p9 }
  0x3c   : > { %v2800_v3 = vld [vmem:[%s3253_s7 + $0x1a8] sm:$0xff]  ;;  %v409_v8 = vadd.f32 %v2772_v62, %v376_v61  ;;  %5071 = vst [vmem:[#allocation17_spill] sm:$0xff] %v3333_v13  ;;  %v2805_v15 = vld [vmem:[%s3253_s7 + $0x1d0] sm:$0xff]  ;;  %v3341_v21 = vadd.f32 %v2817_v9, %v472_v7  ;;  %v2775_v25 = vld [vmem:[%s3253_s7 + $0xe0] sm:$0xff] }
  0x3d   : > { %5070 = vst [vmem:[#allocation16_spill] sm:$0xff] %v3321_v1  ;;  %539 = vrot.lane.b32.xlu2 %v3321_v1, %s3130_s21  ;;  %v2788_v10 = vld [vmem:[%s3253_s7 + $0x148] sm:$0xff]  ;;  %v471_v11 = vadd.f32 %v2800_v3, %v438_v6  ;;  %v2787_v28 = vld [vmem:[%s3253_s7 + $0x140] sm:$0xff]  ;;  %v378_v30 = vld [vmem:[%s3253_s7 + $0x58] sm:$0xff]  ;;  %v476_v32 = vadd.f32 %v2805_v15, %v443_v14  ;;  %v412_v38 = vadd.f32 %v2775_v25, %v379_v24  ;;  %p3059_p6 = pneg %p3058_p5 }
  0x3e   : > { %537 = vrot.lane.b32.xlu1 %v3305_v47, %s3130_s21  ;;  %533 = vrot.lane.b32.xlu0 %v3311_v54, %s3130_s21  ;;  %v2816_v12 = vld [vmem:[%s3253_s7 + $0x228] sm:$0xff]  ;;  %5072 = vst [vmem:[#allocation18_spill] sm:$0xff] %v3341_v21  ;;  %v442_v22 = vadd.f32 %v2788_v10, %v409_v8  ;;  %v2803_v29 = vld [vmem:[%s3253_s7 + $0x1c0] sm:$0xff]  ;;  %v441_v35 = vadd.f32 %v2787_v28, %v408_v27  ;;  %v3131_v8 = vmov 0.0  }
  0x3f   : > { %v380_v16 = vld [vmem:[%s3253_s7 + $0x68] sm:$0xff]  ;;  %v3343_v23 = vadd.f32 %v2816_v12, %v471_v11  ;;  %v2774_v31 = vld [vmem:[%s3253_s7 + $0xd8] sm:$0xff]  ;;  %v2821_v36 = vld [vmem:[%s3253_s7 + $0x250] sm:$0xff]  ;;  %238 = vst.msk [vmem:[#allocation2 + $0x70] sm:$0x7] %vm230_vm0, %v3131_v8 }
  0x40   : > { %v2804_v17 = vld [vmem:[%s3253_s7 + $0x1c8] sm:$0xff]  ;;  %v2791_v40 = vld [vmem:[%s3253_s7 + $0x160] sm:$0xff]  ;;  %v474_v41 = vadd.f32 %v2803_v29, %v441_v35  ;;  %v411_v42 = vadd.f32 %v2774_v31, %v378_v30  ;;  %v2790_v45 = vld [vmem:[%s3253_s7 + $0x158] sm:$0xff]  ;;  %v3363_v46 = vadd.f32 %v2821_v36, %v476_v32  ;;  %260 = vst.msk [vmem:[#allocation2 + $0x7b] sm:$0x7] %vm230_vm0, %v3131_v8 }
  0x41   : > { %v2776_v18 = vld [vmem:[%s3253_s7 + $0xe8] sm:$0xff]  ;;  %5073 = vst [vmem:[#allocation19_spill] sm:$0xff] %v3343_v23  ;;  %v475_v39 = vadd.f32 %v2804_v17, %v442_v22  ;;  %v2819_v44 = vld [vmem:[%s3253_s7 + $0x240] sm:$0xff]  ;;  %v445_v50 = vadd.f32 %v2791_v40, %v412_v38  ;;  %v382_v53 = vld [vmem:[%s3253_s7 + $0x78] sm:$0xff] }
  0x42   : > { %v413_v34 = vadd.f32 %v2776_v18, %v380_v16  ;;  %v2792_v37 = vld [vmem:[%s3253_s7 + $0x168] sm:$0xff]  ;;  %5074 = vst [vmem:[#allocation20_spill] sm:$0xff] %v3363_v46  ;;  %v2807_v52 = vld [vmem:[%s3253_s7 + $0x1e0] sm:$0xff]  ;;  %v2778_v55 = vld [vmem:[%s3253_s7 + $0xf8] sm:$0xff]  ;;  %v3371_v56 = vadd.f32 %v2819_v44, %v474_v41  ;;  %v444_v57 = vadd.f32 %v2790_v45, %v411_v42 }
  0x43   : > { %v2820_v43 = vld [vmem:[%s3253_s7 + $0x248] sm:$0xff]  ;;  %v2806_v58 = vld [vmem:[%s3253_s7 + $0x1d8] sm:$0xff]  ;;  %v381_v59 = vld [vmem:[%s3253_s7 + $0x70] sm:$0xff]  ;;  %v478_v63 = vadd.f32 %v2807_v52, %v445_v50  ;;  %v415_v0 = vadd.f32 %v2778_v55, %v382_v53  ;;  %291 = vst.msk [vmem:[#allocation2 + $0x70] sm:$0xff] %vm275_vm1, %v3131_v8 }
  0x44   : > { %v446_v48 = vadd.f32 %v2792_v37, %v413_v34  ;;  %v2808_v49 = vld [vmem:[%s3253_s7 + $0x1e8] sm:$0xff]  ;;  %v3366_v51 = vadd.f32 %v2820_v43, %v475_v39  ;;  %5076 = vst [vmem:[#allocation22_spill] sm:$0xff] %v3371_v56  ;;  %v2777_v60 = vld [vmem:[%s3253_s7 + $0xf0] sm:$0xff]  ;;  %v2794_v2 = vld [vmem:[%s3253_s7 + $0x178] sm:$0xff]  ;;  %v477_v3 = vadd.f32 %v2806_v58, %v444_v57 }
  0x45   : > { %541 = vrot.lane.b32.xlu2 %v3343_v23, %s3130_s21  ;;  %v2824_v62 = vld [vmem:[%s3253_s7 + $0x268] sm:$0xff]  ;;  %v414_v4 = vadd.f32 %v2777_v60, %v381_v59  ;;  %v2823_v5 = vld [vmem:[%s3253_s7 + $0x260] sm:$0xff]  ;;  %v2822_v6 = vld [vmem:[%s3253_s7 + $0x258] sm:$0xff]  ;;  %v448_v10 = vadd.f32 %v2794_v2, %v415_v0  ;;  %292 = vst.msk [vmem:[#allocation2 + $0x78] sm:$0x3f] %vm277_vm2, %v3131_v8 }
  0x46   : > { %545 = vrot.lane.b32.xlu1 %v3333_v13, %s3130_s21  ;;  %543 = vrot.lane.b32.xlu0 %v3341_v21, %s3130_s21  ;;  %5075 = vst [vmem:[#allocation21_spill] sm:$0xff] %v3366_v51  ;;  %v479_v61 = vadd.f32 %v2808_v49, %v446_v48  ;;  %v2793_v7 = vld [vmem:[%s3253_s7 + $0x170] sm:$0xff]  ;;  %v3395_v11 = vadd.f32 %v2823_v5, %v478_v63  ;;  %v2810_v15 = vld [vmem:[%s3253_s7 + $0x1f8] sm:$0xff] }
  0x47   : > { %v3397_v12 = vadd.f32 %v2822_v6, %v477_v3  ;;  %v447_v14 = vadd.f32 %v2793_v7, %v414_v4  ;;  %v2809_v16 = vld [vmem:[%s3253_s7 + $0x1f0] sm:$0xff]  ;;  %337 = vst.msk [vmem:[#allocation2 + $0x70] sm:$0xff] %vm321_vm3, %v3131_v8  ;;  %v481_v17 = vadd.f32 %v2810_v15, %v448_v10  ;;  %v2826_v19 = vld [vmem:[%s3253_s7 + $0x278] sm:$0xff] }
  0x48   : > { %v3389_v9 = vadd.f32 %v2824_v62, %v479_v61  ;;  %5078 = vst [vmem:[#allocation24_spill] sm:$0xff] %v3395_v11  ;;  %v2825_v20 = vld [vmem:[%s3253_s7 + $0x270] sm:$0xff]  ;;  %v600_v27 = vld [vmem:[%s3261_s8 + $0x18] sm:$0xff]  ;;  %v598_v29 = vld [vmem:[%s3261_s8 + $0x8] sm:$0xff]  ;;  %s2626_s7 = scalar_lea.sflag [#allocation5], %s3247_s4 }
  0x49   : > { %5079 = vst [vmem:[#allocation25_spill] sm:$0xff] %v3397_v12  ;;  %v480_v18 = vadd.f32 %v2809_v16, %v447_v14  ;;  %v597_v22 = vld [vmem:[%s3261_s8] sm:$0xff]  ;;  %v3426_v24 = vadd.f32 %v2826_v19, %v481_v17  ;;  %v599_v28 = vld [vmem:[%s3261_s8 + $0x10] sm:$0xff]  ;;  %v602_v30 = vld [vmem:[%s3261_s8 + $0x28] sm:$0xff] }
  0x4a   : > { %5077 = vst [vmem:[#allocation23_spill] sm:$0xff] %v3389_v9  ;;  %v601_v31 = vld [vmem:[%s3261_s8 + $0x20] sm:$0xff] }
  0x4b   : > { %338 = vst.msk [vmem:[#allocation2 + $0x78] sm:$0x3f] %vm323_vm4, %v3131_v8  ;;  %v3428_v25 = vadd.f32 %v2825_v20, %v480_v18 }
  0x4c   : > { %231 = vst.msk [vmem:[#allocation2] sm:$0x7] %vm230_vm0, %v3131_v8 }
  0x4d   : > { %547 = vrot.lane.b32.xlu2 %v3371_v56, %s3130_s21  ;;  %232 = vst.msk [vmem:[#allocation2 + $0x10] sm:$0x7] %vm230_vm0, %v3131_v8 }
  0x4e   : > { %551 = vrot.lane.b32.xlu1 %v3363_v46, %s3130_s21  ;;  %549 = vrot.lane.b32.xlu0 %v3366_v51, %s3130_s21  ;;  %233 = vst.msk [vmem:[#allocation2 + $0x20] sm:$0x7] %vm230_vm0, %v3131_v8 }
  0x4f   : > { %234 = vst.msk [vmem:[#allocation2 + $0x30] sm:$0x7] %vm230_vm0, %v3131_v8 }
  0x50   : > { %235 = vst.msk [vmem:[#allocation2 + $0x40] sm:$0x7] %vm230_vm0, %v3131_v8 }
  0x51   : > { %5080 = vst [vmem:[#allocation26_spill] sm:$0xff] %v3426_v24 }
  0x52   : > { %5081 = vst [vmem:[#allocation27_spill] sm:$0xff] %v3428_v25 }
  0x53   : > { %236 = vst.msk [vmem:[#allocation2 + $0x50] sm:$0x7] %vm230_vm0, %v3131_v8 }
  0x54   : > { %237 = vst.msk [vmem:[#allocation2 + $0x60] sm:$0x7] %vm230_vm0, %v3131_v8 }
  0x55   : > { %553 = vrot.lane.b32.xlu2 %v3397_v12, %s3130_s21  ;;  %239 = vst.msk [vmem:[#allocation2 + $0x80] sm:$0x7] %vm230_vm0, %v3131_v8 }
  0x56   : > { %557 = vrot.lane.b32.xlu1 %v3389_v9, %s3130_s21  ;;  %555 = vrot.lane.b32.xlu0 %v3395_v11, %s3130_s21  ;;  %240 = vst.msk [vmem:[#allocation2 + $0x90] sm:$0x7] %vm230_vm0, %v3131_v8 }
  0x57   : > { %241 = vst.msk [vmem:[#allocation2 + $0xa0] sm:$0x7] %vm230_vm0, %v3131_v8 }
  0x58   : > { %242 = vst.msk [vmem:[#allocation2 + $0xb0] sm:$0x7] %vm230_vm0, %v3131_v8 }
  0x59   : > { %243 = vst.msk [vmem:[#allocation2 + $0xc0] sm:$0x7] %vm230_vm0, %v3131_v8 }
  0x5a   : > { %244 = vst.msk [vmem:[#allocation2 + $0xd0] sm:$0x7] %vm230_vm0, %v3131_v8 }
  0x5b   : > { %245 = vst.msk [vmem:[#allocation2 + $0xe0] sm:$0x7] %vm230_vm0, %v3131_v8 }
  0x5c   : > { %246 = vst.msk [vmem:[#allocation2 + $0xf0] sm:$0x7] %vm230_vm0, %v3131_v8 }
  0x5d   : > { %559 = vrot.lane.b32.xlu2 %v3428_v25, %s3130_s21  ;;  %247 = vst.msk [vmem:[#allocation2 + $0x100] sm:$0x7] %vm230_vm0, %v3131_v8 }
  0x5e   : > { %606 = vrot.lane.b32.xlu1 %v597_v22, %s3130_s21  ;;  %561 = vrot.lane.b32.xlu0 %v3426_v24, %s3130_s21  ;;  %248 = vst.msk [vmem:[#allocation2 + $0x110] sm:$0x7] %vm230_vm0, %v3131_v8 }
  0x5f   : > { %249 = vst.msk [vmem:[#allocation2 + $0x120] sm:$0x7] %vm230_vm0, %v3131_v8 }
  0x60   : > { %250 = vst.msk [vmem:[#allocation2 + $0x130] sm:$0x7] %vm230_vm0, %v3131_v8 }
  0x61   : > { %251 = vst.msk [vmem:[#allocation2 + $0x140] sm:$0x7] %vm230_vm0, %v3131_v8 }
  0x62   : > { %252 = vst.msk [vmem:[#allocation2 + $0x150] sm:$0x7] %vm230_vm0, %v3131_v8 }
  0x63   : > { %253 = vst.msk [vmem:[#allocation2 + $0xb] sm:$0x7] %vm230_vm0, %v3131_v8 }
  0x64   : > { %254 = vst.msk [vmem:[#allocation2 + $0x1b] sm:$0x7] %vm230_vm0, %v3131_v8 }
  0x65   : > { %608 = vrot.lane.b32.xlu2 %v598_v29, %s3130_s21  ;;  %255 = vst.msk [vmem:[#allocation2 + $0x2b] sm:$0x7] %vm230_vm0, %v3131_v8 }
  0x66   : > { %621 = vrot.lane.b32.xlu1 %v600_v27, %s3130_s21  ;;  %610 = vrot.lane.b32.xlu0 %v599_v28, %s3130_s21  ;;  %256 = vst.msk [vmem:[#allocation2 + $0x3b] sm:$0x7] %vm230_vm0, %v3131_v8 }
  0x67   : > { %257 = vst.msk [vmem:[#allocation2 + $0x4b] sm:$0x7] %vm230_vm0, %v3131_v8 }
  0x68   : > { %258 = vst.msk [vmem:[#allocation2 + $0x5b] sm:$0x7] %vm230_vm0, %v3131_v8 }
  0x69   : > { %259 = vst.msk [vmem:[#allocation2 + $0x6b] sm:$0x7] %vm230_vm0, %v3131_v8 }
  0x6a   : > { %261 = vst.msk [vmem:[#allocation2 + $0x8b] sm:$0x7] %vm230_vm0, %v3131_v8 }
  0x6b   : > { %262 = vst.msk [vmem:[#allocation2 + $0x9b] sm:$0x7] %vm230_vm0, %v3131_v8 }
  0x6c   : > { %263 = vst.msk [vmem:[#allocation2 + $0xab] sm:$0x7] %vm230_vm0, %v3131_v8 }
  0x6d   : > { %623 = vrot.lane.b32.xlu2 %v601_v31, %s3130_s21  ;;  %264 = vst.msk [vmem:[#allocation2 + $0xbb] sm:$0x7] %vm230_vm0, %v3131_v8 }
  0x6e   : > { %625 = vrot.lane.b32.xlu0 %v602_v30, %s3130_s21  ;;  %265 = vst.msk [vmem:[#allocation2 + $0xcb] sm:$0x7] %vm230_vm0, %v3131_v8 }
  0x6f   : > { %266 = vst.msk [vmem:[#allocation2 + $0xdb] sm:$0x7] %vm230_vm0, %v3131_v8 }
  0x70   : > { %267 = vst.msk [vmem:[#allocation2 + $0xeb] sm:$0x7] %vm230_vm0, %v3131_v8 }
  0x71   : > { %268 = vst.msk [vmem:[#allocation2 + $0xfb] sm:$0x7] %vm230_vm0, %v3131_v8 }
  0x72   : > { %269 = vst.msk [vmem:[#allocation2 + $0x10b] sm:$0x7] %vm230_vm0, %v3131_v8 }
  0x73   : > { %270 = vst.msk [vmem:[#allocation2 + $0x11b] sm:$0x7] %vm230_vm0, %v3131_v8 }
  0x74   : > { %271 = vst.msk [vmem:[#allocation2 + $0x12b] sm:$0x7] %vm230_vm0, %v3131_v8 }
  0x75   : > { %272 = vst.msk [vmem:[#allocation2 + $0x13b] sm:$0x7] %vm230_vm0, %v3131_v8 }
  0x76   : > { %273 = vst.msk [vmem:[#allocation2 + $0x14b] sm:$0x7] %vm230_vm0, %v3131_v8 }
  0x77   : > { %274 = vst.msk [vmem:[#allocation2 + $0x15b] sm:$0x7] %vm230_vm0, %v3131_v8 }
  0x78   : > { %287 = vst.msk [vmem:[#allocation2 + $0x50] sm:$0xff] %vm275_vm1, %v3131_v8 }
  0x79   : > { %288 = vst.msk [vmem:[#allocation2 + $0x58] sm:$0x3f] %vm277_vm2, %v3131_v8 }
  0x7a   : > { %333 = vst.msk [vmem:[#allocation2 + $0x50] sm:$0xff] %vm321_vm3, %v3131_v8 }
  0x7b   : > { %334 = vst.msk [vmem:[#allocation2 + $0x58] sm:$0x3f] %vm323_vm4, %v3131_v8 }
  0x7c   : > { %276 = vst.msk [vmem:[#allocation2] sm:$0xff] %vm275_vm1, %v3131_v8 }
  0x7d   : > { %278 = vst.msk [vmem:[#allocation2 + $0x8] sm:$0x3f] %vm277_vm2, %v3131_v8 }
  0x7e   : > { %279 = vst.msk [vmem:[#allocation2 + $0x10] sm:$0xff] %vm275_vm1, %v3131_v8 }
  0x7f   : > { %280 = vst.msk [vmem:[#allocation2 + $0x18] sm:$0x3f] %vm277_vm2, %v3131_v8 }
  0x80   : > { %281 = vst.msk [vmem:[#allocation2 + $0x20] sm:$0xff] %vm275_vm1, %v3131_v8 }
  0x81   : > { %282 = vst.msk [vmem:[#allocation2 + $0x28] sm:$0x3f] %vm277_vm2, %v3131_v8 }
  0x82   : > { %283 = vst.msk [vmem:[#allocation2 + $0x30] sm:$0xff] %vm275_vm1, %v3131_v8 }
  0x83   : > { %284 = vst.msk [vmem:[#allocation2 + $0x38] sm:$0x3f] %vm277_vm2, %v3131_v8 }
  0x84   : > { %285 = vst.msk [vmem:[#allocation2 + $0x40] sm:$0xff] %vm275_vm1, %v3131_v8 }
  0x85   : > { %286 = vst.msk [vmem:[#allocation2 + $0x48] sm:$0x3f] %vm277_vm2, %v3131_v8 }
  0x86   : > { %289 = vst.msk [vmem:[#allocation2 + $0x60] sm:$0xff] %vm275_vm1, %v3131_v8 }
  0x87   : > { %290 = vst.msk [vmem:[#allocation2 + $0x68] sm:$0x3f] %vm277_vm2, %v3131_v8 }
  0x88   : > { %293 = vst.msk [vmem:[#allocation2 + $0x80] sm:$0xff] %vm275_vm1, %v3131_v8 }
  0x89   : > { %294 = vst.msk [vmem:[#allocation2 + $0x88] sm:$0x3f] %vm277_vm2, %v3131_v8 }
  0x8a   : > { %295 = vst.msk [vmem:[#allocation2 + $0x90] sm:$0xff] %vm275_vm1, %v3131_v8 }
  0x8b   : > { %296 = vst.msk [vmem:[#allocation2 + $0x98] sm:$0x3f] %vm277_vm2, %v3131_v8 }
  0x8c   : > { %297 = vst.msk [vmem:[#allocation2 + $0xa0] sm:$0xff] %vm275_vm1, %v3131_v8 }
  0x8d   : > { %298 = vst.msk [vmem:[#allocation2 + $0xa8] sm:$0x3f] %vm277_vm2, %v3131_v8 }
  0x8e   : > { %299 = vst.msk [vmem:[#allocation2 + $0xb0] sm:$0xff] %vm275_vm1, %v3131_v8 }
  0x8f   : > { %300 = vst.msk [vmem:[#allocation2 + $0xb8] sm:$0x3f] %vm277_vm2, %v3131_v8 }
  0x90   : > { %301 = vst.msk [vmem:[#allocation2 + $0xc0] sm:$0xff] %vm275_vm1, %v3131_v8 }
  0x91   : > { %302 = vst.msk [vmem:[#allocation2 + $0xc8] sm:$0x3f] %vm277_vm2, %v3131_v8 }
  0x92   : > { %303 = vst.msk [vmem:[#allocation2 + $0xd0] sm:$0xff] %vm275_vm1, %v3131_v8 }
  0x93   : > { %304 = vst.msk [vmem:[#allocation2 + $0xd8] sm:$0x3f] %vm277_vm2, %v3131_v8 }
  0x94   : > { %305 = vst.msk [vmem:[#allocation2 + $0xe0] sm:$0xff] %vm275_vm1, %v3131_v8 }
  0x95   : > { %306 = vst.msk [vmem:[#allocation2 + $0xe8] sm:$0x3f] %vm277_vm2, %v3131_v8 }
  0x96   : > { %307 = vst.msk [vmem:[#allocation2 + $0xf0] sm:$0xff] %vm275_vm1, %v3131_v8 }
  0x97   : > { %v540_v32 = vpop.permute.xlu2 %539  ;;  %308 = vst.msk [vmem:[#allocation2 + $0xf8] sm:$0x3f] %vm277_vm2, %v3131_v8 }
  0x98   : > { %585 = vst.msk [vmem:[#allocation2 + $0x73] sm:$0xff] %vm580_vm5, %v540_v32 }
  0x99   : > { %309 = vst.msk [vmem:[#allocation2 + $0x100] sm:$0xff] %vm275_vm1, %v3131_v8 }
  0x9a   : > { %310 = vst.msk [vmem:[#allocation2 + $0x108] sm:$0x3f] %vm277_vm2, %v3131_v8 }
  0x9b   : > { %311 = vst.msk [vmem:[#allocation2 + $0x110] sm:$0xff] %vm275_vm1, %v3131_v8 }
  0x9c   : > { %312 = vst.msk [vmem:[#allocation2 + $0x118] sm:$0x3f] %vm277_vm2, %v3131_v8 }
  0x9d   : > { %313 = vst.msk [vmem:[#allocation2 + $0x120] sm:$0xff] %vm275_vm1, %v3131_v8 }
  0x9e   : > { %314 = vst.msk [vmem:[#allocation2 + $0x128] sm:$0x3f] %vm277_vm2, %v3131_v8 }
  0x9f   : > { %315 = vst.msk [vmem:[#allocation2 + $0x130] sm:$0xff] %vm275_vm1, %v3131_v8  ;;  %v3674_v38 = vld [vmem:[#allocation2 + $0x70] sm:$0xff]  ;;  %v3678_v39 = vld [vmem:[#allocation2 + $0x78] sm:$0x3f]  ;;  %v542_v41 = vpop.permute.xlu2 %541 }
  0xa0   : > { %316 = vst.msk [vmem:[#allocation2 + $0x138] sm:$0x3f] %vm277_vm2, %v3131_v8  ;;  %v690_v43 = vmul.f32 0.8007374, %v3674_v38  ;;  %v3688_v44 = vmul.f32 0.8007374, %v3678_v39 }
  0xa1   : > { %317 = vst.msk [vmem:[#allocation2 + $0x140] sm:$0xff] %vm275_vm1, %v3131_v8  ;;  %v3691_v45 = vmul.f32 0.41111228, %v3674_v38  ;;  %v3696_v48 = vmul.f32 0.41111228, %v3678_v39 }
  0xa2   : > { %318 = vst.msk [vmem:[#allocation2 + $0x148] sm:$0x3f] %vm277_vm2, %v3131_v8  ;;  %v3699_v49 = vmul.f32 0.0285655, %v3674_v38  ;;  %v3704_v50 = vmul.f32 0.0285655, %v3678_v39 }
  0xa3   : > { %319 = vst.msk [vmem:[#allocation2 + $0x150] sm:$0xff] %vm275_vm1, %v3131_v8  ;;  %v3707_v52 = vmul.f32 0.00033546262, %v3674_v38  ;;  %v3712_v53 = vmul.f32 0.00033546262, %v3678_v39 }
  0xa4   : > { %320 = vst.msk [vmem:[#allocation2 + $0x158] sm:$0x3f] %vm277_vm2, %v3131_v8  ;;  %v814_v20 = vmul.f32 0.13533528, %v3674_v38  ;;  %v815_v22 = vmul.f32 0.13533528, %v3678_v39 }
  0xa5   : > { %329 = vst.msk [vmem:[#allocation2 + $0x30] sm:$0xff] %vm321_vm3, %v3131_v8 }
  0xa6   : > { %330 = vst.msk [vmem:[#allocation2 + $0x38] sm:$0x3f] %vm323_vm4, %v3131_v8 }
  0xa7   : > { %322 = vst.msk [vmem:[#allocation2] sm:$0xff] %vm321_vm3, %v3131_v8  ;;  %v548_v0 = vpop.permute.xlu2 %547 }
  0xa8   : > { %v536_v34 = vpop.permute.xlu1 %535  ;;  %v532_v35 = vpop.permute.xlu0 %531  ;;  %324 = vst.msk [vmem:[#allocation2 + $0x8] sm:$0x3f] %vm323_vm4, %v3131_v8 }
  0xa9   : > { %583 = vst.msk [vmem:[#allocation2 + $0x53] sm:$0xff] %vm580_vm5, %v536_v34 }
  0xaa   : > { %581 = vst.msk [vmem:[#allocation2 + $0x33] sm:$0xff] %vm580_vm5, %v532_v35 }
  0xab   : > { %325 = vst.msk [vmem:[#allocation2 + $0x10] sm:$0xff] %vm321_vm3, %v3131_v8 }
  0xac   : > { %326 = vst.msk [vmem:[#allocation2 + $0x18] sm:$0x3f] %vm323_vm4, %v3131_v8 }
  0xad   : > { %327 = vst.msk [vmem:[#allocation2 + $0x20] sm:$0xff] %vm321_vm3, %v3131_v8 }
  0xae   : > { %328 = vst.msk [vmem:[#allocation2 + $0x28] sm:$0x3f] %vm323_vm4, %v3131_v8 }
  0xaf   : > { %331 = vst.msk [vmem:[#allocation2 + $0x40] sm:$0xff] %vm321_vm3, %v3131_v8  ;;  %v554_v25 = vpop.permute.xlu2 %553 }
  0xb0   : > { %332 = vst.msk [vmem:[#allocation2 + $0x48] sm:$0x3f] %vm323_vm4, %v3131_v8  ;;  %v538_v36 = vpop.permute.xlu1 %537  ;;  %v534_v37 = vpop.permute.xlu0 %533  ;;  %v3714_v55 = vld [vmem:[#allocation2 + $0x50] sm:$0xff]  ;;  %v3718_v57 = vld [vmem:[#allocation2 + $0x58] sm:$0x3f] }
  0xb1   : > { %335 = vst.msk [vmem:[#allocation2 + $0x60] sm:$0xff] %vm321_vm3, %v3131_v8  ;;  %v3721_v58 = vmul.f32 0.41111228, %v3714_v55  ;;  %v3725_v59 = vmul.f32 0.41111228, %v3718_v57  ;;  %v3727_v60 = vld [vmem:[#allocation2 + $0x30] sm:$0xff] }
  0xb2   : > { %336 = vst.msk [vmem:[#allocation2 + $0x68] sm:$0x3f] %vm323_vm4, %v3131_v8  ;;  %v3729_v61 = vld [vmem:[#allocation2 + $0x38] sm:$0x3f]  ;;  %v3733_v62 = vmul.f32 0.0285655, %v3714_v55 }
  0xb3   : > { %339 = vst.msk [vmem:[#allocation2 + $0x80] sm:$0xff] %vm321_vm3, %v3131_v8  ;;  %v3736_v63 = vmul.f32 0.0285655, %v3718_v57  ;;  %v3740_v2 = vmul.f32 0.0038659202, %v3714_v55 }
  0xb4   : > { %340 = vst.msk [vmem:[#allocation2 + $0x88] sm:$0x3f] %vm323_vm4, %v3131_v8  ;;  %v3743_v3 = vmul.f32 0.0038659202, %v3718_v57  ;;  %v3747_v5 = vmul.f32 0.8007374, %v3727_v60 }
  0xb5   : > { %341 = vst.msk [vmem:[#allocation2 + $0x90] sm:$0xff] %vm321_vm3, %v3131_v8  ;;  %v3750_v6 = vmul.f32 0.8007374, %v3729_v61  ;;  %v3757_v10 = vmul.f32 0.41111228, %v3729_v61 }
  0xb6   : > { %342 = vst.msk [vmem:[#allocation2 + $0x98] sm:$0x3f] %vm323_vm4, %v3131_v8  ;;  %v3761_v14 = vmul.f32 0.13533528, %v3727_v60  ;;  %v3764_v15 = vmul.f32 0.13533528, %v3729_v61 }
  0xb7   : > { %343 = vst.msk [vmem:[#allocation2 + $0xa0] sm:$0xff] %vm321_vm3, %v3131_v8  ;;  %v686_v18 = vmul.f32 0.8007374, %v3714_v55  ;;  %v687_v19 = vmul.f32 0.8007374, %v3718_v57 }
  0xb8   : > { %344 = vst.msk [vmem:[#allocation2 + $0xa8] sm:$0x3f] %vm323_vm4, %v3131_v8  ;;  %v546_v40 = vpop.permute.xlu1 %545  ;;  %v544_v42 = vpop.permute.xlu0 %543 }
  0xb9   : > { %345 = vst.msk [vmem:[#allocation2 + $0xb0] sm:$0xff] %vm321_vm3, %v3131_v8 }
  0xba   : > { %346 = vst.msk [vmem:[#allocation2 + $0xb8] sm:$0x3f] %vm323_vm4, %v3131_v8 }
  0xbb   : > { %347 = vst.msk [vmem:[#allocation2 + $0xc0] sm:$0xff] %vm321_vm3, %v3131_v8 }
  0xbc   : > { %348 = vst.msk [vmem:[#allocation2 + $0xc8] sm:$0x3f] %vm323_vm4, %v3131_v8 }
  0xbd   : > { %349 = vst.msk [vmem:[#allocation2 + $0xd0] sm:$0xff] %vm321_vm3, %v3131_v8 }
  0xbe   : > { %350 = vst.msk [vmem:[#allocation2 + $0xd8] sm:$0x3f] %vm323_vm4, %v3131_v8 }
  0xbf   : > { %351 = vst.msk [vmem:[#allocation2 + $0xe0] sm:$0xff] %vm321_vm3, %v3131_v8 }
  0xc0   : > { %352 = vst.msk [vmem:[#allocation2 + $0xe8] sm:$0x3f] %vm323_vm4, %v3131_v8  ;;  %v552_v4 = vpop.permute.xlu1 %551  ;;  %v550_v7 = vpop.permute.xlu0 %549 }
  0xc1   : > { %353 = vst.msk [vmem:[#allocation2 + $0xf0] sm:$0xff] %vm321_vm3, %v3131_v8 }
  0xc2   : > { %354 = vst.msk [vmem:[#allocation2 + $0xf8] sm:$0x3f] %vm323_vm4, %v3131_v8 }
  0xc3   : > { %355 = vst.msk [vmem:[#allocation2 + $0x100] sm:$0xff] %vm321_vm3, %v3131_v8 }
  0xc4   : > { %356 = vst.msk [vmem:[#allocation2 + $0x108] sm:$0x3f] %vm323_vm4, %v3131_v8 }
  0xc5   : > { %357 = vst.msk [vmem:[#allocation2 + $0x110] sm:$0xff] %vm321_vm3, %v3131_v8 }
  0xc6   : > { %358 = vst.msk [vmem:[#allocation2 + $0x118] sm:$0x3f] %vm323_vm4, %v3131_v8 }
  0xc7   : > { %5082 = vst [vmem:[#allocation28_spill] sm:$0xff] %v3674_v38 }
  0xc8   : > { %359 = vst.msk [vmem:[#allocation2 + $0x120] sm:$0xff] %vm321_vm3, %v3131_v8 }
  0xc9   : > { %5083 = vst [vmem:[#allocation29_spill] sm:$0xff] %v3678_v39 }
  0xca   : > { %360 = vst.msk [vmem:[#allocation2 + $0x128] sm:$0x3f] %vm323_vm4, %v3131_v8 }
  0xcb   : > { %361 = vst.msk [vmem:[#allocation2 + $0x130] sm:$0xff] %vm321_vm3, %v3131_v8 }
  0xcc   : > { %362 = vst.msk [vmem:[#allocation2 + $0x138] sm:$0x3f] %vm323_vm4, %v3131_v8 }
  0xcd   : > { %363 = vst.msk [vmem:[#allocation2 + $0x140] sm:$0xff] %vm321_vm3, %v3131_v8 }
  0xce   : > { %364 = vst.msk [vmem:[#allocation2 + $0x148] sm:$0x3f] %vm323_vm4, %v3131_v8 }
  0xcf   : > { %5084 = vst [vmem:[#allocation30_spill] sm:$0xff] %v3707_v52 }
  0xd0   : > { %365 = vst.msk [vmem:[#allocation2 + $0x150] sm:$0xff] %vm321_vm3, %v3131_v8 }
  0xd1   : > { %5085 = vst [vmem:[#allocation31_spill] sm:$0xff] %v3712_v53 }
  0xd2   : > { %366 = vst.msk [vmem:[#allocation2 + $0x158] sm:$0x3f] %vm323_vm4, %v3131_v8  ;;  %v3754_v8 = vmul.f32 0.41111228, %v3727_v60 }
  0xd3   : > { %5086 = vst [vmem:[#allocation32_spill] sm:$0xff] %v3718_v57 }
  0xd4   : > { %586 = vst.msk [vmem:[#allocation2 + $0x83] sm:$0xff] %vm580_vm5, %v542_v41 }
  0xd5   : > { %584 = vst.msk [vmem:[#allocation2 + $0x63] sm:$0xff] %vm580_vm5, %v538_v36 }
  0xd6   : > { %5087 = vst [vmem:[#allocation33_spill] sm:$0xff] %v3733_v62 }
  0xd7   : > { %5088 = vst [vmem:[#allocation34_spill] sm:$0xff] %v3736_v63 }
  0xd8   : > { %582 = vst.msk [vmem:[#allocation2 + $0x43] sm:$0xff] %vm580_vm5, %v534_v37 }
  0xd9   : > { %5089 = vst [vmem:[#allocation35_spill] sm:$0xff] %v3740_v2 }
  0xda   : > { %5090 = vst [vmem:[#allocation36_spill] sm:$0xff] %v3743_v3 }
  0xdb   : > { %588 = vst.msk [vmem:[#allocation2 + $0xa3] sm:$0xff] %vm580_vm5, %v546_v40  ;;  %v3767_v16 = vld [vmem:[#allocation2 + $0x80] sm:$0xff]  ;;  %v3769_v17 = vld [vmem:[#allocation2 + $0x88] sm:$0x3f] }
  0xdc   : > { %587 = vst.msk [vmem:[#allocation2 + $0x93] sm:$0xff] %vm580_vm5, %v544_v42  ;;  %v692_v27 = vmul.f32 0.8007374, %v3767_v16  ;;  %v693_v28 = vmul.f32 0.8007374, %v3769_v17  ;;  %v3783_v32 = vld [vmem:[#allocation2 + $0x60] sm:$0xff] }
  0xdd   : > { %589 = vst.msk [vmem:[#allocation2 + $0xb3] sm:$0xff] %vm580_vm5, %v548_v0  ;;  %v754_v29 = vmul.f32 0.41111228, %v3767_v16  ;;  %v755_v30 = vmul.f32 0.41111228, %v3769_v17  ;;  %v722_v36 = vadd.f32 %v690_v43, %v3783_v32 }
  0xde   : > { %5091 = vst [vmem:[#allocation37_spill] sm:$0xff] %v3761_v14  ;;  %v3781_v31 = vmul.f32 0.13533528, %v3767_v16  ;;  %v3786_v34 = vmul.f32 0.13533528, %v3769_v17  ;;  %v3803_v0 = vadd.f32 %v692_v27, %v3674_v38 }
  0xdf   : > { %5092 = vst [vmem:[#allocation38_spill] sm:$0xff] %v3764_v15  ;;  %v3789_v35 = vmul.f32 0.0285655, %v3767_v16  ;;  %v3792_v37 = vld [vmem:[#allocation2 + $0x40] sm:$0xff]  ;;  %v3795_v40 = vmul.f32 0.0285655, %v3769_v17  ;;  %v3824_v13 = vadd.f32 %v754_v29, %v722_v36 }
  0xe0   : > { %591 = vst.msk [vmem:[#allocation2 + $0xd3] sm:$0xff] %vm580_vm5, %v552_v4  ;;  %v3798_v41 = vmul.f32 0.0038659202, %v3767_v16  ;;  %v3800_v42 = vld [vmem:[#allocation2 + $0x68] sm:$0x3f]  ;;  %v3806_v4 = vadd.f32 %v693_v28, %v3678_v39  ;;  %v718_v27 = vadd.f32 %v686_v18, %v3792_v37 }
  0xe1   : > { %590 = vst.msk [vmem:[#allocation2 + $0xc3] sm:$0xff] %vm580_vm5, %v550_v7  ;;  %v3809_v7 = vmul.f32 0.0038659202, %v3769_v17  ;;  %v688_v43 = vmul.f32 0.8007374, %v3783_v32  ;;  %v723_v28 = vadd.f32 %v3688_v44, %v3800_v42 }
  0xe2   : > { %5093 = vst [vmem:[#allocation39_spill] sm:$0xff] %v3783_v32  ;;  %v3812_v9 = vld [vmem:[#allocation2 + $0x48] sm:$0x3f]  ;;  %v3815_v24 = vmul.f32 0.00033546262, %v3767_v16 }
  0xe3   : > { %5094 = vst [vmem:[#allocation40_spill] sm:$0xff] %v3800_v42  ;;  %v3818_v46 = vmul.f32 0.00033546262, %v3769_v17  ;;  %v689_v11 = vmul.f32 0.8007374, %v3800_v42  ;;  %v719_v12 = vadd.f32 %v687_v19, %v3812_v9  ;;  %v720_v18 = vadd.f32 %v688_v43, %v3714_v55 }
  0xe4   : > { %5095 = vst [vmem:[#allocation41_spill] sm:$0xff] %v3815_v24  ;;  %v812_v51 = vmul.f32 0.13533528, %v3783_v32  ;;  %v813_v1 = vmul.f32 0.13533528, %v3800_v42 }
  0xe5   : > { %5096 = vst [vmem:[#allocation42_spill] sm:$0xff] %v3818_v46  ;;  %v3829_v54 = vmul.f32 0.0038659202, %v3783_v32  ;;  %v684_v21 = vmul.f32 0.8007374, %v3792_v37  ;;  %v721_v33 = vadd.f32 %v689_v11, %v3718_v57  ;;  %v3846_v46 = vld [vmem:[#allocation2 + $0xa0] sm:$0xff]  ;;  %v784_v2 = vadd.f32 %v3691_v45, %v720_v18 }
  0xe6   : > { %v685_v47 = vmul.f32 0.8007374, %v3812_v9  ;;  %v3836_v44 = vmul.f32 0.0038659202, %v3800_v42  ;;  %v750_v29 = vmul.f32 0.41111228, %v3783_v32 }
  0xe7   : > { %5097 = vst [vmem:[#allocation43_spill] sm:$0xff] %v3829_v54  ;;  %v751_v36 = vmul.f32 0.41111228, %v3800_v42  ;;  %v3842_v56 = vmul.f32 0.00033546262, %v3783_v32  ;;  %v716_v23 = vadd.f32 %v684_v21, %v3727_v60 }
  0xe8   : > { %5098 = vst [vmem:[#allocation44_spill] sm:$0xff] %v3836_v44  ;;  %v717_v26 = vadd.f32 %v685_v47, %v3729_v61  ;;  %v3848_v19 = vld [vmem:[#allocation2 + $0xa8] sm:$0x3f]  ;;  %v3851_v43 = vmul.f32 0.00033546262, %v3800_v42  ;;  %v782_v24 = vadd.f32 %v750_v29, %v718_v27  ;;  %v558_v29 = vpop.permute.xlu1 %557 }
  0xe9   : > { %5099 = vst [vmem:[#allocation45_spill] sm:$0xff] %v3842_v56  ;;  %v783_v53 = vadd.f32 %v751_v36, %v719_v12  ;;  %v3854_v52 = vmul.f32 0.13533528, %v3792_v37  ;;  %v780_v11 = vadd.f32 %v3721_v58, %v716_v23  ;;  %v3859_v21 = vmul.f32 0.13533528, %v3812_v9 }
  0xea   : > { %5100 = vst [vmem:[#allocation46_spill] sm:$0xff] %v3851_v43  ;;  %v781_v56 = vadd.f32 %v3725_v59, %v717_v26  ;;  %v3862_v47 = vmul.f32 0.0285655, %v3792_v37  ;;  %v653_v60 = vld [vmem:[#allocation2 + $0x98] sm:$0x3f]  ;;  %v846_v61 = vadd.f32 %v814_v20, %v782_v24  ;;  %v787_v36 = vadd.f32 %v755_v30, %v723_v28  ;;  %v652_v59 = vld [vmem:[#allocation2 + $0x90] sm:$0xff]  ;;  %v556_v43 = vpop.permute.xlu0 %555  ;;  %v560_v28 = vpop.permute.xlu2 %559 }
  0xeb   : > { %5101 = vst [vmem:[#allocation47_spill] sm:$0xff] %v3854_v52  ;;  %v3865_v44 = vmul.f32 0.0285655, %v3812_v9  ;;  %v696_v12 = vmul.f32 0.8007374, %v3846_v46  ;;  %v847_v23 = vadd.f32 %v815_v22, %v783_v53  ;;  %v844_v24 = vadd.f32 %v812_v51, %v780_v11 }
  0xec   : > { %5102 = vst [vmem:[#allocation48_spill] sm:$0xff] %v3859_v21  ;;  %v697_v27 = vmul.f32 0.8007374, %v3848_v19  ;;  %v758_v26 = vmul.f32 0.41111228, %v3846_v46  ;;  %v845_v20 = vadd.f32 %v813_v1, %v781_v56  ;;  %v785_v30 = vadd.f32 %v3696_v48, %v721_v33 }
  0xed   : > { %5103 = vst [vmem:[#allocation49_spill] sm:$0xff] %v3862_v47  ;;  %v3871_v58 = vmul.f32 0.41111228, %v3848_v19  ;;  %v820_v54 = vmul.f32 0.13533528, %v3846_v46  ;;  %v911_v45 = vadd.f32 %v3795_v40, %v847_v23  ;;  %v908_v11 = vadd.f32 %v3699_v49, %v844_v24 }
  0xee   : > { %5104 = vst [vmem:[#allocation50_spill] sm:$0xff] %v3865_v44  ;;  %v821_v3 = vmul.f32 0.13533528, %v3848_v19  ;;  %v3879_v53 = vmul.f32 0.0285655, %v3846_v46  ;;  %v909_v39 = vadd.f32 %v3704_v50, %v845_v20  ;;  %v728_v62 = vadd.f32 %v696_v12, %v652_v59 }
  0xef   : > { %592 = vst.msk [vmem:[#allocation2 + $0xe3] sm:$0xff] %vm580_vm5, %v554_v25  ;;  %v3882_v22 = vmul.f32 0.0285655, %v3848_v19  ;;  %v910_v25 = vadd.f32 %v3789_v35, %v846_v61  ;;  %v3887_v1 = vmul.f32 0.0038659202, %v3846_v46  ;;  %v729_v40 = vadd.f32 %v697_v27, %v653_v60 }
  0xf0   : > { %594 = vst.msk [vmem:[#allocation2 + $0x103] sm:$0xff] %vm580_vm5, %v558_v29  ;;  %v694_v51 = vmul.f32 0.8007374, %v652_v59  ;;  %v695_v56 = vmul.f32 0.8007374, %v653_v60  ;;  %v849_v38 = vadd.f32 %v3786_v34, %v785_v30 }
  0xf1   : > { %v3891_v33 = vmul.f32 0.0038659202, %v3848_v19  ;;  %v756_v48 = vmul.f32 0.41111228, %v652_v59  ;;  %v757_v18 = vmul.f32 0.41111228, %v653_v60 }
  0xf2   : > { %v818_v29 = vmul.f32 0.13533528, %v652_v59  ;;  %v819_v63 = vmul.f32 0.13533528, %v653_v60  ;;  %593 = vst.msk [vmem:[#allocation2 + $0xf3] sm:$0xff] %vm580_vm5, %v556_v43  ;;  %v726_v23 = vadd.f32 %v694_v51, %v3767_v16  ;;  %v727_v44 = vadd.f32 %v695_v56, %v3769_v17 }
  0xf3   : > { %v1006_v35 = vmul.f32 0.00033546262, %v3846_v46  ;;  %v3898_v61 = vmul.f32 0.00033546262, %v3848_v19  ;;  %595 = vst.msk [vmem:[#allocation2 + $0x113] sm:$0xff] %vm580_vm5, %v560_v28  ;;  %v788_v50 = vadd.f32 %v756_v48, %v3803_v0  ;;  %v789_v20 = vadd.f32 %v757_v18, %v3806_v4  ;;  %v3908_v28 = vld [vmem:[#allocation2 + $0xb0] sm:$0xff]  ;;  %v607_v4 = vpop.permute.xlu1 %606  ;;  %v562_v48 = vpop.permute.xlu0 %561 }
  0xf4   : > { %v880_v49 = vmul.f32 0.0285655, %v652_v59  ;;  %v942_v24 = vmul.f32 0.0038659202, %v652_v59  ;;  %v848_v43 = vadd.f32 %v3781_v31, %v784_v2  ;;  %v881_v47 = vmul.f32 0.0285655, %v653_v60 }
  0xf5   : > { %5105 = vst [vmem:[#allocation51_spill] sm:$0xff] %v3898_v61  ;;  %v850_v12 = vadd.f32 %v818_v29, %v3824_v13  ;;  %v851_v27 = vadd.f32 %v819_v63, %v787_v36  ;;  %v943_v61 = vmul.f32 0.0038659202, %v653_v60  ;;  %v3910_v16 = vld [vmem:[#allocation2 + $0xb8] sm:$0x3f]  ;;  %v972_v17 = vadd.f32 %v3798_v41, %v908_v11 }
  0xf6   : > { %v973_v51 = vadd.f32 %v3809_v7, %v909_v39  ;;  %v1004_v0 = vmul.f32 0.00033546262, %v652_v59  ;;  %v1005_v56 = vmul.f32 0.00033546262, %v653_v60  ;;  %v912_v2 = vadd.f32 %v880_v49, %v848_v43  ;;  %615 = vst.msk [vmem:[#allocation2 + $0x3] sm:$0xff] %vm580_vm5, %v607_v4  ;;  %v3935_v49 = vld [vmem:[#allocation2 + $0xd0] sm:$0xff] }
  0xf7   : > { %v974_v31 = vadd.f32 %v942_v24, %v910_v25  ;;  %v698_v34 = vmul.f32 0.8007374, %v3908_v28  ;;  %v699_v13 = vmul.f32 0.8007374, %v3910_v16  ;;  %v913_v63 = vadd.f32 %v881_v47, %v849_v38  ;;  %596 = vst.msk [vmem:[#allocation2 + $0x123] sm:$0xff] %vm580_vm5, %v562_v48 }
  0xf8   : > { %v760_v36 = vmul.f32 0.41111228, %v3908_v28  ;;  %v761_v30 = vmul.f32 0.41111228, %v3910_v16  ;;  %v790_v41 = vadd.f32 %v758_v26, %v726_v23  ;;  %v3920_v39 = vadd.f32 %v943_v61, %v911_v45 }
  0xf9   : > { %v791_v7 = vadd.f32 %v3871_v58, %v727_v44  ;;  %v822_v60 = vmul.f32 0.13533528, %v3908_v28  ;;  %v823_v59 = vmul.f32 0.13533528, %v3910_v16  ;;  %v852_v25 = vadd.f32 %v820_v54, %v788_v50  ;;  %v3937_v54 = vld [vmem:[#allocation2 + $0xd8] sm:$0x3f] }
  0xfa   : > { %5106 = vst [vmem:[#allocation52_spill] sm:$0xff] %v3920_v39  ;;  %v853_v18 = vadd.f32 %v821_v3, %v789_v20  ;;  %v884_v11 = vmul.f32 0.0285655, %v3908_v28  ;;  %v885_v38 = vmul.f32 0.0285655, %v3910_v16  ;;  %v3927_v47 = vadd.f32 %v1004_v0, %v972_v17 }
  0xfb   : > { %v3929_v29 = vadd.f32 %v1005_v56, %v973_v51  ;;  %v3931_v26 = vadd.f32 %v1006_v35, %v974_v31  ;;  %v730_v45 = vadd.f32 %v698_v34, %v3846_v46  ;;  %v731_v44 = vadd.f32 %v699_v13, %v3848_v19  ;;  %v658_v35 = vld [vmem:[#allocation2 + $0xc0] sm:$0xff]  ;;  %v659_v19 = vld [vmem:[#allocation2 + $0xc8] sm:$0x3f]  ;;  %v611_v42 = vpop.permute.xlu0 %610 }
  0xfc   : > { %5107 = vst [vmem:[#allocation53_spill] sm:$0xff] %v3927_v47  ;;  %v792_v58 = vadd.f32 %v760_v36, %v728_v62  ;;  %v793_v61 = vadd.f32 %v761_v30, %v729_v40  ;;  %v854_v23 = vadd.f32 %v822_v60, %v790_v41  ;;  %v855_v3 = vadd.f32 %v823_v59, %v791_v7 }
  0xfd   : > { %5108 = vst [vmem:[#allocation54_spill] sm:$0xff] %v3929_v29  ;;  %v914_v24 = vadd.f32 %v3879_v53, %v850_v12  ;;  %v915_v50 = vadd.f32 %v3882_v22, %v851_v27  ;;  %v946_v20 = vmul.f32 0.0038659202, %v3908_v28  ;;  %v916_v43 = vadd.f32 %v884_v11, %v852_v25  ;;  %v3975_v29 = vld [vmem:[#allocation2 + $0xe0] sm:$0xff] }
  0xfe   : > { %5109 = vst [vmem:[#allocation55_spill] sm:$0xff] %v3931_v26  ;;  %v917_v17 = vadd.f32 %v885_v38, %v853_v18  ;;  %v947_v46 = vmul.f32 0.0038659202, %v3910_v16  ;;  %v1008_v62 = vmul.f32 0.00033546262, %v3908_v28  ;;  %v976_v40 = vadd.f32 %v3887_v1, %v912_v2  ;;  %v609_v18 = vpop.permute.xlu2 %608 }
  0xff   : > { %v1009_v51 = vmul.f32 0.00033546262, %v3910_v16  ;;  %v702_v0 = vmul.f32 0.8007374, %v3935_v49  ;;  %v703_v53 = vmul.f32 0.8007374, %v3937_v54  ;;  %v977_v22 = vadd.f32 %v3891_v33, %v913_v63 }
 0x100   : > { %v3950_v12 = vmul.f32 0.41111228, %v3935_v49  ;;  %v3953_v27 = vmul.f32 0.41111228, %v3937_v54  ;;  %v826_v56 = vmul.f32 0.13533528, %v3935_v49  ;;  %v978_v4 = vadd.f32 %v946_v20, %v914_v24 }
 0x101   : > { %v827_v48 = vmul.f32 0.13533528, %v3937_v54  ;;  %v888_v1 = vmul.f32 0.0285655, %v3935_v49  ;;  %v889_v2 = vmul.f32 0.0285655, %v3937_v54  ;;  %v979_v31 = vadd.f32 %v947_v46, %v915_v50 }
 0x102   : > { %v950_v34 = vmul.f32 0.0038659202, %v3935_v49  ;;  %v951_v33 = vmul.f32 0.0038659202, %v3937_v54  ;;  %v700_v13 = vmul.f32 0.8007374, %v658_v35  ;;  %v3961_v63 = vadd.f32 %v1008_v62, %v976_v40 }
 0x103   : > { %v701_v36 = vmul.f32 0.8007374, %v659_v19  ;;  %v762_v30 = vmul.f32 0.41111228, %v658_v35  ;;  %v763_v41 = vmul.f32 0.41111228, %v659_v19  ;;  %v3963_v7 = vadd.f32 %v1009_v51, %v977_v22  ;;  %v626_v57 = vpop.permute.xlu0 %625 }
 0x104   : > { %5110 = vst [vmem:[#allocation56_spill] sm:$0xff] %v3961_v63  ;;  %v824_v60 = vmul.f32 0.13533528, %v658_v35  ;;  %v825_v59 = vmul.f32 0.13533528, %v659_v19  ;;  %v3966_v38 = vadd.f32 %v702_v0, %v658_v35  ;;  %v3968_v24 = vadd.f32 %v703_v53, %v659_v19  ;;  %v622_v0 = vpop.permute.xlu1 %621 }
 0x105   : > { %5111 = vst [vmem:[#allocation57_spill] sm:$0xff] %v3963_v7  ;;  %v886_v25 = vmul.f32 0.0285655, %v658_v35  ;;  %v1012_v11 = vmul.f32 0.00033546262, %v3935_v49  ;;  %v732_v46 = vadd.f32 %v700_v13, %v3908_v28  ;;  %v794_v62 = vadd.f32 %v762_v30, %v730_v45 }
 0x106   : > { %v887_v50 = vmul.f32 0.0285655, %v659_v19  ;;  %616 = vst.msk [vmem:[#allocation2 + $0x13] sm:$0xff] %vm580_vm5, %v609_v18  ;;  %v3972_v20 = vmul.f32 0.00033546262, %v3937_v54  ;;  %v795_v51 = vadd.f32 %v763_v41, %v731_v44  ;;  %v856_v22 = vadd.f32 %v824_v60, %v792_v58 }
 0x107   : > { %v948_v40 = vmul.f32 0.0038659202, %v658_v35  ;;  %v949_v7 = vmul.f32 0.0038659202, %v659_v19  ;;  %v1010_v63 = vmul.f32 0.00033546262, %v658_v35  ;;  %v733_v53 = vadd.f32 %v701_v36, %v3910_v16 }
 0x108   : > { %5112 = vst [vmem:[#allocation58_spill] sm:$0xff] %v3972_v20  ;;  %v857_v47 = vadd.f32 %v825_v59, %v793_v61  ;;  %v918_v26 = vadd.f32 %v886_v25, %v854_v23  ;;  %v1011_v39 = vmul.f32 0.00033546262, %v659_v19  ;;  %v3978_v18 = vld [vmem:[#allocation2 + $0xe8] sm:$0x3f]  ;;  %v919_v20 = vadd.f32 %v887_v50, %v855_v3  ;;  %v666_v19 = vld [vmem:[#allocation2 + $0x100] sm:$0xff] }
 0x109   : > { %v980_v21 = vadd.f32 %v948_v40, %v916_v43  ;;  %v3981_v28 = vmul.f32 0.8007374, %v3975_v29  ;;  %v3984_v45 = vmul.f32 0.8007374, %v3978_v18  ;;  %631 = vst.msk [vmem:[#allocation2 + $0x133] sm:$0xff] %vm580_vm5, %v622_v0  ;;  %v3987_v44 = vadd.f32 %v949_v7, %v917_v17 }
 0x10a   : > { %v3989_v58 = vadd.f32 %v1010_v63, %v978_v4  ;;  %v3992_v16 = vmul.f32 0.41111228, %v3975_v29  ;;  %v858_v61 = vadd.f32 %v826_v56, %v794_v62  ;;  %617 = vst.msk [vmem:[#allocation2 + $0x23] sm:$0xff] %vm580_vm5, %v611_v42  ;;  %v859_v23 = vadd.f32 %v827_v48, %v795_v51  ;;  %v667_v63 = vld [vmem:[#allocation2 + $0x108] sm:$0x3f] }
 0x10b   : > { %5113 = vst [vmem:[#allocation59_spill] sm:$0xff] %v3987_v44  ;;  %v890_v3 = vmul.f32 0.0285655, %v3975_v29  ;;  %v891_v35 = vmul.f32 0.0285655, %v3978_v18  ;;  %v920_v43 = vadd.f32 %v888_v1, %v856_v22  ;;  %v3997_v13 = vadd.f32 %v1011_v39, %v979_v31 }
 0x10c   : > { %5114 = vst [vmem:[#allocation60_spill] sm:$0xff] %v3989_v58  ;;  %v921_v36 = vadd.f32 %v889_v2, %v857_v47  ;;  %v952_v17 = vmul.f32 0.0038659202, %v3975_v29  ;;  %v953_v4 = vmul.f32 0.0038659202, %v3978_v18  ;;  %v4001_v30 = vadd.f32 %v1012_v11, %v980_v21  ;;  %v664_v47 = vld [vmem:[#allocation2 + $0xf0] sm:$0xff] }
 0x10d   : > { %5115 = vst [vmem:[#allocation61_spill] sm:$0xff] %v3997_v13  ;;  %v4004_v56 = vmul.f32 0.41111228, %v3978_v18  ;;  %v828_v42 = vmul.f32 0.13533528, %v3975_v29  ;;  %v922_v41 = vadd.f32 %v890_v3, %v858_v61  ;;  %v923_v1 = vadd.f32 %v891_v35, %v859_v23  ;;  %v668_v35 = vld [vmem:[#allocation2 + $0x110] sm:$0xff] }
 0x10e   : > { %5116 = vst [vmem:[#allocation62_spill] sm:$0xff] %v4001_v30  ;;  %v829_v48 = vmul.f32 0.13533528, %v3978_v18  ;;  %v982_v7 = vadd.f32 %v950_v34, %v918_v26  ;;  %v1014_v39 = vmul.f32 0.00033546262, %v3975_v29  ;;  %v983_v2 = vadd.f32 %v951_v33, %v919_v20 }
 0x10f   : > { %v984_v31 = vadd.f32 %v952_v17, %v920_v43  ;;  %v1015_v60 = vmul.f32 0.00033546262, %v3978_v18  ;;  %v708_v59 = vmul.f32 0.8007374, %v666_v19  ;;  %v665_v21 = vld [vmem:[#allocation2 + $0xf8] sm:$0x3f]  ;;  %v985_v25 = vadd.f32 %v953_v4, %v921_v36 }
 0x110   : > { %v709_v11 = vmul.f32 0.8007374, %v667_v63  ;;  %v4010_v50 = vmul.f32 0.41111228, %v666_v19  ;;  %v4012_v62 = vmul.f32 0.41111228, %v667_v63  ;;  %v796_v34 = vadd.f32 %v3950_v12, %v732_v46 }
 0x111   : > { %v4014_v40 = vmul.f32 0.13533528, %v666_v19  ;;  %v4016_v51 = vmul.f32 0.13533528, %v667_v63  ;;  %v4018_v26 = vmul.f32 0.0285655, %v666_v19  ;;  %v4021_v33 = vadd.f32 %v1014_v39, %v982_v7 }
 0x112   : > { %v4023_v20 = vmul.f32 0.0285655, %v667_v63  ;;  %v956_v22 = vmul.f32 0.0038659202, %v666_v19  ;;  %v957_v0 = vmul.f32 0.0038659202, %v667_v63  ;;  %v797_v36 = vadd.f32 %v3953_v27, %v733_v53 }
 0x113   : > { %5117 = vst [vmem:[#allocation63_spill] sm:$0xff] %v4021_v33  ;;  %v1018_v61 = vmul.f32 0.00033546262, %v666_v19  ;;  %v4025_v23 = vmul.f32 0.00033546262, %v667_v63  ;;  %v860_v58 = vadd.f32 %v828_v42, %v796_v34  ;;  %v4028_v30 = vadd.f32 %v1015_v60, %v983_v2  ;;  %v624_v2 = vpop.permute.xlu2 %623 }
 0x114   : > { %v706_v3 = vmul.f32 0.8007374, %v664_v47  ;;  %v669_v43 = vld [vmem:[#allocation2 + $0x118] sm:$0x3f]  ;;  %v707_v17 = vmul.f32 0.8007374, %v665_v21  ;;  %v861_v15 = vadd.f32 %v829_v48, %v797_v36  ;;  %v736_v42 = vadd.f32 %v3981_v28, %v3935_v49 }
 0x115   : > { %5118 = vst [vmem:[#allocation64_spill] sm:$0xff] %v4025_v23  ;;  %v768_v4 = vmul.f32 0.41111228, %v664_v47  ;;  %v892_v13 = vmul.f32 0.0285655, %v664_v47  ;;  %v737_v36 = vadd.f32 %v3984_v45, %v3937_v54  ;;  %v799_v54 = vadd.f32 %v4004_v56, %v3968_v24 }
 0x116   : > { %5119 = vst [vmem:[#allocation65_spill] sm:$0xff] %v4028_v30  ;;  %v893_v12 = vmul.f32 0.0285655, %v665_v21  ;;  %v954_v46 = vmul.f32 0.0038659202, %v664_v47  ;;  %v739_v49 = vadd.f32 %v707_v17, %v3978_v18 }
 0x117   : > { %v955_v7 = vmul.f32 0.0038659202, %v665_v21  ;;  %v769_v39 = vmul.f32 0.41111228, %v665_v21  ;;  %v1016_v33 = vmul.f32 0.00033546262, %v664_v47  ;;  %v924_v19 = vadd.f32 %v892_v13, %v860_v58 }
 0x118   : > { %v1017_v44 = vmul.f32 0.00033546262, %v665_v21  ;;  %v830_v63 = vmul.f32 0.13533528, %v664_v47  ;;  %v831_v23 = vmul.f32 0.13533528, %v665_v21  ;;  %v986_v52 = vadd.f32 %v954_v46, %v922_v41 }
 0x119   : > { %v4030_v14 = vadd.f32 %v955_v7, %v923_v1  ;;  %v772_v27 = vmul.f32 0.41111228, %v668_v35  ;;  %v773_v53 = vmul.f32 0.41111228, %v669_v43  ;;  %v4034_v60 = vadd.f32 %v1016_v33, %v984_v31  ;;  %632 = vst.msk [vmem:[#allocation2 + $0x143] sm:$0xff] %vm580_vm5, %v624_v2  ;;  %v670_v31 = vld [vmem:[#allocation2 + $0x120] sm:$0xff] }
 0x11a   : > { %v4036_v34 = vadd.f32 %v1017_v44, %v985_v25  ;;  %v834_v30 = vmul.f32 0.13533528, %v668_v35  ;;  %v925_v32 = vadd.f32 %v893_v12, %v861_v15  ;;  %v4038_v58 = vadd.f32 %v1018_v61, %v986_v52  ;;  %633 = vst.msk [vmem:[#allocation2 + $0x153] sm:$0xff] %vm580_vm5, %v626_v57  ;;  %v671_v52 = vld [vmem:[#allocation2 + $0x128] sm:$0x3f]  ;;  %v634_v12 = vld [vmem:[#allocation2] sm:$0xff] }
 0x11b   : > { %v835_v13 = vmul.f32 0.13533528, %v669_v43  ;;  %v896_v41 = vmul.f32 0.0285655, %v668_v35  ;;  %v988_v48 = vadd.f32 %v956_v22, %v924_v19  ;;  %v1020_v1 = vmul.f32 0.00033546262, %v668_v35 }
 0x11c   : > { %v738_v46 = vadd.f32 %v706_v3, %v3975_v29  ;;  %v989_v28 = vadd.f32 %v957_v0, %v925_v32  ;;  %v1021_v44 = vmul.f32 0.00033546262, %v669_v43  ;;  %v740_v15 = vadd.f32 %v708_v59, %v664_v47 }
 0x11d   : > { %v741_v25 = vadd.f32 %v709_v11, %v665_v21  ;;  %v798_v33 = vadd.f32 %v3992_v16, %v3966_v38  ;;  %v800_v45 = vadd.f32 %v768_v4, %v736_v42  ;;  %v801_v29 = vadd.f32 %v769_v39, %v737_v36  ;;  %v635_v42 = vld [vmem:[#allocation2 + $0x8] sm:$0x3f] }
 0x11e   : > { %v897_v22 = vmul.f32 0.0285655, %v669_v43  ;;  %v958_v18 = vmul.f32 0.0038659202, %v668_v35  ;;  %v959_v61 = vmul.f32 0.0038659202, %v669_v43  ;;  %v802_v32 = vadd.f32 %v4010_v50, %v738_v46 }
 0x11f   : > { %v803_v0 = vadd.f32 %v4012_v62, %v739_v49  ;;  %v836_v47 = vmul.f32 0.13533528, %v670_v31  ;;  %v862_v59 = vadd.f32 %v830_v63, %v798_v33  ;;  %v863_v21 = vadd.f32 %v831_v23, %v799_v54  ;;  %v636_v43 = vld [vmem:[#allocation2 + $0x10] sm:$0xff]  ;;  %v637_v23 = vld [vmem:[#allocation2 + $0x18] sm:$0x3f] }
 0x120   : > { %v4052_v57 = vadd.f32 %v1020_v1, %v988_v48  ;;  %v4054_v11 = vadd.f32 %v1021_v44, %v989_v28  ;;  %v864_v38 = vadd.f32 %v4014_v40, %v800_v45  ;;  %v865_v24 = vadd.f32 %v4016_v51, %v801_v29  ;;  %v672_v40 = vld [vmem:[#allocation2 + $0x130] sm:$0xff]  ;;  %v673_v46 = vld [vmem:[#allocation2 + $0x138] sm:$0x3f]  ;;  %v638_v44 = vld [vmem:[#allocation2 + $0x20] sm:$0xff] }
 0x121   : > { %v804_v16 = vadd.f32 %v772_v27, %v740_v15  ;;  %v805_v56 = vadd.f32 %v773_v53, %v741_v25  ;;  %v837_v3 = vmul.f32 0.13533528, %v671_v52  ;;  %v866_v35 = vadd.f32 %v834_v30, %v802_v32 }
 0x122   : > { %v898_v17 = vmul.f32 0.0285655, %v670_v31  ;;  %v899_v50 = vmul.f32 0.0285655, %v671_v52  ;;  %v926_v62 = vadd.f32 %v4018_v26, %v862_v59  ;;  %v927_v4 = vadd.f32 %v4023_v20, %v863_v21 }
 0x123   : > { %v867_v7 = vadd.f32 %v835_v13, %v803_v0  ;;  %v868_v39 = vadd.f32 %v836_v47, %v804_v16  ;;  %v960_v19 = vmul.f32 0.0038659202, %v670_v31  ;;  %v961_v63 = vmul.f32 0.0038659202, %v671_v52  ;;  %v639_v13 = vld [vmem:[#allocation2 + $0x28] sm:$0x3f] }
 0x124   : > { %v928_v51 = vadd.f32 %v896_v41, %v864_v38  ;;  %v929_v27 = vadd.f32 %v897_v22, %v865_v24  ;;  %v1022_v53 = vmul.f32 0.00033546262, %v670_v31  ;;  %v1023_v2 = vmul.f32 0.00033546262, %v671_v52 }
 0x125   : > { %v990_v30 = vadd.f32 %v958_v18, %v926_v62  ;;  %v991_v48 = vadd.f32 %v959_v61, %v927_v4  ;;  %v678_v1 = vmul.f32 0.8007374, %v636_v43  ;;  %v679_v36 = vmul.f32 0.8007374, %v637_v23 }
 0x126   : > { %v869_v26 = vadd.f32 %v837_v3, %v805_v56  ;;  %v930_v49 = vadd.f32 %v898_v17, %v866_v35  ;;  %v931_v20 = vadd.f32 %v899_v50, %v867_v7  ;;  %v900_v28 = vmul.f32 0.0285655, %v672_v40 }
 0x127   : > { %v992_v15 = vadd.f32 %v960_v19, %v928_v51  ;;  %v993_v25 = vadd.f32 %v961_v63, %v929_v27  ;;  %v4060_v33 = vadd.f32 %v1022_v53, %v990_v30  ;;  %v4062_v54 = vadd.f32 %v1023_v2, %v991_v48  ;;  %v5122_v19 = vld [vmem:[#allocation37_spill] sm:$0xff]  ;;  %v5125_v51 = vld [vmem:[#allocation48_spill] sm:$0xff] }
 0x128   : > { %v710_v41 = vadd.f32 %v678_v1, %v634_v12  ;;  %v711_v31 = vadd.f32 %v679_v36, %v635_v42  ;;  %v901_v52 = vmul.f32 0.0285655, %v673_v46  ;;  %v962_v45 = vmul.f32 0.0038659202, %v672_v40  ;;  %v5124_v42 = vld [vmem:[#allocation47_spill] sm:$0xff]  ;;  %v674_v27 = vld [vmem:[#allocation2 + $0x140] sm:$0xff] }
 0x129   : > { %v932_v29 = vadd.f32 %v900_v28, %v868_v39  ;;  %v963_v22 = vmul.f32 0.0038659202, %v673_v46  ;;  %v680_v18 = vmul.f32 0.8007374, %v638_v44  ;;  %v681_v61 = vmul.f32 0.8007374, %v639_v13 }
 0x12a   : > { %v1024_v32 = vmul.f32 0.00033546262, %v672_v40  ;;  %v1025_v0 = vmul.f32 0.00033546262, %v673_v46  ;;  %v714_v47 = vadd.f32 %v3747_v5, %v638_v44  ;;  %v715_v59 = vadd.f32 %v3750_v6, %v639_v13  ;;  %v5120_v6 = vld [vmem:[#allocation32_spill] sm:$0xff]  ;;  %v5123_v40 = vld [vmem:[#allocation38_spill] sm:$0xff] }
 0x12b   : > { %v712_v21 = vadd.f32 %v680_v18, %v636_v43  ;;  %v713_v38 = vadd.f32 %v681_v61, %v637_v23  ;;  %v742_v24 = vmul.f32 0.41111228, %v638_v44  ;;  %v743_v16 = vmul.f32 0.41111228, %v639_v13  ;;  %v5121_v23 = vld [vmem:[#allocation39_spill] sm:$0xff]  ;;  %v5128_v1 = vld [vmem:[#allocation49_spill] sm:$0xff] }
 0x12c   : > { %v933_v56 = vadd.f32 %v901_v52, %v869_v26  ;;  %v746_v3 = vmul.f32 0.41111228, %v3792_v37  ;;  %v747_v35 = vmul.f32 0.41111228, %v3812_v9  ;;  %v810_v17 = vmul.f32 0.13533528, %v3714_v55 }
 0x12d   : > { %v774_v50 = vadd.f32 %v742_v24, %v710_v41  ;;  %v775_v62 = vadd.f32 %v743_v16, %v711_v31  ;;  %v776_v4 = vadd.f32 %v3754_v8, %v712_v21  ;;  %v777_v12 = vadd.f32 %v3757_v10, %v713_v38  ;;  %v5126_v8 = vld [vmem:[#allocation40_spill] sm:$0xff]  ;;  %v5129_v46 = vld [vmem:[#allocation50_spill] sm:$0xff]  ;;  %v5130_v28 = vld [vmem:[#allocation33_spill] sm:$0xff] }
 0x12e   : > { %v778_v5 = vadd.f32 %v746_v3, %v714_v47  ;;  %v779_v7 = vadd.f32 %v747_v35, %v715_v59  ;;  %v811_v43 = vmul.f32 0.13533528, %v5120_v6  ;;  %v874_v39 = vmul.f32 0.0285655, %v5121_v23  ;;  %v5127_v10 = vld [vmem:[#allocation28_spill] sm:$0xff]  ;;  %v5131_v13 = vld [vmem:[#allocation34_spill] sm:$0xff] }
 0x12f   : > { %v838_v63 = vadd.f32 %v5122_v19, %v774_v50  ;;  %v839_v37 = vadd.f32 %v5123_v40, %v775_v62  ;;  %v840_v9 = vadd.f32 %v5124_v42, %v776_v4  ;;  %v841_v55 = vadd.f32 %v5125_v51, %v777_v12  ;;  %v5132_v18 = vld [vmem:[#allocation29_spill] sm:$0xff]  ;;  %v5133_v21 = vld [vmem:[#allocation35_spill] sm:$0xff]  ;;  %v5134_v24 = vld [vmem:[#allocation36_spill] sm:$0xff] }
 0x130   : > { %v842_v53 = vadd.f32 %v810_v17, %v778_v5  ;;  %v843_v2 = vadd.f32 %v811_v43, %v779_v7  ;;  %v875_v30 = vmul.f32 0.0285655, %v5126_v8  ;;  %v938_v48 = vmul.f32 0.0038659202, %v5127_v10  ;;  %v675_v47 = vld [vmem:[#allocation2 + $0x148] sm:$0x3f] }
 0x131   : > { %v902_v36 = vadd.f32 %v5128_v1, %v838_v63  ;;  %v903_v26 = vadd.f32 %v5129_v46, %v839_v37  ;;  %v904_v44 = vadd.f32 %v5130_v28, %v840_v9  ;;  %v905_v41 = vadd.f32 %v5131_v13, %v841_v55  ;;  %v5135_v3 = vld [vmem:[#allocation43_spill] sm:$0xff]  ;;  %v5136_v17 = vld [vmem:[#allocation44_spill] sm:$0xff]  ;;  %v5137_v6 = vld [vmem:[#allocation45_spill] sm:$0xff] }
 0x132   : > { %v906_v31 = vadd.f32 %v874_v39, %v842_v53  ;;  %v907_v52 = vadd.f32 %v875_v30, %v843_v2  ;;  %v939_v61 = vmul.f32 0.0038659202, %v5132_v18  ;;  %v964_v59 = vmul.f32 0.0038659202, %v674_v27  ;;  %v5138_v23 = vld [vmem:[#allocation46_spill] sm:$0xff]  ;;  %v5143_v51 = vld [vmem:[#allocation41_spill] sm:$0xff] }
 0x133   : > { %v966_v38 = vadd.f32 %v5133_v21, %v902_v36  ;;  %v967_v16 = vadd.f32 %v5134_v24, %v903_v26  ;;  %v968_v35 = vadd.f32 %v5135_v3, %v904_v44  ;;  %v969_v50 = vadd.f32 %v5136_v17, %v905_v41  ;;  %v676_v63 = vld [vmem:[#allocation2 + $0x150] sm:$0xff] }
 0x134   : > { %v4088_v62 = vadd.f32 %v962_v45, %v930_v49  ;;  %v4090_v4 = vadd.f32 %v963_v22, %v931_v20  ;;  %v970_v12 = vadd.f32 %v938_v48, %v906_v31  ;;  %v971_v5 = vadd.f32 %v939_v61, %v907_v52  ;;  %v5139_v37 = vld [vmem:[#allocation30_spill] sm:$0xff]  ;;  %v677_v49 = vld [vmem:[#allocation2 + $0x158] sm:$0x3f]  ;;  %v5140_v20 = vld [vmem:[#allocation52_spill] sm:$0xff] }
 0x135   : > { %v4092_v7 = vadd.f32 %v1024_v32, %v992_v15  ;;  %v1030_v43 = vadd.f32 %v5137_v6, %v966_v38  ;;  %v1031_v39 = vadd.f32 %v5138_v23, %v967_v16  ;;  %v965_v19 = vmul.f32 0.0038659202, %v675_v47  ;;  %v5141_v45 = vld [vmem:[#allocation51_spill] sm:$0xff] }
 0x136   : > { %v4096_v40 = vadd.f32 %v1025_v0, %v993_v25  ;;  %v4099_v42 = vadd.f32 %v5139_v37, %v968_v35  ;;  %v4101_v9 = vadd.f32 %v964_v59, %v932_v29  ;;  %v4105_v22 = vadd.f32 %v5141_v45, %v5140_v20  ;;  %v5142_v15 = vld [vmem:[#allocation31_spill] sm:$0xff]  ;;  %v5144_v0 = vld [vmem:[#allocation42_spill] sm:$0xff] }
 0x137   : > { %v4108_v32 = vadd.f32 %v5142_v15, %v969_v50  ;;  %v4111_v55 = vadd.f32 %v5143_v51, %v970_v12  ;;  %v4113_v53 = vmul.f32 0.00033546262, %v674_v27  ;;  %v4115_v25 = vmul.f32 0.00033546262, %v675_v47 }
 0x138   : > { %v4118_v2 = vadd.f32 %v5144_v0, %v971_v5  ;;  %v4120_v29 = vmul.f32 0.00033546262, %v676_v63  ;;  %v1062_v8 = vmul.f32 0.8007374, %v1030_v43  ;;  %v1063_v30 = vmul.f32 0.8007374, %v1031_v39 }
 0x139   : > { %v4122_v10 = vadd.f32 %v965_v19, %v933_v56  ;;  %v4124_v48 = vmul.f32 0.00033546262, %v677_v49  ;;  %v1207_v1 = vmul.f32 0.41111228, %v1030_v43  ;;  %v1208_v26 = vmul.f32 0.41111228, %v1031_v39 }
 0x13a   : > { %v1127_v36 = vrot.slane %v1062_v8, 1  ;;  %v1128_v46 = vrot.slane %v1063_v30, 1  ;;  %v1352_v28 = vmul.f32 0.13533528, %v1030_v43  ;;  %v1353_v44 = vmul.f32 0.13533528, %v1031_v39 }
 0x13b   : > { %v1272_v27 = vrot.slane %v1207_v1, 2  ;;  %v1273_v41 = vrot.slane %v1208_v26, 2  ;;  %v1497_v31 = vmul.f32 0.0285655, %v1030_v43  ;;  %v1498_v52 = vmul.f32 0.0285655, %v1031_v39 }
 0x13c   : > { %v1129_v13 = vsel %vm1126_vm6, %v1127_v36, %v1128_v46  ;;  %v1417_v56 = vrot.slane %v1352_v28, 3  ;;  %v1418_v61 = vrot.slane %v1353_v44, 3  ;;  %v1642_v38 = vmul.f32 0.0038659202, %v1030_v43 }
 0x13d   : > { %v1191_v18 = vadd.f32 %v1129_v13, %v1030_v43  ;;  %v1274_v47 = vsel %vm1271_vm7, %v1272_v27, %v1273_v41  ;;  %v1562_v59 = vrot.slane %v1497_v31, 4  ;;  %v1563_v21 = vrot.slane %v1498_v52, 4 }
 0x13e   : > { %v1419_v16 = vsel %vm1416_vm8, %v1417_v56, %v1418_v61  ;;  %v1643_v3 = vmul.f32 0.0038659202, %v1031_v39  ;;  %v1707_v17 = vrot.slane %v1642_v38, 5  ;;  %v1787_v50 = vmul.f32 0.00033546262, %v1030_v43 }
 0x13f   : > { %v1336_v24 = vadd.f32 %v1274_v47, %v1191_v18  ;;  %v1564_v35 = vsel %vm1561_vm9, %v1562_v59, %v1563_v21  ;;  %v1788_v12 = vmul.f32 0.00033546262, %v1031_v39  ;;  %v1064_v23 = vmul.f32 0.8007374, %v4099_v42 }
 0x140   : > { %v1708_v6 = vrot.slane %v1643_v3, 5  ;;  %v1852_v19 = vrot.slane %v1787_v50, 6  ;;  %v1065_v37 = vmul.f32 0.8007374, %v4108_v32  ;;  %v1209_v49 = vmul.f32 0.41111228, %v4099_v42 }
 0x141   : > { %v1481_v5 = vadd.f32 %v1419_v16, %v1336_v24  ;;  %v1853_v63 = vrot.slane %v1788_v12, 6  ;;  %v1130_v15 = vrot.slane %v1064_v23, 1  ;;  %v1210_v51 = vmul.f32 0.41111228, %v4108_v32 }
 0x142   : > { %v1709_v45 = vsel %vm1706_vm10, %v1707_v17, %v1708_v6  ;;  %v1131_v39 = vrot.slane %v1065_v37, 1  ;;  %v1275_v0 = vrot.slane %v1209_v49, 2  ;;  %v1354_v8 = vmul.f32 0.13533528, %v4099_v42 }
 0x143   : > { %v1626_v20 = vadd.f32 %v1564_v35, %v1481_v5  ;;  %v1854_v43 = vsel %vm1851_vm11, %v1852_v19, %v1853_v63  ;;  %v1276_v1 = vrot.slane %v1210_v51, 2  ;;  %v1355_v36 = vmul.f32 0.13533528, %v4108_v32 }
 0x144   : > { %v1499_v46 = vmul.f32 0.0285655, %v4099_v42  ;;  %v1132_v26 = vsel %vm1126_vm6, %v1130_v15, %v1131_v39  ;;  %v1420_v27 = vrot.slane %v1354_v8, 3  ;;  %v1500_v28 = vmul.f32 0.0285655, %v4108_v32 }
 0x145   : > { %v1771_v30 = vadd.f32 %v1709_v45, %v1626_v20  ;;  %v1644_v44 = vmul.f32 0.0038659202, %v4099_v42  ;;  %v1192_v41 = vadd.f32 %v1132_v26, %v4099_v42  ;;  %v1277_v31 = vsel %vm1271_vm7, %v1275_v0, %v1276_v1 }
 0x146   : > { %v1421_v52 = vrot.slane %v1355_v36, 3  ;;  %v1565_v18 = vrot.slane %v1499_v46, 4  ;;  %v1566_v56 = vrot.slane %v1500_v28, 4  ;;  %v1645_v61 = vmul.f32 0.0038659202, %v4108_v32 }
 0x147   : > { %v4142_v13 = vadd.f32 %v1854_v43, %v1771_v30  ;;  %v1710_v47 = vrot.slane %v1644_v44, 5  ;;  %v1337_v24 = vadd.f32 %v1277_v31, %v1192_v41  ;;  %v1789_v17 = vmul.f32 0.00033546262, %v4099_v42 }
 0x148   : > { %v1422_v16 = vsel %vm1416_vm8, %v1420_v27, %v1421_v52  ;;  %v1567_v3 = vsel %vm1561_vm9, %v1565_v18, %v1566_v56  ;;  %v1711_v35 = vrot.slane %v1645_v61, 5  ;;  %v1790_v12 = vmul.f32 0.00033546262, %v4108_v32 }
 0x149   : > { %v2124_v59 = vmul.f32 0.13533528, %v4142_v13  ;;  %v2028_v21 = vmul.f32 0.41111228, %v4142_v13  ;;  %v1932_v38 = vmul.f32 0.8007374, %v4142_v13  ;;  %v1482_v50 = vadd.f32 %v1422_v16, %v1337_v24 }
 0x14a   : > { %v1066_v5 = vmul.f32 0.8007374, %v4111_v55  ;;  %v1067_v6 = vmul.f32 0.8007374, %v4118_v2  ;;  %v1712_v23 = vsel %vm1706_vm10, %v1710_v47, %v1711_v35  ;;  %v1855_v19 = vrot.slane %v1789_v17, 6  ;;  %v5146_v17 = vld [vmem:[#allocation59_spill] sm:$0xff] }
 0x14b   : > { %2156 = vrot.lane.b32.xlu0 %v2124_v59, %s3132_s15  ;;  %2060 = vrot.lane.b32.xlu2 %v2028_v21, %s3133_s16  ;;  %v1211_v42 = vmul.f32 0.41111228, %v4111_v55  ;;  %v1212_v63 = vmul.f32 0.41111228, %v4118_v2  ;;  %v1627_v37 = vadd.f32 %v1567_v3, %v1482_v50  ;;  %v1856_v49 = vrot.slane %v1790_v12, 6  ;;  %v5147_v50 = vld [vmem:[#allocation58_spill] sm:$0xff] }
 0x14c   : > { %1964 = vrot.lane.b32.xlu1 %v1932_v38, %s3134_s18  ;;  %v1133_v20 = vrot.slane %v1066_v5, 1  ;;  %v1134_v45 = vrot.slane %v1067_v6, 1  ;;  %v1356_v51 = vmul.f32 0.13533528, %v4111_v55  ;;  %v1357_v43 = vmul.f32 0.13533528, %v4118_v2 }
 0x14d   : > { %v1278_v15 = vrot.slane %v1211_v42, 2  ;;  %v1279_v32 = vrot.slane %v1212_v63, 2  ;;  %v4166_v39 = vadd.f32 %v4113_v53, %v4088_v62  ;;  %v1772_v0 = vadd.f32 %v1712_v23, %v1627_v37 }
 0x14e   : > { %v1135_v8 = vsel %vm1126_vm6, %v1133_v20, %v1134_v45  ;;  %v1501_v30 = vmul.f32 0.0285655, %v4111_v55  ;;  %v1857_v1 = vsel %vm1851_vm11, %v1855_v19, %v1856_v49  ;;  %v1423_v46 = vrot.slane %v1356_v51, 3 }
 0x14f   : > { %v1193_v36 = vadd.f32 %v1135_v8, %v4111_v55  ;;  %v1424_v26 = vrot.slane %v1357_v43, 3  ;;  %v4172_v27 = vadd.f32 %v1857_v1, %v1772_v0  ;;  %v1280_v28 = vsel %vm1271_vm7, %v1278_v15, %v1279_v32 }
 0x150   : > { %v1502_v44 = vmul.f32 0.0285655, %v4118_v2  ;;  %v1646_v62 = vmul.f32 0.0038659202, %v4111_v55  ;;  %v1568_v41 = vrot.slane %v1501_v30, 4  ;;  %v4189_v12 = vadd.f32 %v5147_v50, %v5146_v17  ;;  %v5149_v17 = vld [vmem:[#allocation54_spill] sm:$0xff] }
 0x151   : > { %v1338_v53 = vadd.f32 %v1280_v28, %v1193_v36  ;;  %v1647_v31 = vmul.f32 0.0038659202, %v4118_v2  ;;  %v1791_v52 = vmul.f32 0.00033546262, %v4111_v55  ;;  %v2029_v18 = vmul.f32 0.41111228, %v4172_v27 }
 0x152   : > { %v1933_v56 = vmul.f32 0.8007374, %v4172_v27  ;;  %v2125_v61 = vmul.f32 0.13533528, %v4172_v27  ;;  %v1425_v47 = vsel %vm1416_vm8, %v1423_v46, %v1424_v26  ;;  %v1569_v21 = vrot.slane %v1502_v44, 4  ;;  %v5145_v55 = vld [vmem:[#allocation55_spill] sm:$0xff] }
 0x153   : > { %v1483_v59 = vadd.f32 %v1425_v47, %v1338_v53  ;;  %v1713_v38 = vrot.slane %v1646_v62, 5  ;;  %v1714_v24 = vrot.slane %v1647_v31, 5  ;;  %2062 = vrot.lane.b32.xlu0 %v2029_v18, %s3133_s16  ;;  %v1792_v16 = vmul.f32 0.00033546262, %v4118_v2 }
 0x154   : > { %1966 = vrot.lane.b32.xlu2 %v1933_v56, %s3134_s18  ;;  %v1858_v3 = vrot.slane %v1791_v52, 6  ;;  %v1070_v35 = vmul.f32 0.8007374, %v5145_v55  ;;  %2158 = vrot.lane.b32.xlu1 %v2125_v61, %s3132_s15  ;;  %v1570_v5 = vsel %vm1561_vm9, %v1568_v41, %v1569_v21  ;;  %v1071_v23 = vmul.f32 0.8007374, %v4105_v22 }
 0x155   : > { %v1715_v6 = vsel %vm1706_vm10, %v1713_v38, %v1714_v24  ;;  %v1215_v19 = vmul.f32 0.41111228, %v5145_v55  ;;  %v1628_v42 = vadd.f32 %v1570_v5, %v1483_v59  ;;  %v1859_v63 = vrot.slane %v1792_v16, 6  ;;  %v5148_v38 = vld [vmem:[#allocation53_spill] sm:$0xff] }
 0x156   : > { %v1139_v2 = vrot.slane %v1070_v35, 1  ;;  %v1216_v37 = vmul.f32 0.41111228, %v4105_v22  ;;  %v1140_v49 = vrot.slane %v1071_v23, 1  ;;  %v1360_v45 = vmul.f32 0.13533528, %v5145_v55 }
 0x157   : > { %v1284_v20 = vrot.slane %v1215_v19, 2  ;;  %v1361_v15 = vmul.f32 0.13533528, %v4105_v22  ;;  %v1773_v32 = vadd.f32 %v1715_v6, %v1628_v42  ;;  %v1860_v51 = vsel %vm1851_vm11, %v1858_v3, %v1859_v63 }
 0x158   : > { %v1285_v43 = vrot.slane %v1216_v37, 2  ;;  %v1505_v0 = vmul.f32 0.0285655, %v5145_v55  ;;  %v1141_v8 = vsel %vm1126_vm6, %v1139_v2, %v1140_v49  ;;  %v1429_v30 = vrot.slane %v1360_v45, 3 }
 0x159   : > { %v1430_v1 = vrot.slane %v1361_v15, 3  ;;  %v1506_v36 = vmul.f32 0.0285655, %v4105_v22  ;;  %v4203_v46 = vadd.f32 %v1860_v51, %v1773_v32  ;;  %v1195_v26 = vadd.f32 %v1141_v8, %v5145_v55 }
 0x15a   : > { %v1286_v28 = vsel %vm1271_vm7, %v1284_v20, %v1285_v43  ;;  %v1574_v44 = vrot.slane %v1505_v0, 4  ;;  %v1650_v41 = vmul.f32 0.0038659202, %v5145_v55  ;;  %v1651_v31 = vmul.f32 0.0038659202, %v4105_v22 }
 0x15b   : > { %v1431_v62 = vsel %vm1416_vm8, %v1429_v30, %v1430_v1  ;;  %v1575_v53 = vrot.slane %v1506_v36, 4  ;;  %v1934_v52 = vmul.f32 0.8007374, %v4203_v46  ;;  %v1340_v18 = vadd.f32 %v1286_v28, %v1195_v26 }
 0x15c   : > { %v1795_v56 = vmul.f32 0.00033546262, %v5145_v55  ;;  %v1796_v61 = vmul.f32 0.00033546262, %v4105_v22  ;;  %v1719_v59 = vrot.slane %v1650_v41, 5  ;;  %v1720_v21 = vrot.slane %v1651_v31, 5 }
 0x15d   : > { %v1576_v47 = vsel %vm1561_vm9, %v1574_v44, %v1575_v53  ;;  %v1068_v24 = vmul.f32 0.8007374, %v5148_v38  ;;  %1968 = vrot.lane.b32.xlu0 %v1934_v52, %s3134_s18  ;;  %v1485_v16 = vadd.f32 %v1431_v62, %v1340_v18  ;;  %v1069_v50 = vmul.f32 0.8007374, %v5149_v17 }
 0x15e   : > { %v1864_v3 = vrot.slane %v1795_v56, 6  ;;  %v1865_v35 = vrot.slane %v1796_v61, 6  ;;  %v1721_v5 = vsel %vm1706_vm10, %v1719_v59, %v1720_v21  ;;  %v1213_v55 = vmul.f32 0.41111228, %v5148_v38  ;;  %v5150_v21 = vld [vmem:[#allocation56_spill] sm:$0xff] }
 0x15f   : > { %v1136_v6 = vrot.slane %v1068_v24, 1  ;;  %v1214_v22 = vmul.f32 0.41111228, %v5149_v17  ;;  %v1630_v23 = vadd.f32 %v1576_v47, %v1485_v16  ;;  %v1137_v42 = vrot.slane %v1069_v50, 1 }
 0x160   : > { %v1866_v19 = vsel %vm1851_vm11, %v1864_v3, %v1865_v35  ;;  %v1358_v63 = vmul.f32 0.13533528, %v5148_v38  ;;  %v1281_v2 = vrot.slane %v1213_v55, 2  ;;  %v1359_v49 = vmul.f32 0.13533528, %v5149_v17  ;;  %v5151_v3 = vld [vmem:[#allocation57_spill] sm:$0xff] }
 0x161   : > { %v1282_v37 = vrot.slane %v1214_v22, 2  ;;  %v1503_v20 = vmul.f32 0.0285655, %v5148_v38  ;;  %v1775_v45 = vadd.f32 %v1721_v5, %v1630_v23  ;;  %v1138_v15 = vsel %vm1126_vm6, %v1136_v6, %v1137_v42 }
 0x162   : > { %v1426_v32 = vrot.slane %v1358_v63, 3  ;;  %v1504_v51 = vmul.f32 0.0285655, %v5149_v17  ;;  %v1194_v43 = vadd.f32 %v1138_v15, %v5148_v38  ;;  %v1427_v8 = vrot.slane %v1359_v49, 3 }
 0x163   : > { %v1283_v0 = vsel %vm1271_vm7, %v1281_v2, %v1282_v37  ;;  %v1571_v30 = vrot.slane %v1503_v20, 4  ;;  %v4228_v1 = vadd.f32 %v1866_v19, %v1775_v45  ;;  %v1648_v26 = vmul.f32 0.0038659202, %v5148_v38 }
 0x164   : > { %v1572_v36 = vrot.slane %v1504_v51, 4  ;;  %v1649_v28 = vmul.f32 0.0038659202, %v5149_v17  ;;  %v1339_v44 = vadd.f32 %v1283_v0, %v1194_v43  ;;  %v1428_v62 = vsel %vm1416_vm8, %v1426_v32, %v1427_v8 }
 0x165   : > { %v1793_v53 = vmul.f32 0.00033546262, %v5148_v38  ;;  %v1794_v41 = vmul.f32 0.00033546262, %v5149_v17  ;;  %v1936_v31 = vmul.f32 0.8007374, %v4228_v1 }
 0x166   : > { %v1573_v52 = vsel %vm1561_vm9, %v1571_v30, %v1572_v36  ;;  %v1716_v18 = vrot.slane %v1648_v26, 5  ;;  %v1717_v56 = vrot.slane %v1649_v28, 5  ;;  %v1484_v61 = vadd.f32 %v1428_v62, %v1339_v44 }
 0x167   : > { %v1861_v47 = vrot.slane %v1793_v53, 6  ;;  %v1862_v59 = vrot.slane %v1794_v41, 6  ;;  %v1072_v24 = vmul.f32 0.8007374, %v5150_v21  ;;  %1972 = vrot.lane.b32.xlu2 %v1936_v31, %s3134_s18  ;;  %v1073_v35 = vmul.f32 0.8007374, %v5151_v3 }
 0x168   : > { %v1718_v16 = vsel %vm1706_vm10, %v1716_v18, %v1717_v56  ;;  %v1217_v38 = vmul.f32 0.41111228, %v5150_v21  ;;  %v1218_v17 = vmul.f32 0.41111228, %v5151_v3  ;;  %v1629_v50 = vadd.f32 %v1573_v52, %v1484_v61  ;;  %v5152_v18 = vld [vmem:[#allocation62_spill] sm:$0xff] }
 0x169   : > { %v1863_v5 = vsel %vm1851_vm11, %v1861_v47, %v1862_v59  ;;  %v1142_v6 = vrot.slane %v1072_v24, 1  ;;  %v1362_v55 = vmul.f32 0.13533528, %v5150_v21  ;;  %v1143_v22 = vrot.slane %v1073_v35, 1 }
 0x16a   : > { %v1287_v23 = vrot.slane %v1217_v38, 2  ;;  %v1288_v19 = vrot.slane %v1218_v17, 2  ;;  %v1363_v42 = vmul.f32 0.13533528, %v5151_v3  ;;  %v1774_v63 = vadd.f32 %v1718_v16, %v1629_v50 }
 0x16b   : > { %v1432_v2 = vrot.slane %v1362_v55, 3  ;;  %v1507_v37 = vmul.f32 0.0285655, %v5150_v21  ;;  %v1508_v49 = vmul.f32 0.0285655, %v5151_v3  ;;  %v1144_v20 = vsel %vm1126_vm6, %v1142_v6, %v1143_v22 }
 0x16c   : > { %v1289_v45 = vsel %vm1271_vm7, %v1287_v23, %v1288_v19  ;;  %v1433_v15 = vrot.slane %v1363_v42, 3  ;;  %v1652_v32 = vmul.f32 0.0038659202, %v5150_v21  ;;  %v4251_v51 = vadd.f32 %v1863_v5, %v1774_v63 }
 0x16d   : > { %v1196_v43 = vadd.f32 %v1144_v20, %v5150_v21  ;;  %v1577_v0 = vrot.slane %v1507_v37, 4  ;;  %v1578_v8 = vrot.slane %v1508_v49, 4  ;;  %v1653_v36 = vmul.f32 0.0038659202, %v5151_v3 }
 0x16e   : > { %v1434_v30 = vsel %vm1416_vm8, %v1432_v2, %v1433_v15  ;;  %v1722_v26 = vrot.slane %v1652_v32, 5  ;;  %v1797_v28 = vmul.f32 0.00033546262, %v5150_v21  ;;  %v1935_v44 = vmul.f32 0.8007374, %v4251_v51 }
 0x16f   : > { %v1341_v62 = vadd.f32 %v1289_v45, %v1196_v43  ;;  %v1579_v53 = vsel %vm1561_vm9, %v1577_v0, %v1578_v8  ;;  %v1798_v41 = vmul.f32 0.00033546262, %v5151_v3  ;;  %v1723_v31 = vrot.slane %v1653_v36, 5 }
 0x170   : > { %v1867_v52 = vrot.slane %v1797_v28, 6  ;;  %v1076_v56 = vmul.f32 0.8007374, %v5152_v18  ;;  %v1077_v61 = vmul.f32 0.8007374, %v4189_v12  ;;  %1970 = vrot.lane.b32.xlu1 %v1935_v44, %s3134_s18 }
 0x171   : > { %v1486_v47 = vadd.f32 %v1434_v30, %v1341_v62  ;;  %v1868_v59 = vrot.slane %v1798_v41, 6  ;;  %v1221_v24 = vmul.f32 0.41111228, %v5152_v18  ;;  %v1222_v21 = vmul.f32 0.41111228, %v4189_v12 }
 0x172   : > { %v1724_v16 = vsel %vm1706_vm10, %v1722_v26, %v1723_v31  ;;  %v1148_v35 = vrot.slane %v1076_v56, 1  ;;  %v1149_v38 = vrot.slane %v1077_v61, 1  ;;  %v1366_v3 = vmul.f32 0.13533528, %v5152_v18  ;;  %v5153_v56 = vld [vmem:[#allocation60_spill] sm:$0xff] }
 0x173   : > { %v1631_v17 = vadd.f32 %v1579_v53, %v1486_v47  ;;  %v1869_v50 = vsel %vm1851_vm11, %v1867_v52, %v1868_v59  ;;  %v1293_v5 = vrot.slane %v1221_v24, 2  ;;  %v1294_v6 = vrot.slane %v1222_v21, 2  ;;  %v5154_v47 = vld [vmem:[#allocation61_spill] sm:$0xff] }
 0x174   : > { %v1150_v55 = vsel %vm1126_vm6, %v1148_v35, %v1149_v38  ;;  %v1367_v22 = vmul.f32 0.13533528, %v4189_v12  ;;  %v1438_v23 = vrot.slane %v1366_v3, 3  ;;  %v1511_v19 = vmul.f32 0.0285655, %v5152_v18 }
 0x175   : > { %v1776_v42 = vadd.f32 %v1724_v16, %v1631_v17  ;;  %v1198_v63 = vadd.f32 %v1150_v55, %v5152_v18  ;;  %v1295_v2 = vsel %vm1271_vm7, %v1293_v5, %v1294_v6  ;;  %v1512_v37 = vmul.f32 0.0285655, %v4189_v12 }
 0x176   : > { %v1439_v49 = vrot.slane %v1367_v22, 3  ;;  %v1583_v20 = vrot.slane %v1511_v19, 4  ;;  %v1656_v45 = vmul.f32 0.0038659202, %v5152_v18  ;;  %v1657_v15 = vmul.f32 0.0038659202, %v4189_v12 }
 0x177   : > { %v4276_v32 = vadd.f32 %v1869_v50, %v1776_v42  ;;  %v1343_v43 = vadd.f32 %v1295_v2, %v1198_v63  ;;  %v1584_v0 = vrot.slane %v1512_v37, 4  ;;  %v1801_v8 = vmul.f32 0.00033546262, %v5152_v18 }
 0x178   : > { %v1440_v30 = vsel %vm1416_vm8, %v1438_v23, %v1439_v49  ;;  %v1728_v36 = vrot.slane %v1656_v45, 5  ;;  %v1729_v26 = vrot.slane %v1657_v15, 5  ;;  %v1802_v28 = vmul.f32 0.00033546262, %v4189_v12 }
 0x179   : > { %v1937_v44 = vmul.f32 0.8007374, %v4276_v32  ;;  %v1488_v62 = vadd.f32 %v1440_v30, %v1343_v43  ;;  %v1585_v53 = vsel %vm1561_vm9, %v1583_v20, %v1584_v0  ;;  %v1873_v41 = vrot.slane %v1801_v8, 6 }
 0x17a   : > { %v1730_v31 = vsel %vm1706_vm10, %v1728_v36, %v1729_v26  ;;  %v1874_v52 = vrot.slane %v1802_v28, 6  ;;  %v1074_v61 = vmul.f32 0.8007374, %v5153_v56  ;;  %v1075_v59 = vmul.f32 0.8007374, %v5154_v47 }
 0x17b   : > { %1974 = vrot.lane.b32.xlu0 %v1937_v44, %s3134_s18  ;;  %v1633_v18 = vadd.f32 %v1585_v53, %v1488_v62  ;;  %v1219_v24 = vmul.f32 0.41111228, %v5153_v56  ;;  %v1220_v12 = vmul.f32 0.41111228, %v5154_v47  ;;  %v1364_v21 = vmul.f32 0.13533528, %v5153_v56 }
 0x17c   : > { %v1875_v16 = vsel %vm1851_vm11, %v1873_v41, %v1874_v52  ;;  %v1145_v35 = vrot.slane %v1074_v61, 1  ;;  %v1146_v38 = vrot.slane %v1075_v59, 1  ;;  %v1365_v3 = vmul.f32 0.13533528, %v5154_v47  ;;  %v5155_v44 = vld [vmem:[#allocation63_spill] sm:$0xff] }
 0x17d   : > { %v1778_v17 = vadd.f32 %v1730_v31, %v1633_v18  ;;  %v1290_v50 = vrot.slane %v1219_v24, 2  ;;  %v1291_v5 = vrot.slane %v1220_v12, 2  ;;  %v1435_v6 = vrot.slane %v1364_v21, 3  ;;  %v5156_v31 = vld [vmem:[#allocation65_spill] sm:$0xff] }
 0x17e   : > { %v1147_v55 = vsel %vm1126_vm6, %v1145_v35, %v1146_v38  ;;  %v1436_v22 = vrot.slane %v1365_v3, 3  ;;  %v1509_v23 = vmul.f32 0.0285655, %v5153_v56  ;;  %v1510_v19 = vmul.f32 0.0285655, %v5154_v47 }
 0x17f   : > { %v4295_v42 = vadd.f32 %v1875_v16, %v1778_v17  ;;  %v1197_v63 = vadd.f32 %v1147_v55, %v5153_v56  ;;  %v1292_v2 = vsel %vm1271_vm7, %v1290_v50, %v1291_v5  ;;  %v1654_v37 = vmul.f32 0.0038659202, %v5153_v56 }
 0x180   : > { %v1437_v49 = vsel %vm1416_vm8, %v1435_v6, %v1436_v22  ;;  %v1580_v20 = vrot.slane %v1509_v23, 4  ;;  %v1581_v45 = vrot.slane %v1510_v19, 4  ;;  %v1655_v15 = vmul.f32 0.0038659202, %v5154_v47 }
 0x181   : > { %v1939_v43 = vmul.f32 0.8007374, %v4295_v42  ;;  %v1342_v0 = vadd.f32 %v1292_v2, %v1197_v63  ;;  %v1725_v8 = vrot.slane %v1654_v37, 5  ;;  %v1799_v30 = vmul.f32 0.00033546262, %v5153_v56 }
 0x182   : > { %v1582_v36 = vsel %vm1561_vm9, %v1580_v20, %v1581_v45  ;;  %v1726_v26 = vrot.slane %v1655_v15, 5  ;;  %v1800_v28 = vmul.f32 0.00033546262, %v5154_v47  ;;  %v1078_v62 = vmul.f32 0.8007374, %v5155_v44 }
 0x183   : > { %1978 = vrot.lane.b32.xlu2 %v1939_v43, %s3134_s18  ;;  %v1487_v53 = vadd.f32 %v1437_v49, %v1342_v0  ;;  %v1870_v41 = vrot.slane %v1799_v30, 6  ;;  %v1079_v52 = vmul.f32 0.8007374, %v5156_v31  ;;  %v1223_v61 = vmul.f32 0.41111228, %v5155_v44 }
 0x184   : > { %v1727_v59 = vsel %vm1706_vm10, %v1725_v8, %v1726_v26  ;;  %v1871_v18 = vrot.slane %v1800_v28, 6  ;;  %v1151_v24 = vrot.slane %v1078_v62, 1  ;;  %v1224_v56 = vmul.f32 0.41111228, %v5156_v31 }
 0x185   : > { %v1632_v12 = vadd.f32 %v1582_v36, %v1487_v53  ;;  %v1152_v21 = vrot.slane %v1079_v52, 1  ;;  %v1296_v16 = vrot.slane %v1223_v61, 2  ;;  %v1368_v47 = vmul.f32 0.13533528, %v5155_v44 }
 0x186   : > { %v1872_v35 = vsel %vm1851_vm11, %v1870_v41, %v1871_v18  ;;  %v1297_v38 = vrot.slane %v1224_v56, 2  ;;  %v1369_v3 = vmul.f32 0.13533528, %v5156_v31  ;;  %v1513_v17 = vmul.f32 0.0285655, %v5155_v44  ;;  %v5157_v41 = vld [vmem:[#allocation64_spill] sm:$0xff] }
 0x187   : > { %v1777_v50 = vadd.f32 %v1727_v59, %v1632_v12  ;;  %v1153_v5 = vsel %vm1126_vm6, %v1151_v24, %v1152_v21  ;;  %v1441_v6 = vrot.slane %v1368_v47, 3  ;;  %v1514_v55 = vmul.f32 0.0285655, %v5156_v31 }
 0x188   : > { %v1199_v22 = vadd.f32 %v1153_v5, %v5155_v44  ;;  %v1298_v23 = vsel %vm1271_vm7, %v1296_v16, %v1297_v38  ;;  %v1442_v19 = vrot.slane %v1369_v3, 3  ;;  %v1586_v63 = vrot.slane %v1513_v17, 4 }
 0x189   : > { %v4320_v2 = vadd.f32 %v1872_v35, %v1777_v50  ;;  %v1587_v37 = vrot.slane %v1514_v55, 4  ;;  %v1658_v49 = vmul.f32 0.0038659202, %v5155_v44  ;;  %v1659_v20 = vmul.f32 0.0038659202, %v5156_v31 }
 0x18a   : > { %v4326_v45 = vadd.f32 %v4115_v25, %v4090_v4  ;;  %v1344_v15 = vadd.f32 %v1298_v23, %v1199_v22  ;;  %v1803_v43 = vmul.f32 0.00033546262, %v5155_v44  ;;  %v1804_v0 = vmul.f32 0.00033546262, %v5156_v31 }
 0x18b   : > { %v1938_v8 = vmul.f32 0.8007374, %v4320_v2  ;;  %v1443_v30 = vsel %vm1416_vm8, %v1441_v6, %v1442_v19  ;;  %v1731_v36 = vrot.slane %v1658_v49, 5  ;;  %v1732_v26 = vrot.slane %v1659_v20, 5 }
 0x18c   : > { %v1489_v28 = vadd.f32 %v1443_v30, %v1344_v15  ;;  %v1876_v62 = vrot.slane %v1803_v43, 6  ;;  %v1877_v53 = vrot.slane %v1804_v0, 6  ;;  %v1051_v52 = vadd.f32 %v5157_v41, %v4030_v14 }
 0x18d   : > { %1976 = vrot.lane.b32.xlu1 %v1938_v8, %s3134_s18  ;;  %v1588_v4 = vsel %vm1561_vm9, %v1586_v63, %v1587_v37  ;;  %v1082_v25 = vmul.f32 0.8007374, %v4038_v58  ;;  %v1227_v44 = vmul.f32 0.41111228, %v4038_v58  ;;  %v1372_v31 = vmul.f32 0.13533528, %v4038_v58 }
 0x18e   : > { %v1634_v61 = vadd.f32 %v1588_v4, %v1489_v28  ;;  %v1733_v59 = vsel %vm1706_vm10, %v1731_v36, %v1732_v26  ;;  %v1083_v18 = vmul.f32 0.8007374, %v1051_v52  ;;  %v1228_v24 = vmul.f32 0.41111228, %v1051_v52 }
 0x18f   : > { %v1878_v56 = vsel %vm1851_vm11, %v1876_v62, %v1877_v53  ;;  %v1157_v12 = vrot.slane %v1082_v25, 1  ;;  %v1302_v21 = vrot.slane %v1227_v44, 2  ;;  %v1373_v14 = vmul.f32 0.13533528, %v1051_v52 }
 0x190   : > { %v1779_v16 = vadd.f32 %v1733_v59, %v1634_v61  ;;  %v1158_v47 = vrot.slane %v1083_v18, 1  ;;  %v1303_v35 = vrot.slane %v1228_v24, 2  ;;  %v1517_v38 = vmul.f32 0.0285655, %v4038_v58 }
 0x191   : > { %v1447_v3 = vrot.slane %v1372_v31, 3  ;;  %v1448_v17 = vrot.slane %v1373_v14, 3  ;;  %v1518_v50 = vmul.f32 0.0285655, %v1051_v52  ;;  %v1662_v5 = vmul.f32 0.0038659202, %v4038_v58 }
 0x192   : > { %v4345_v6 = vadd.f32 %v4120_v29, %v4101_v9  ;;  %v4347_v55 = vadd.f32 %v1878_v56, %v1779_v16  ;;  %v1159_v22 = vsel %vm1126_vm6, %v1157_v12, %v1158_v47  ;;  %v1592_v23 = vrot.slane %v1517_v38, 4 }
 0x193   : > { %v4352_v19 = vadd.f32 %v4124_v48, %v4122_v10  ;;  %v1201_v63 = vadd.f32 %v1159_v22, %v4038_v58  ;;  %v1593_v37 = vrot.slane %v1518_v50, 4  ;;  %v1663_v49 = vmul.f32 0.0038659202, %v1051_v52 }
 0x194   : > { %v1940_v20 = vmul.f32 0.8007374, %v4347_v55  ;;  %v1304_v15 = vsel %vm1271_vm7, %v1302_v21, %v1303_v35  ;;  %v1737_v43 = vrot.slane %v1662_v5, 5  ;;  %v1807_v9 = vmul.f32 0.00033546262, %v4038_v58 }
 0x195   : > { %v1346_v29 = vadd.f32 %v1304_v15, %v1201_v63  ;;  %v1449_v0 = vsel %vm1416_vm8, %v1447_v3, %v1448_v17  ;;  %v1738_v8 = vrot.slane %v1663_v49, 5  ;;  %v1808_v30 = vmul.f32 0.00033546262, %v1051_v52 }
 0x196   : > { %1980 = vrot.lane.b32.xlu0 %v1940_v20, %s3134_s18  ;;  %v1594_v10 = vsel %vm1561_vm9, %v1592_v23, %v1593_v37  ;;  %v1882_v48 = vrot.slane %v1807_v9, 6  ;;  %v1080_v36 = vmul.f32 0.8007374, %v4034_v60  ;;  %v1081_v26 = vmul.f32 0.8007374, %v4036_v34 }
 0x197   : > { %v1491_v28 = vadd.f32 %v1449_v0, %v1346_v29  ;;  %v1739_v62 = vsel %vm1706_vm10, %v1737_v43, %v1738_v8  ;;  %v1883_v53 = vrot.slane %v1808_v30, 6  ;;  %v1225_v58 = vmul.f32 0.41111228, %v4034_v60 }
 0x198   : > { %v1154_v41 = vrot.slane %v1080_v36, 1  ;;  %v1155_v4 = vrot.slane %v1081_v26, 1  ;;  %v1226_v25 = vmul.f32 0.41111228, %v4036_v34  ;;  %v1370_v52 = vmul.f32 0.13533528, %v4034_v60 }
 0x199   : > { %v1636_v44 = vadd.f32 %v1594_v10, %v1491_v28  ;;  %v1884_v31 = vsel %vm1851_vm11, %v1882_v48, %v1883_v53  ;;  %v1299_v61 = vrot.slane %v1225_v58, 2  ;;  %v1371_v59 = vmul.f32 0.13533528, %v4036_v34 }
 0x19a   : > { %v1156_v18 = vsel %vm1126_vm6, %v1154_v41, %v1155_v4  ;;  %v1300_v24 = vrot.slane %v1226_v25, 2  ;;  %v1444_v56 = vrot.slane %v1370_v52, 3  ;;  %v1515_v12 = vmul.f32 0.0285655, %v4034_v60 }
 0x19b   : > { %v1781_v21 = vadd.f32 %v1739_v62, %v1636_v44  ;;  %v1200_v14 = vadd.f32 %v1156_v18, %v4034_v60  ;;  %v1445_v16 = vrot.slane %v1371_v59, 3  ;;  %v1516_v47 = vmul.f32 0.0285655, %v4036_v34 }
 0x19c   : > { %v1301_v35 = vsel %vm1271_vm7, %v1299_v61, %v1300_v24  ;;  %v1589_v38 = vrot.slane %v1515_v12, 4  ;;  %v1660_v3 = vmul.f32 0.0038659202, %v4034_v60  ;;  %v1661_v17 = vmul.f32 0.0038659202, %v4036_v34 }
 0x19d   : > { %v4376_v50 = vadd.f32 %v1884_v31, %v1781_v21  ;;  %v1345_v5 = vadd.f32 %v1301_v35, %v1200_v14  ;;  %v1446_v22 = vsel %vm1416_vm8, %v1444_v56, %v1445_v16  ;;  %v1590_v23 = vrot.slane %v1516_v47, 4 }
 0x19e   : > { %v1734_v63 = vrot.slane %v1660_v3, 5  ;;  %v1735_v37 = vrot.slane %v1661_v17, 5  ;;  %v1805_v49 = vmul.f32 0.00033546262, %v4034_v60  ;;  %v1806_v20 = vmul.f32 0.00033546262, %v4036_v34 }
 0x19f   : > { %v1942_v15 = vmul.f32 0.8007374, %v4376_v50  ;;  %v1490_v43 = vadd.f32 %v1446_v22, %v1345_v5  ;;  %v1591_v9 = vsel %vm1561_vm9, %v1589_v38, %v1590_v23  ;;  %v1084_v29 = vmul.f32 0.8007374, %v4052_v57 }
 0x1a0   : > { %v1736_v0 = vsel %vm1706_vm10, %v1734_v63, %v1735_v37  ;;  %v1879_v8 = vrot.slane %v1805_v49, 6  ;;  %v1880_v30 = vrot.slane %v1806_v20, 6  ;;  %v1085_v10 = vmul.f32 0.8007374, %v4054_v11 }
 0x1a1   : > { %1984 = vrot.lane.b32.xlu2 %v1942_v15, %s3134_s18  ;;  %v1635_v48 = vadd.f32 %v1591_v9, %v1490_v43  ;;  %v1160_v36 = vrot.slane %v1084_v29, 1  ;;  %v1229_v60 = vmul.f32 0.41111228, %v4052_v57  ;;  %v1230_v34 = vmul.f32 0.41111228, %v4054_v11 }
 0x1a2   : > { %v1881_v26 = vsel %vm1851_vm11, %v1879_v8, %v1880_v30  ;;  %v1161_v28 = vrot.slane %v1085_v10, 1  ;;  %v1374_v62 = vmul.f32 0.13533528, %v4052_v57  ;;  %v1375_v53 = vmul.f32 0.13533528, %v4054_v11 }
 0x1a3   : > { %v1780_v58 = vadd.f32 %v1736_v0, %v1635_v48  ;;  %v1305_v41 = vrot.slane %v1229_v60, 2  ;;  %v1306_v4 = vrot.slane %v1230_v34, 2  ;;  %v1519_v25 = vmul.f32 0.0285655, %v4052_v57 }
 0x1a4   : > { %v1162_v52 = vsel %vm1126_vm6, %v1160_v36, %v1161_v28  ;;  %v1450_v44 = vrot.slane %v1374_v62, 3  ;;  %v1451_v31 = vrot.slane %v1375_v53, 3  ;;  %v1520_v61 = vmul.f32 0.0285655, %v4054_v11 }
 0x1a5   : > { %v4395_v59 = vadd.f32 %v1881_v26, %v1780_v58  ;;  %v1202_v18 = vadd.f32 %v1162_v52, %v4052_v57  ;;  %v1307_v24 = vsel %vm1271_vm7, %v1305_v41, %v1306_v4  ;;  %v1595_v56 = vrot.slane %v1519_v25, 4 }
 0x1a6   : > { %v1452_v12 = vsel %vm1416_vm8, %v1450_v44, %v1451_v31  ;;  %v1596_v21 = vrot.slane %v1520_v61, 4  ;;  %v1664_v14 = vmul.f32 0.0038659202, %v4052_v57  ;;  %v1665_v16 = vmul.f32 0.0038659202, %v4054_v11 }
 0x1a7   : > { %v1941_v47 = vmul.f32 0.8007374, %v4395_v59  ;;  %v1347_v35 = vadd.f32 %v1307_v24, %v1202_v18  ;;  %v1809_v38 = vmul.f32 0.00033546262, %v4052_v57  ;;  %v1810_v3 = vmul.f32 0.00033546262, %v4054_v11 }
 0x1a8   : > { %v1597_v17 = vsel %vm1561_vm9, %v1595_v56, %v1596_v21  ;;  %v1740_v5 = vrot.slane %v1664_v14, 5  ;;  %v1741_v22 = vrot.slane %v1665_v16, 5  ;;  %v1088_v23 = vmul.f32 0.8007374, %v4092_v7 }
 0x1a9   : > { %1982 = vrot.lane.b32.xlu1 %v1941_v47, %s3134_s18  ;;  %v1492_v63 = vadd.f32 %v1452_v12, %v1347_v35  ;;  %v1885_v37 = vrot.slane %v1809_v38, 6  ;;  %v1886_v49 = vrot.slane %v1810_v3, 6  ;;  %v1089_v20 = vmul.f32 0.8007374, %v4096_v40 }
 0x1aa   : > { %v1742_v15 = vsel %vm1706_vm10, %v1740_v5, %v1741_v22  ;;  %v1166_v43 = vrot.slane %v1088_v23, 1  ;;  %v1233_v57 = vmul.f32 0.41111228, %v4092_v7  ;;  %v1234_v11 = vmul.f32 0.41111228, %v4096_v40 }
 0x1ab   : > { %v1637_v9 = vadd.f32 %v1597_v17, %v1492_v63  ;;  %v1887_v29 = vsel %vm1851_vm11, %v1885_v37, %v1886_v49  ;;  %v1167_v0 = vrot.slane %v1089_v20, 1  ;;  %v1378_v8 = vmul.f32 0.13533528, %v4092_v7 }
 0x1ac   : > { %v1311_v30 = vrot.slane %v1233_v57, 2  ;;  %v1312_v10 = vrot.slane %v1234_v11, 2  ;;  %v1379_v48 = vmul.f32 0.13533528, %v4096_v40  ;;  %v1523_v36 = vmul.f32 0.0285655, %v4092_v7 }
 0x1ad   : > { %v1782_v60 = vadd.f32 %v1742_v15, %v1637_v9  ;;  %v1168_v34 = vsel %vm1126_vm6, %v1166_v43, %v1167_v0  ;;  %v1456_v26 = vrot.slane %v1378_v8, 3  ;;  %v1524_v28 = vmul.f32 0.0285655, %v4096_v40 }
 0x1ae   : > { %v1204_v62 = vadd.f32 %v1168_v34, %v4092_v7  ;;  %v1313_v53 = vsel %vm1271_vm7, %v1311_v30, %v1312_v10  ;;  %v1457_v58 = vrot.slane %v1379_v48, 3  ;;  %v1601_v41 = vrot.slane %v1523_v36, 4 }
 0x1af   : > { %v4420_v4 = vadd.f32 %v1887_v29, %v1782_v60  ;;  %v1602_v25 = vrot.slane %v1524_v28, 4  ;;  %v1668_v52 = vmul.f32 0.0038659202, %v4092_v7  ;;  %v1669_v44 = vmul.f32 0.0038659202, %v4096_v40 }
 0x1b0   : > { %v1349_v31 = vadd.f32 %v1313_v53, %v1204_v62  ;;  %v1458_v61 = vsel %vm1416_vm8, %v1456_v26, %v1457_v58  ;;  %v1813_v18 = vmul.f32 0.00033546262, %v4092_v7  ;;  %v1814_v24 = vmul.f32 0.00033546262, %v4096_v40 }
 0x1b1   : > { %v1943_v56 = vmul.f32 0.8007374, %v4420_v4  ;;  %v1603_v12 = vsel %vm1561_vm9, %v1601_v41, %v1602_v25  ;;  %v1746_v21 = vrot.slane %v1668_v52, 5  ;;  %v1747_v14 = vrot.slane %v1669_v44, 5 }
 0x1b2   : > { %v1494_v16 = vadd.f32 %v1458_v61, %v1349_v31  ;;  %v1891_v47 = vrot.slane %v1813_v18, 6  ;;  %v1892_v35 = vrot.slane %v1814_v24, 6  ;;  %v1086_v38 = vmul.f32 0.8007374, %v4060_v33 }
 0x1b3   : > { %1986 = vrot.lane.b32.xlu0 %v1943_v56, %s3134_s18  ;;  %v1748_v3 = vsel %vm1706_vm10, %v1746_v21, %v1747_v14  ;;  %v1087_v17 = vmul.f32 0.8007374, %v4062_v54  ;;  %v1231_v7 = vmul.f32 0.41111228, %v4060_v33  ;;  %v1232_v40 = vmul.f32 0.41111228, %v4062_v54 }
 0x1b4   : > { %v1639_v5 = vadd.f32 %v1603_v12, %v1494_v16  ;;  %v1893_v22 = vsel %vm1851_vm11, %v1891_v47, %v1892_v35  ;;  %v1163_v23 = vrot.slane %v1086_v38, 1  ;;  %v1376_v63 = vmul.f32 0.13533528, %v4060_v33 }
 0x1b5   : > { %v1164_v37 = vrot.slane %v1087_v17, 1  ;;  %v1308_v49 = vrot.slane %v1231_v7, 2  ;;  %v1309_v20 = vrot.slane %v1232_v40, 2  ;;  %v1377_v15 = vmul.f32 0.13533528, %v4062_v54 }
 0x1b6   : > { %v1784_v43 = vadd.f32 %v1748_v3, %v1639_v5  ;;  %v1453_v57 = vrot.slane %v1376_v63, 3  ;;  %v1521_v11 = vmul.f32 0.0285655, %v4060_v33  ;;  %v1522_v9 = vmul.f32 0.0285655, %v4062_v54 }
 0x1b7   : > { %v1165_v29 = vsel %vm1126_vm6, %v1163_v23, %v1164_v37  ;;  %v1310_v0 = vsel %vm1271_vm7, %v1308_v49, %v1309_v20  ;;  %v1454_v8 = vrot.slane %v1377_v15, 3  ;;  %v1666_v30 = vmul.f32 0.0038659202, %v4060_v33 }
 0x1b8   : > { %v4443_v10 = vadd.f32 %v1893_v22, %v1784_v43  ;;  %v1203_v48 = vadd.f32 %v1165_v29, %v4060_v33  ;;  %v1598_v36 = vrot.slane %v1521_v11, 4  ;;  %v1599_v60 = vrot.slane %v1522_v9, 4 }
 0x1b9   : > { %v1455_v34 = vsel %vm1416_vm8, %v1453_v57, %v1454_v8  ;;  %v1667_v26 = vmul.f32 0.0038659202, %v4062_v54  ;;  %v1743_v28 = vrot.slane %v1666_v30, 5  ;;  %v1811_v62 = vmul.f32 0.00033546262, %v4060_v33 }
 0x1ba   : > { %v1945_v53 = vmul.f32 0.8007374, %v4443_v10  ;;  %v1348_v58 = vadd.f32 %v1310_v0, %v1203_v48  ;;  %v1600_v41 = vsel %vm1561_vm9, %v1598_v36, %v1599_v60  ;;  %v1812_v25 = vmul.f32 0.00033546262, %v4062_v54 }
 0x1bb   : > { %v1744_v52 = vrot.slane %v1667_v26, 5  ;;  %v1888_v44 = vrot.slane %v1811_v62, 6  ;;  %v1090_v31 = vmul.f32 0.8007374, %v4166_v39  ;;  %v1091_v61 = vmul.f32 0.8007374, %v4326_v45 }
 0x1bc   : > { %1990 = vrot.lane.b32.xlu2 %v1945_v53, %s3134_s18  ;;  %v1493_v18 = vadd.f32 %v1455_v34, %v1348_v58  ;;  %v1889_v24 = vrot.slane %v1812_v25, 6  ;;  %v1235_v56 = vmul.f32 0.41111228, %v4166_v39  ;;  %v1236_v33 = vmul.f32 0.41111228, %v4326_v45 }
 0x1bd   : > { %v1745_v12 = vsel %vm1706_vm10, %v1743_v28, %v1744_v52  ;;  %v1169_v21 = vrot.slane %v1090_v31, 1  ;;  %v1170_v14 = vrot.slane %v1091_v61, 1  ;;  %v1380_v54 = vmul.f32 0.13533528, %v4166_v39 }
 0x1be   : > { %v1638_v16 = vadd.f32 %v1600_v41, %v1493_v18  ;;  %v1890_v47 = vsel %vm1851_vm11, %v1888_v44, %v1889_v24  ;;  %v1314_v35 = vrot.slane %v1235_v56, 2  ;;  %v1315_v38 = vrot.slane %v1236_v33, 2 }
 0x1bf   : > { %v1171_v3 = vsel %vm1126_vm6, %v1169_v21, %v1170_v14  ;;  %v1381_v17 = vmul.f32 0.13533528, %v4326_v45  ;;  %v1459_v7 = vrot.slane %v1380_v54, 3  ;;  %v1525_v40 = vmul.f32 0.0285655, %v4166_v39 }
 0x1c0   : > { %v1783_v5 = vadd.f32 %v1745_v12, %v1638_v16  ;;  %v1205_v22 = vadd.f32 %v1171_v3, %v4166_v39  ;;  %v1316_v23 = vsel %vm1271_vm7, %v1314_v35, %v1315_v38  ;;  %v1526_v63 = vmul.f32 0.0285655, %v4326_v45 }
 0x1c1   : > { %v1460_v37 = vrot.slane %v1381_v17, 3  ;;  %v1604_v49 = vrot.slane %v1525_v40, 4  ;;  %v1670_v20 = vmul.f32 0.0038659202, %v4166_v39  ;;  %v1671_v15 = vmul.f32 0.0038659202, %v4326_v45 }
 0x1c2   : > { %v4468_v43 = vadd.f32 %v1890_v47, %v1783_v5  ;;  %v1350_v57 = vadd.f32 %v1316_v23, %v1205_v22  ;;  %v1605_v11 = vrot.slane %v1526_v63, 4  ;;  %v1815_v9 = vmul.f32 0.00033546262, %v4166_v39 }
 0x1c3   : > { %v1461_v29 = vsel %vm1416_vm8, %v1459_v7, %v1460_v37  ;;  %v1749_v0 = vrot.slane %v1670_v20, 5  ;;  %v1750_v8 = vrot.slane %v1671_v15, 5  ;;  %v1816_v30 = vmul.f32 0.00033546262, %v4326_v45 }
 0x1c4   : > { %v1944_v48 = vmul.f32 0.8007374, %v4468_v43  ;;  %v1495_v36 = vadd.f32 %v1461_v29, %v1350_v57  ;;  %v1606_v60 = vsel %vm1561_vm9, %v1604_v49, %v1605_v11  ;;  %v1894_v34 = vrot.slane %v1815_v9, 6 }
 0x1c5   : > { %v1895_v26 = vrot.slane %v1816_v30, 6  ;;  %v2031_v28 = vmul.f32 0.41111228, %v4251_v51  ;;  %v1092_v62 = vmul.f32 0.8007374, %v4345_v6  ;;  %v1751_v41 = vsel %vm1706_vm10, %v1749_v0, %v1750_v8 }
 0x1c6   : > { %1988 = vrot.lane.b32.xlu1 %v1944_v48, %s3134_s18  ;;  %v1640_v39 = vadd.f32 %v1606_v60, %v1495_v36  ;;  %v1093_v53 = vmul.f32 0.8007374, %v4352_v19  ;;  %v1237_v58 = vmul.f32 0.41111228, %v4345_v6  ;;  %v1238_v45 = vmul.f32 0.41111228, %v4352_v19 }
 0x1c7   : > { %2066 = vrot.lane.b32.xlu2 %v2031_v28, %s3133_s16  ;;  %v1172_v25 = vrot.slane %v1092_v62, 1  ;;  %v1382_v52 = vmul.f32 0.13533528, %v4345_v6  ;;  %v1383_v44 = vmul.f32 0.13533528, %v4352_v19  ;;  %v1896_v56 = vsel %vm1851_vm11, %v1894_v34, %v1895_v26  ;;  %v2061_v62 = vpop.permute.xlu2 %2060 }
 0x1c8   : > { %v1785_v31 = vadd.f32 %v1751_v41, %v1640_v39  ;;  %v1173_v61 = vrot.slane %v1093_v53, 1  ;;  %v1317_v18 = vrot.slane %v1237_v58, 2  ;;  %v1318_v24 = vrot.slane %v1238_v45, 2 }
 0x1c9   : > { %v1462_v33 = vrot.slane %v1382_v52, 3  ;;  %v1527_v12 = vmul.f32 0.0285655, %v4345_v6  ;;  %v1528_v21 = vmul.f32 0.0285655, %v4352_v19  ;;  %v1463_v16 = vrot.slane %v1383_v44, 3 }
 0x1ca   : > { %v4488_v14 = vadd.f32 %v1896_v56, %v1785_v31  ;;  %v1174_v54 = vsel %vm1126_vm6, %v1172_v25, %v1173_v61  ;;  %v1672_v47 = vmul.f32 0.0038659202, %v4345_v6  ;;  %v1319_v38 = vsel %vm1271_vm7, %v1317_v18, %v1318_v24  ;;  %v4539_v18 = vpop.permute.xlu0 %2156  ;;  %v1965_v24 = vpop.permute.xlu1 %1964 }
 0x1cb   : > { %v1206_v35 = vadd.f32 %v1174_v54, %v4345_v6  ;;  %v1607_v17 = vrot.slane %v1527_v12, 4  ;;  %v1608_v7 = vrot.slane %v1528_v21, 4  ;;  %v1673_v40 = vmul.f32 0.0038659202, %v4352_v19 }
 0x1cc   : > { %v1946_v3 = vmul.f32 0.8007374, %v4488_v14  ;;  %v1817_v22 = vmul.f32 0.00033546262, %v4345_v6  ;;  %v1818_v23 = vmul.f32 0.00033546262, %v4352_v19  ;;  %v1464_v63 = vsel %vm1416_vm8, %v1462_v33, %v1463_v16 }
 0x1cd   : > { %v1351_v5 = vadd.f32 %v1319_v38, %v1206_v35  ;;  %v1752_v37 = vrot.slane %v1672_v47, 5  ;;  %v1753_v49 = vrot.slane %v1673_v40, 5  ;;  %v2034_v20 = vmul.f32 0.41111228, %v4320_v2 }
 0x1ce   : > { %1992 = vrot.lane.b32.xlu0 %v1946_v3, %s3134_s18  ;;  %v1609_v57 = vsel %vm1561_vm9, %v1607_v17, %v1608_v7  ;;  %v1897_v11 = vrot.slane %v1817_v22, 6  ;;  %v1898_v9 = vrot.slane %v1818_v23, 6  ;;  %v2032_v8 = vmul.f32 0.41111228, %v4228_v1 }
 0x1cf   : > { %v1496_v15 = vadd.f32 %v1464_v63, %v1351_v5  ;;  %2072 = vrot.lane.b32.xlu2 %v2034_v20, %s3133_s16  ;;  %v1754_v6 = vsel %vm1706_vm10, %v1752_v37, %v1753_v49  ;;  %v2037_v48 = vmul.f32 0.41111228, %v4395_v59  ;;  %v2035_v60 = vmul.f32 0.41111228, %v4295_v42  ;;  %v1967_v25 = vpop.permute.xlu2 %1966 }
 0x1d0   : > { %v1899_v19 = vsel %vm1851_vm11, %v1897_v11, %v1898_v9  ;;  %v2040_v34 = vmul.f32 0.41111228, %v4468_v43  ;;  %v2030_v26 = vmul.f32 0.41111228, %v4203_v46  ;;  %v2038_v28 = vmul.f32 0.41111228, %v4376_v50 }
 0x1d1   : > { %v1641_v29 = vadd.f32 %v1609_v57, %v1496_v15  ;;  %v2033_v53 = vmul.f32 0.41111228, %v4276_v32  ;;  %v2041_v58 = vmul.f32 0.41111228, %v4443_v10  ;;  %v2126_v45 = vmul.f32 0.13533528, %v4203_v46 }
 0x1d2   : > { %v2036_v41 = vmul.f32 0.41111228, %v4347_v55  ;;  %v2127_v52 = vmul.f32 0.13533528, %v4251_v51  ;;  %v2129_v44 = vmul.f32 0.13533528, %v4276_v32  ;;  %v2012_v56 = vadd.f32 %v1965_v24, %v4142_v13  ;;  %v2063_v47 = vpop.permute.xlu0 %2062  ;;  %v2159_v3 = vpop.permute.xlu1 %2158 }
 0x1d3   : > { %v1786_v0 = vadd.f32 %v1754_v6, %v1641_v29  ;;  %v2039_v31 = vmul.f32 0.41111228, %v4420_v4  ;;  %v2130_v33 = vmul.f32 0.13533528, %v4320_v2  ;;  %v2132_v21 = vmul.f32 0.13533528, %v4347_v55 }
 0x1d4   : > { %v4543_v12 = vadd.f32 %v2061_v62, %v2012_v56  ;;  %v2042_v54 = vmul.f32 0.41111228, %v4488_v14  ;;  %v2013_v16 = vadd.f32 %v1967_v25, %v4172_v27  ;;  %v2133_v17 = vmul.f32 0.13533528, %v4395_v59 }
 0x1d5   : > { %v4506_v30 = vadd.f32 %v1899_v19, %v1786_v0  ;;  %v2135_v40 = vmul.f32 0.13533528, %v4420_v4  ;;  %v2128_v5 = vmul.f32 0.13533528, %v4228_v1  ;;  %v2136_v22 = vmul.f32 0.13533528, %v4468_v43 }
 0x1d6   : > { %2068 = vrot.lane.b32.xlu0 %v2032_v8, %s3133_s16  ;;  %v2109_v35 = vadd.f32 %v2063_v47, %v2013_v16  ;;  %v2138_v63 = vmul.f32 0.13533528, %v4488_v14  ;;  %v2131_v37 = vmul.f32 0.13533528, %v4295_v42  ;;  %v2221_v20 = vmul.f32 0.0285655, %v4172_v27 }
 0x1d7   : > { %v1947_v36 = vmul.f32 0.8007374, %v4506_v30  ;;  %2078 = vrot.lane.b32.xlu2 %v2037_v48, %s3133_s16  ;;  %v2043_v39 = vmul.f32 0.41111228, %v4506_v30  ;;  %v4537_v61 = vpop.permute.xlu2 %1972  ;;  %v2139_v49 = vmul.f32 0.13533528, %v4506_v30 }
 0x1d8   : > { %v4554_v7 = vadd.f32 %v2159_v3, %v2109_v35  ;;  %v2134_v15 = vmul.f32 0.13533528, %v4376_v50  ;;  %v2222_v29 = vmul.f32 0.0285655, %v4203_v46  ;;  %v2224_v6 = vmul.f32 0.0285655, %v4228_v1 }
 0x1d9   : > { %1994 = vrot.lane.b32.xlu1 %v1947_v36, %s3134_s18  ;;  %v2137_v0 = vmul.f32 0.13533528, %v4443_v10  ;;  %v2230_v25 = vmul.f32 0.0285655, %v4376_v50  ;;  %v2231_v56 = vmul.f32 0.0285655, %v4420_v4 }
 0x1da   : > { %v4576_v11 = vpop.permute.xlu0 %1968 }
 0x1de   : > { %2074 = vrot.lane.b32.xlu0 %v2035_v60, %s3133_s16  ;;  %v2225_v60 = vmul.f32 0.0285655, %v4276_v32 }
 0x1df   : > { %2084 = vrot.lane.b32.xlu2 %v2040_v34, %s3133_s16  ;;  %v4551_v38 = vpop.permute.xlu2 %1978 }
 0x1e1   : > { %2064 = vrot.lane.b32.xlu1 %v2030_v26, %s3133_s16  ;;  %v2227_v26 = vmul.f32 0.0285655, %v4295_v42 }
 0x1e2   : > { %v1971_v9 = vpop.permute.xlu1 %1970 }
 0x1e3   : > { %v2015_v19 = vadd.f32 %v1971_v9, %v4251_v51 }
 0x1e6   : > { %2080 = vrot.lane.b32.xlu0 %v2038_v28, %s3133_s16  ;;  %v2220_v28 = vmul.f32 0.0285655, %v4142_v13 }
 0x1e7   : > { %2090 = vrot.lane.b32.xlu2 %v2043_v39, %s3133_s16 }
 0x1e9   : > { %2070 = vrot.lane.b32.xlu1 %v2033_v53, %s3133_s16 }
 0x1ed   : > { %v4586_v48 = vpop.permute.xlu0 %1974 }
 0x1ee   : > { %2086 = vrot.lane.b32.xlu0 %v2041_v58, %s3133_s16  ;;  %v2228_v58 = vmul.f32 0.0285655, %v4347_v55 }
 0x1ef   : > { %2160 = vrot.lane.b32.xlu2 %v2126_v45, %s3132_s15 }
 0x1f1   : > { %2076 = vrot.lane.b32.xlu1 %v2036_v41, %s3133_s16 }
 0x1f6   : > { %2162 = vrot.lane.b32.xlu0 %v2127_v52, %s3132_s15  ;;  %v2223_v52 = vmul.f32 0.0285655, %v4251_v51 }
 0x1f7   : > { %2166 = vrot.lane.b32.xlu2 %v2129_v44, %s3132_s15 }
 0x1f9   : > { %2082 = vrot.lane.b32.xlu1 %v2039_v31, %s3133_s16 }
 0x1fb   : > { %v4562_v23 = vpop.permute.xlu2 %1984 }
 0x1fe   : > { %2168 = vrot.lane.b32.xlu0 %v2130_v33, %s3132_s15 }
 0x1ff   : > { %2172 = vrot.lane.b32.xlu2 %v2132_v21, %s3132_s15  ;;  %v1977_v34 = vpop.permute.xlu1 %1976  ;;  %v2233_v21 = vmul.f32 0.0285655, %v4443_v10 }
 0x200   : > { %v2018_v62 = vadd.f32 %v1977_v34, %v4320_v2  ;;  %v2019_v34 = vadd.f32 %v4551_v38, %v4295_v42  ;;  %v2325_v38 = vmul.f32 0.0038659202, %v4395_v59 }
 0x201   : > { %2088 = vrot.lane.b32.xlu1 %v2042_v54, %s3133_s16  ;;  %v2226_v54 = vmul.f32 0.0285655, %v4320_v2 }
 0x206   : > { %2174 = vrot.lane.b32.xlu0 %v2133_v17, %s3132_s15  ;;  %v2234_v17 = vmul.f32 0.0285655, %v4488_v14 }
 0x207   : > { %2178 = vrot.lane.b32.xlu2 %v2135_v40, %s3132_s15  ;;  %v2316_v40 = vmul.f32 0.0038659202, %v4142_v13 }
 0x208   : > { %v4600_v45 = vpop.permute.xlu0 %1980 }
 0x209   : > { %2164 = vrot.lane.b32.xlu1 %v2128_v5, %s3132_s15  ;;  %v2229_v5 = vmul.f32 0.0285655, %v4395_v59 }
 0x20e   : > { %2180 = vrot.lane.b32.xlu0 %v2136_v22, %s3132_s15 }
 0x20f   : > { %2184 = vrot.lane.b32.xlu2 %v2138_v63, %s3132_s15 }
 0x211   : > { %2170 = vrot.lane.b32.xlu1 %v2131_v37, %s3132_s15  ;;  %v2317_v37 = vmul.f32 0.0038659202, %v4172_v27 }
 0x216   : > { %2186 = vrot.lane.b32.xlu0 %v2139_v49, %s3132_s15  ;;  %v4573_v57 = vpop.permute.xlu2 %1990  ;;  %v2319_v49 = vmul.f32 0.0038659202, %v4251_v51 }
 0x217   : > { %2254 = vrot.lane.b32.xlu2 %v2221_v20, %s3135_s19  ;;  %v2016_v20 = vadd.f32 %v4537_v61, %v4228_v1  ;;  %v2322_v61 = vmul.f32 0.0038659202, %v4320_v2 }
 0x219   : > { %2176 = vrot.lane.b32.xlu1 %v2134_v15, %s3132_s15  ;;  %v2232_v15 = vmul.f32 0.0285655, %v4468_v43 }
 0x21b   : > { %v1983_v41 = vpop.permute.xlu1 %1982 }
 0x21c   : > { %v2021_v44 = vadd.f32 %v1983_v41, %v4395_v59 }
 0x21e   : > { %2256 = vrot.lane.b32.xlu0 %v2222_v29, %s3135_s19 }
 0x21f   : > { %2260 = vrot.lane.b32.xlu2 %v2224_v6, %s3135_s19 }
 0x221   : > { %2182 = vrot.lane.b32.xlu1 %v2137_v0, %s3132_s15  ;;  %v2067_v8 = vpop.permute.xlu2 %2066  ;;  %s3060_s15 = scalar_lea.hbm %s5029_s2, 1280 }
 0x222   : > { %v4588_v36 = vadd.f32 %v2067_v8, %v2015_v19  ;;  %v2320_v8 = vmul.f32 0.0038659202, %v4228_v1  ;;  %p3062_p8 = scmp.lt.s32.totalorder %s3060_s15, %s3056_s28 }
 0x224   : > { %p3063_p10 = por %p3062_p8, %p3061_p7 }
 0x225   : > { %v4612_v33 = vpop.permute.xlu0 %1986 }
 0x226   : > { %2262 = vrot.lane.b32.xlu0 %v2225_v60, %s3135_s19  ;;  %p3064_p13 = pnand %p3063_p10, %p3059_p6 }
 0x227   : > { %2266 = vrot.lane.b32.xlu2 %v2227_v26, %s3135_s19  ;;  %v2235_v26 = vmul.f32 0.0285655, %v4506_v30 }
 0x229   : > { %2252 = vrot.lane.b32.xlu1 %v2220_v28, %s3135_s19  ;;  %v2073_v39 = vpop.permute.xlu2 %2072 }
 0x22a   : > { %v4597_v53 = vadd.f32 %v2073_v39, %v2018_v62  ;;  %v2014_v39 = vadd.f32 %v4576_v11, %v4203_v46 }
 0x22e   : > { %2268 = vrot.lane.b32.xlu0 %v2228_v58, %s3135_s19 }
 0x22f   : > { %2272 = vrot.lane.b32.xlu2 %v2230_v25, %s3135_s19 }
 0x231   : > { %2258 = vrot.lane.b32.xlu1 %v2223_v52, %s3135_s19  ;;  %v2079_v31 = vpop.permute.xlu2 %2078  ;;  %v2323_v52 = vmul.f32 0.0038659202, %v4295_v42 }
 0x232   : > { %v4608_v24 = vadd.f32 %v2079_v31, %v2021_v44  ;;  %v2022_v31 = vadd.f32 %v4562_v23, %v4376_v50  ;;  %v2328_v23 = vmul.f32 0.0038659202, %v4468_v43 }
 0x236   : > { %2274 = vrot.lane.b32.xlu0 %v2231_v56, %s3135_s19  ;;  %v2318_v56 = vmul.f32 0.0038659202, %v4203_v46 }
 0x237   : > { %2278 = vrot.lane.b32.xlu2 %v2233_v21, %s3135_s19 }
 0x238   : > { %v1989_v16 = vpop.permute.xlu1 %1988 }
 0x239   : > { %2264 = vrot.lane.b32.xlu1 %v2226_v54, %s3135_s19  ;;  %v2024_v47 = vadd.f32 %v1989_v16, %v4468_v43  ;;  %v2085_v35 = vpop.permute.xlu2 %2084  ;;  %v2017_v54 = vadd.f32 %v4586_v48, %v4276_v32 }
 0x23b   : > { %v4619_v3 = vadd.f32 %v2085_v35, %v2024_v47 }
 0x23e   : > { %2280 = vrot.lane.b32.xlu0 %v2234_v17, %s3135_s19  ;;  %v2326_v17 = vmul.f32 0.0038659202, %v4376_v50 }
 0x23f   : > { %2348 = vrot.lane.b32.xlu2 %v2316_v40, %s3136_s20 }
 0x240   : > { %v4625_v22 = vpop.permute.xlu0 %1992 }
 0x241   : > { %2270 = vrot.lane.b32.xlu1 %v2229_v5, %s3135_s19  ;;  %v2091_v63 = vpop.permute.xlu2 %2090  ;;  %v2025_v5 = vadd.f32 %v4573_v57, %v4443_v10  ;;  %v2331_v57 = vmul.f32 0.0038659202, %v4506_v30 }
 0x246   : > { %2350 = vrot.lane.b32.xlu0 %v2317_v37, %s3136_s20 }
 0x247   : > { %2354 = vrot.lane.b32.xlu2 %v2319_v49, %s3136_s20  ;;  %v2020_v49 = vadd.f32 %v4600_v45, %v4347_v55 }
 0x248   : > { %v2069_v9 = vpop.permute.xlu0 %2068 }
 0x249   : > { %2276 = vrot.lane.b32.xlu1 %v2232_v15, %s3135_s19  ;;  %v4637_v29 = vadd.f32 %v2069_v9, %v2016_v20  ;;  %v2161_v6 = vpop.permute.xlu2 %2160 }
 0x24b   : > { %v1995_v0 = vpop.permute.xlu1 %1994 }
 0x24c   : > { %v2027_v19 = vadd.f32 %v1995_v0, %v4506_v30 }
 0x24e   : > { %v4641_v60 = vadd.f32 %v2091_v63, %v2027_v19  ;;  %2356 = vrot.lane.b32.xlu0 %v2320_v8, %s3136_s20  ;;  %v2321_v63 = vmul.f32 0.0038659202, %v4276_v32  ;;  %v2324_v19 = vmul.f32 0.0038659202, %v4347_v55 }
 0x24f   : > { %2360 = vrot.lane.b32.xlu2 %v2322_v61, %s3136_s20  ;;  %v2023_v61 = vadd.f32 %v4612_v33, %v4420_v4 }
 0x250   : > { %v2075_v28 = vpop.permute.xlu0 %2074 }
 0x251   : > { %2282 = vrot.lane.b32.xlu1 %v2235_v26, %s3135_s19  ;;  %v4650_v62 = vadd.f32 %v2075_v28, %v2019_v34  ;;  %v2167_v58 = vpop.permute.xlu2 %2166 }
 0x253   : > { %v2065_v41 = vpop.permute.xlu1 %2064 }
 0x254   : > { %v2110_v25 = vadd.f32 %v2065_v41, %v2014_v39  ;;  %v2412_v39 = vmul.f32 0.00033546262, %v4142_v13  ;;  %v2414_v41 = vmul.f32 0.00033546262, %v4203_v46  ;;  %v2026_v13 = vadd.f32 %v4625_v22, %v4488_v14 }
 0x255   : > { %v2415_v46 = vmul.f32 0.00033546262, %v4251_v51 }
 0x256   : > { %v4655_v44 = vadd.f32 %v2161_v6, %v2110_v25  ;;  %2362 = vrot.lane.b32.xlu0 %v2323_v52, %s3136_s20  ;;  %v2329_v6 = vmul.f32 0.0038659202, %v4443_v10  ;;  %v2327_v25 = vmul.f32 0.0038659202, %v4420_v4 }
 0x257   : > { %2366 = vrot.lane.b32.xlu2 %v2325_v38, %s3136_s20 }
 0x258   : > { %v2081_v21 = vpop.permute.xlu0 %2080 }
 0x259   : > { %2352 = vrot.lane.b32.xlu1 %v2318_v56, %s3136_s20  ;;  %v4664_v11 = vadd.f32 %v2081_v21, %v2022_v31  ;;  %v2173_v16 = vpop.permute.xlu2 %2172 }
 0x25b   : > { %v2071_v47 = vpop.permute.xlu1 %2070 }
 0x25c   : > { %v2113_v35 = vadd.f32 %v2071_v47, %v2017_v54  ;;  %v2417_v54 = vmul.f32 0.00033546262, %v4276_v32  ;;  %v2420_v32 = vmul.f32 0.00033546262, %v4347_v55  ;;  %v2423_v55 = vmul.f32 0.00033546262, %v4420_v4 }
 0x25d   : > { %v2426_v4 = vmul.f32 0.00033546262, %v4488_v14 }
 0x25e   : > { %v4669_v40 = vadd.f32 %v2167_v58, %v2113_v35  ;;  %2368 = vrot.lane.b32.xlu0 %v2326_v17, %s3136_s20  ;;  %v2418_v35 = vmul.f32 0.00033546262, %v4320_v2  ;;  %v2421_v2 = vmul.f32 0.00033546262, %v4395_v59  ;;  %v2424_v59 = vmul.f32 0.00033546262, %v4468_v43 }
 0x25f   : > { %2372 = vrot.lane.b32.xlu2 %v2328_v23, %s3136_s20  ;;  %v2413_v23 = vmul.f32 0.00033546262, %v4172_v27  ;;  %v2416_v27 = vmul.f32 0.00033546262, %v4228_v1  ;;  %v2419_v1 = vmul.f32 0.00033546262, %v4295_v42  ;;  %v2204_v42 = vadd.f32 %v4539_v18, %v4543_v12 }
 0x260   : > { %v2087_v37 = vpop.permute.xlu0 %2086 }
 0x261   : > { %2358 = vrot.lane.b32.xlu1 %v2321_v63, %s3136_s20  ;;  %v4678_v48 = vadd.f32 %v2087_v37, %v2025_v5  ;;  %v2179_v20 = vpop.permute.xlu2 %2178 }
 0x263   : > { %v2077_v15 = vpop.permute.xlu1 %2076 }
 0x264   : > { %v2116_v9 = vadd.f32 %v2077_v15, %v2020_v49 }
 0x266   : > { %v4683_v0 = vadd.f32 %v2173_v16, %v2116_v9  ;;  %2374 = vrot.lane.b32.xlu0 %v2329_v6, %s3136_s20 }
 0x267   : > { %2378 = vrot.lane.b32.xlu2 %v2331_v57, %s3136_s20 }
 0x268   : > { %v2163_v8 = vpop.permute.xlu0 %2162 }
 0x269   : > { %2364 = vrot.lane.b32.xlu1 %v2324_v19, %s3136_s20  ;;  %v4691_v45 = vadd.f32 %v2163_v8, %v4588_v36  ;;  %v2185_v34 = vpop.permute.xlu2 %2184 }
 0x26b   : > { %v2083_v26 = vpop.permute.xlu1 %2082 }
 0x26c   : > { %v2119_v28 = vadd.f32 %v2083_v26, %v2023_v61  ;;  %v2422_v61 = vmul.f32 0.00033546262, %v4376_v50 }
 0x26e   : > { %v4696_v58 = vadd.f32 %v2179_v20, %v2119_v28  ;;  %2444 = vrot.lane.b32.xlu0 %v2412_v39, %s3137_s26 }
 0x26f   : > { %2448 = vrot.lane.b32.xlu2 %v2414_v41, %s3137_s26 }
 0x270   : > { %v2169_v52 = vpop.permute.xlu0 %2168 }
 0x271   : > { %2370 = vrot.lane.b32.xlu1 %v2327_v25, %s3136_s20  ;;  %v4704_v36 = vadd.f32 %v2169_v52, %v4597_v53  ;;  %v2255_v33 = vpop.permute.xlu2 %2254  ;;  %v2330_v53 = vmul.f32 0.0038659202, %v4488_v14 }
 0x272   : > { %v4709_v31 = vadd.f32 %v2255_v33, %v4554_v7 }
 0x273   : > { %v2089_v38 = vpop.permute.xlu1 %2088 }
 0x274   : > { %v2122_v56 = vadd.f32 %v2089_v38, %v2026_v13 }
 0x276   : > { %v4712_v21 = vadd.f32 %v2185_v34, %v2122_v56  ;;  %2450 = vrot.lane.b32.xlu0 %v2415_v46, %s3137_s26 }
 0x277   : > { %2454 = vrot.lane.b32.xlu2 %v2417_v54, %s3137_s26 }
 0x278   : > { %v2175_v16 = vpop.permute.xlu0 %2174 }
 0x279   : > { %2376 = vrot.lane.b32.xlu1 %v2330_v53, %s3136_s20  ;;  %v4720_v22 = vadd.f32 %v2175_v16, %v4608_v24  ;;  %v2261_v7 = vpop.permute.xlu2 %2260 }
 0x27b   : > { %v2165_v47 = vpop.permute.xlu1 %2164 }
 0x27c   : > { %v2208_v51 = vadd.f32 %v2165_v47, %v4637_v29 }
 0x27e   : > { %2456 = vrot.lane.b32.xlu0 %v2418_v35, %s3137_s26  ;;  %v4725_v17 = vadd.f32 %v2261_v7, %v2208_v51 }
 0x27f   : > { %2460 = vrot.lane.b32.xlu2 %v2420_v32, %s3137_s26 }
 0x280   : > { %v2181_v5 = vpop.permute.xlu0 %2180 }
 0x281   : > { %2446 = vrot.lane.b32.xlu1 %v2413_v23, %s3137_s26  ;;  %v2216_v24 = vadd.f32 %v2181_v5, %v4619_v3  ;;  %v2267_v63 = vpop.permute.xlu2 %2266 }
 0x283   : > { %v2171_v37 = vpop.permute.xlu1 %2170 }
 0x284   : > { %v2211_v29 = vadd.f32 %v2171_v37, %v4650_v62 }
 0x286   : > { %2462 = vrot.lane.b32.xlu0 %v2421_v2, %s3137_s26  ;;  %v2307_v49 = vadd.f32 %v2267_v63, %v2211_v29 }
 0x287   : > { %2466 = vrot.lane.b32.xlu2 %v2423_v55, %s3137_s26  ;;  %v5158_v55 = vld [vmem:[#allocation12_spill] sm:$0xff] }
 0x288   : > { %v2187_v20 = vpop.permute.xlu0 %2186 }
 0x289   : > { %2452 = vrot.lane.b32.xlu1 %v2416_v27, %s3137_s26  ;;  %v2219_v3 = vadd.f32 %v2187_v20, %v4641_v60  ;;  %v2273_v15 = vpop.permute.xlu2 %2272  ;;  %v2510_v27 = vmul.f32 0.9975212, %v5158_v55  ;;  %v5166_v55 = vld [vmem:[#allocation27_spill] sm:$0xff] }
 0x28b   : > { %v2177_v9 = vpop.permute.xlu1 %2176 }
 0x28c   : > { %v2214_v62 = vadd.f32 %v2177_v9, %v4664_v11  ;;  %v2427_v11 = vmul.f32 0.00033546262, %v4506_v30 }
 0x28e   : > { %2468 = vrot.lane.b32.xlu0 %v2424_v59, %s3137_s26  ;;  %v2310_v6 = vadd.f32 %v2273_v15, %v2214_v62 }
 0x28f   : > { %2472 = vrot.lane.b32.xlu2 %v2426_v4, %s3137_s26 }
 0x290   : > { %v2257_v57 = vpop.permute.xlu0 %2256 }
 0x291   : > { %2458 = vrot.lane.b32.xlu1 %v2419_v1, %s3137_s26  ;;  %v2279_v19 = vpop.permute.xlu2 %2278 }
 0x293   : > { %v2183_v60 = vpop.permute.xlu1 %2182 }
 0x294   : > { %v2217_v8 = vadd.f32 %v2183_v60, %v4678_v48  ;;  %v2425_v48 = vmul.f32 0.00033546262, %v4443_v10 }
 0x296   : > { %2474 = vrot.lane.b32.xlu0 %v2427_v11, %s3137_s26  ;;  %v4750_v43 = vadd.f32 %v2279_v19, %v2217_v8 }
 0x298   : > { %v2263_v14 = vpop.permute.xlu0 %2262 }
 0x299   : > { %2464 = vrot.lane.b32.xlu1 %v2422_v61, %s3137_s26  ;;  %v2349_v34 = vpop.permute.xlu2 %2348 }
 0x29b   : > { %v2253_v26 = vpop.permute.xlu1 %2252 }
 0x29c   : > { %v2300_v28 = vadd.f32 %v2253_v26, %v2204_v42 }
 0x29e   : > { %v4756_v39 = vadd.f32 %v2349_v34, %v2300_v28 }
 0x2a0   : > { %v2269_v30 = vpop.permute.xlu0 %2268 }
 0x2a1   : > { %2470 = vrot.lane.b32.xlu1 %v2425_v48, %s3137_s26  ;;  %v2355_v41 = vpop.permute.xlu2 %2354  ;;  %v2308_v60 = vadd.f32 %v2269_v30, %v4683_v0 }
 0x2a3   : > { %v2259_v25 = vpop.permute.xlu1 %2258 }
 0x2a4   : > { %v2303_v50 = vadd.f32 %v2259_v25, %v4691_v45 }
 0x2a6   : > { %v4761_v52 = vadd.f32 %v2355_v41, %v2303_v50 }
 0x2a8   : > { %v4763_v13 = vpop.permute.xlu0 %2274 }
 0x2a9   : > { %v2361_v33 = vpop.permute.xlu2 %2360  ;;  %v2311_v30 = vadd.f32 %v4763_v13, %v4696_v58 }
 0x2ab   : > { %v2265_v18 = vpop.permute.xlu1 %2264 }
 0x2ac   : > { %v2306_v12 = vadd.f32 %v2265_v18, %v4704_v36  ;;  %v5162_v18 = vld [vmem:[#allocation25_spill] sm:$0xff] }
 0x2ae   : > { %v4766_v38 = vadd.f32 %v2361_v33, %v2306_v12  ;;  %v2519_v12 = vmul.f32 0.9975212, %v5162_v18 }
 0x2b0   : > { %v2281_v56 = vpop.permute.xlu0 %2280 }
 0x2b1   : > { %v4769_v10 = vadd.f32 %v2281_v56, %v4712_v21  ;;  %v2367_v46 = vpop.permute.xlu2 %2366 }
 0x2b3   : > { %v2271_v54 = vpop.permute.xlu1 %2270 }
 0x2b4   : > { %v2309_v53 = vadd.f32 %v2271_v54, %v4720_v22  ;;  %v2302_v22 = vadd.f32 %v2257_v57, %v4655_v44 }
 0x2b6   : > { %v4772_v16 = vadd.f32 %v2367_v46, %v2309_v53 }
 0x2b8   : > { %v4774_v45 = vpop.permute.xlu0 %2350 }
 0x2b9   : > { %v2373_v7 = vpop.permute.xlu2 %2372 }
 0x2bb   : > { %v2277_v47 = vpop.permute.xlu1 %2276 }
 0x2bc   : > { %v2312_v51 = vadd.f32 %v2277_v47, %v2216_v24  ;;  %v5164_v47 = vld [vmem:[#allocation18_spill] sm:$0xff] }
 0x2be   : > { %v4776_v35 = vadd.f32 %v2373_v7, %v2312_v51  ;;  %v2514_v51 = vmul.f32 0.9975212, %v5164_v47 }
 0x2c0   : > { %v4778_v36 = vpop.permute.xlu0 %2356 }
 0x2c1   : > { %v2379_v32 = vpop.permute.xlu2 %2378 }
 0x2c3   : > { %v2283_v23 = vpop.permute.xlu1 %2282 }
 0x2c4   : > { %v2315_v21 = vadd.f32 %v2283_v23, %v2219_v3  ;;  %v2305_v3 = vadd.f32 %v2263_v14, %v4669_v40  ;;  %v5159_v40 = vld [vmem:[#allocation19_spill] sm:$0xff]  ;;  %v5160_v14 = vld [vmem:[#allocation22_spill] sm:$0xff]  ;;  %v2397_v23 = vadd.f32 %v4774_v45, %v4709_v31 }
 0x2c5   : > { %v2516_v42 = vmul.f32 0.9975212, %v5160_v14 }
 0x2c6   : > { %v4780_v5 = vadd.f32 %v2379_v32, %v2315_v21  ;;  %v5165_v21 = vld [vmem:[#allocation15_spill] sm:$0xff] }
 0x2c8   : > { %v2363_v63 = vpop.permute.xlu0 %2362 }
 0x2c9   : > { %v4782_v37 = vadd.f32 %v2363_v63, %v2307_v49  ;;  %v2449_v29 = vpop.permute.xlu2 %2448  ;;  %v2509_v63 = vmul.f32 0.9975212, %v5165_v21 }
 0x2cb   : > { %v2353_v2 = vpop.permute.xlu1 %2352 }
 0x2cc   : > { %v2398_v24 = vadd.f32 %v2353_v2, %v2302_v22 }
 0x2ce   : > { %v2494_v20 = vadd.f32 %v2449_v29, %v2398_v24 }
 0x2d0   : > { %v2369_v15 = vpop.permute.xlu0 %2368  ;;  %v2526_v9 = vadd.f32 %v2510_v27, %v2494_v20  ;;  %v2522_v27 = vmul.f32 0.9975212, %v5166_v55  ;;  %v5167_v20 = vld [vmem:[#allocation16_spill] sm:$0xff] }
 0x2d1   : > { %v4786_v62 = vadd.f32 %v2369_v15, %v2310_v6  ;;  %v2455_v44 = vpop.permute.xlu2 %2454  ;;  %v2513_v6 = vmul.f32 0.9975212, %v5159_v40  ;;  %v2400_v15 = vadd.f32 %v4778_v36, %v4725_v17  ;;  %v5168_v36 = vld [vmem:[#allocation21_spill] sm:$0xff] }
 0x2d2   : > { %2543 = vst.msk [vmem:[%s4791_s27 + $0x10] sm:$0xff] %vm2540_vm12, %v2526_v9 }
 0x2d3   : > { %v2359_v49 = vpop.permute.xlu1 %2358  ;;  %2829 = vst.msk [vmem:[%s4791_s27 + $0x90] sm:$0xff] %vm2540_vm12, %v2526_v9 }
 0x2d4   : > { %v2401_v59 = vadd.f32 %v2359_v49, %v2305_v3  ;;  %2845 = vst.msk [vmem:[%s4791_s27 + $0x110] sm:$0xff] %vm2540_vm12, %v2526_v9 }
 0x2d5   : > { %2861 = vst.msk [vmem:[%s4791_s27 + $0x190] sm:$0xff] %vm2540_vm12, %v2526_v9 }
 0x2d6   : > { %2877 = vst.msk [vmem:[%s4791_s27 + $0x210] sm:$0xff] %vm2540_vm12, %v2526_v9  ;;  %v2497_v4 = vadd.f32 %v2455_v44, %v2401_v59  ;;  %v2517_v59 = vmul.f32 0.9975212, %v5168_v36 }
 0x2d8   : > { %v2375_v1 = vpop.permute.xlu0 %2374  ;;  %v2529_v57 = vadd.f32 %v2513_v6, %v2497_v4 }
 0x2d9   : > { %v4805_v19 = vadd.f32 %v2375_v1, %v4750_v43  ;;  %v2461_v8 = vpop.permute.xlu2 %2460  ;;  %v5161_v43 = vld [vmem:[#allocation13_spill] sm:$0xff] }
 0x2da   : > { %2546 = vst.msk [vmem:[%s4791_s27 + $0x28] sm:$0xff] %vm2540_vm12, %v2529_v57  ;;  %v2508_v34 = vmul.f32 0.9975212, %v5161_v43  ;;  %v5169_v1 = vld [vmem:[#allocation17_spill] sm:$0xff] }
 0x2db   : > { %v2365_v11 = vpop.permute.xlu1 %2364  ;;  %2832 = vst.msk [vmem:[%s4791_s27 + $0xa8] sm:$0xff] %vm2540_vm12, %v2529_v57 }
 0x2dc   : > { %v2404_v61 = vadd.f32 %v2365_v11, %v2308_v60  ;;  %2848 = vst.msk [vmem:[%s4791_s27 + $0x128] sm:$0xff] %vm2540_vm12, %v2529_v57  ;;  %v5170_v11 = vld [vmem:[#allocation24_spill] sm:$0xff] }
 0x2dd   : > { %2864 = vst.msk [vmem:[%s4791_s27 + $0x1a8] sm:$0xff] %vm2540_vm12, %v2529_v57 }
 0x2de   : > { %2880 = vst.msk [vmem:[%s4791_s27 + $0x228] sm:$0xff] %vm2540_vm12, %v2529_v57  ;;  %v2500_v0 = vadd.f32 %v2461_v8, %v2404_v61  ;;  %v2515_v57 = vmul.f32 0.9975212, %v5169_v1  ;;  %v2520_v61 = vmul.f32 0.9975212, %v5170_v11 }
 0x2e0   : > { %v2445_v26 = vpop.permute.xlu0 %2444  ;;  %v2532_v28 = vadd.f32 %v2516_v42, %v2500_v0  ;;  %v5171_v0 = vld [vmem:[#allocation20_spill] sm:$0xff] }
 0x2e1   : > { %v2492_v48 = vadd.f32 %v2445_v26, %v4756_v39  ;;  %v2467_v50 = vpop.permute.xlu2 %2466  ;;  %v5163_v39 = vld [vmem:[#allocation14_spill] sm:$0xff]  ;;  %v2518_v43 = vmul.f32 0.9975212, %v5171_v0 }
 0x2e2   : > { %2549 = vst.msk [vmem:[%s4791_s27 + $0x40] sm:$0xff] %vm2540_vm12, %v2532_v28  ;;  %v2511_v13 = vmul.f32 0.9975212, %v5163_v39 }
 0x2e3   : > { %v2371_v41 = vpop.permute.xlu1 %2370  ;;  %v2524_v25 = vadd.f32 %v2508_v34, %v2492_v48  ;;  %2835 = vst.msk [vmem:[%s4791_s27 + $0xc0] sm:$0xff] %vm2540_vm12, %v2532_v28 }
 0x2e4   : > { %v2407_v33 = vadd.f32 %v2371_v41, %v2311_v30  ;;  %2851 = vst.msk [vmem:[%s4791_s27 + $0x140] sm:$0xff] %vm2540_vm12, %v2532_v28 }
 0x2e5   : > { %2541 = vst.msk [vmem:[%s4791_s27] sm:$0xff] %vm2540_vm12, %v2524_v25 }
 0x2e6   : > { %2827 = vst.msk [vmem:[%s4791_s27 + $0x80] sm:$0xff] %vm2540_vm12, %v2524_v25  ;;  %v2503_v58 = vadd.f32 %v2467_v50, %v2407_v33 }
 0x2e7   : > { %2843 = vst.msk [vmem:[%s4791_s27 + $0x100] sm:$0xff] %vm2540_vm12, %v2524_v25 }
 0x2e8   : > { %2859 = vst.msk [vmem:[%s4791_s27 + $0x180] sm:$0xff] %vm2540_vm12, %v2524_v25  ;;  %v2451_v56 = vpop.permute.xlu0 %2450  ;;  %v2535_v46 = vadd.f32 %v2519_v12, %v2503_v58 }
 0x2e9   : > { %2875 = vst.msk [vmem:[%s4791_s27 + $0x200] sm:$0xff] %vm2540_vm12, %v2524_v25  ;;  %v2495_v54 = vadd.f32 %v2451_v56, %v4761_v52  ;;  %v5173_v25 = vld [vmem:[#allocation23_spill] sm:$0xff] }
 0x2ea   : > { %2867 = vst.msk [vmem:[%s4791_s27 + $0x1c0] sm:$0xff] %vm2540_vm12, %v2532_v28 }
 0x2eb   : > { %2883 = vst.msk [vmem:[%s4791_s27 + $0x240] sm:$0xff] %vm2540_vm12, %v2532_v28  ;;  %v2377_v53 = vpop.permute.xlu1 %2376  ;;  %v2527_v7 = vadd.f32 %v2511_v13, %v2495_v54  ;;  %v5172_v28 = vld [vmem:[#allocation26_spill] sm:$0xff] }
 0x2ec   : > { %2552 = vst.msk [vmem:[%s4791_s27 + $0x58] sm:$0xff] %vm2540_vm12, %v2535_v46  ;;  %v2410_v31 = vadd.f32 %v2377_v53, %v4769_v10  ;;  %v2512_v10 = vmul.f32 0.9975212, %v5167_v20 }
 0x2ed   : > { %2544 = vst.msk [vmem:[%s4791_s27 + $0x18] sm:$0xff] %vm2540_vm12, %v2527_v7 }
 0x2ee   : > { %2830 = vst.msk [vmem:[%s4791_s27 + $0x98] sm:$0xff] %vm2540_vm12, %v2527_v7 }
 0x2ef   : > { %2846 = vst.msk [vmem:[%s4791_s27 + $0x118] sm:$0xff] %vm2540_vm12, %v2527_v7 }
 0x2f0   : > { %2862 = vst.msk [vmem:[%s4791_s27 + $0x198] sm:$0xff] %vm2540_vm12, %v2527_v7  ;;  %v2457_v52 = vpop.permute.xlu0 %2456 }
 0x2f1   : > { %2878 = vst.msk [vmem:[%s4791_s27 + $0x218] sm:$0xff] %vm2540_vm12, %v2527_v7  ;;  %v2498_v32 = vadd.f32 %v2457_v52, %v4766_v38  ;;  %v2473_v38 = vpop.permute.xlu2 %2472 }
 0x2f2   : > { %2838 = vst.msk [vmem:[%s4791_s27 + $0xd8] sm:$0xff] %vm2540_vm12, %v2535_v46  ;;  %v2506_v24 = vadd.f32 %v2473_v38, %v2410_v31 }
 0x2f3   : > { %2854 = vst.msk [vmem:[%s4791_s27 + $0x158] sm:$0xff] %vm2540_vm12, %v2535_v46  ;;  %v2447_v22 = vpop.permute.xlu1 %2446  ;;  %v2530_v29 = vadd.f32 %v2514_v51, %v2498_v32 }
 0x2f4   : > { %2870 = vst.msk [vmem:[%s4791_s27 + $0x1d8] sm:$0xff] %vm2540_vm12, %v2535_v46  ;;  %v2493_v2 = vadd.f32 %v2447_v22, %v2397_v23  ;;  %v2538_v3 = vadd.f32 %v2522_v27, %v2506_v24 }
 0x2f5   : > { %2886 = vst.msk [vmem:[%s4791_s27 + $0x258] sm:$0xff] %vm2540_vm12, %v2535_v46 }
 0x2f6   : > { %v2525_v45 = vadd.f32 %v2509_v63, %v2493_v2  ;;  %2547 = vst.msk [vmem:[%s4791_s27 + $0x30] sm:$0xff] %vm2540_vm12, %v2530_v29 }
 0x2f7   : > { %2833 = vst.msk [vmem:[%s4791_s27 + $0xb0] sm:$0xff] %vm2540_vm12, %v2530_v29 }
 0x2f8   : > { %2542 = vst.msk [vmem:[%s4791_s27 + $0x8] sm:$0xff] %vm2540_vm12, %v2525_v45  ;;  %v2463_v17 = vpop.permute.xlu0 %2462 }
 0x2f9   : > { %2828 = vst.msk [vmem:[%s4791_s27 + $0x88] sm:$0xff] %vm2540_vm12, %v2525_v45  ;;  %v2501_v40 = vadd.f32 %v2463_v17, %v4772_v16 }
 0x2fa   : > { %2844 = vst.msk [vmem:[%s4791_s27 + $0x108] sm:$0xff] %vm2540_vm12, %v2525_v45 }
 0x2fb   : > { %2860 = vst.msk [vmem:[%s4791_s27 + $0x188] sm:$0xff] %vm2540_vm12, %v2525_v45  ;;  %v2453_v9 = vpop.permute.xlu1 %2452  ;;  %v2533_v4 = vadd.f32 %v2517_v59, %v2501_v40 }
 0x2fc   : > { %2876 = vst.msk [vmem:[%s4791_s27 + $0x208] sm:$0xff] %vm2540_vm12, %v2525_v45  ;;  %v2496_v44 = vadd.f32 %v2453_v9, %v2400_v15 }
 0x2fd   : > { %2849 = vst.msk [vmem:[%s4791_s27 + $0x130] sm:$0xff] %vm2540_vm12, %v2530_v29 }
 0x2fe   : > { %2865 = vst.msk [vmem:[%s4791_s27 + $0x1b0] sm:$0xff] %vm2540_vm12, %v2530_v29  ;;  %v2528_v49 = vadd.f32 %v2512_v10, %v2496_v44 }
 0x2ff   : > { %2881 = vst.msk [vmem:[%s4791_s27 + $0x230] sm:$0xff] %vm2540_vm12, %v2530_v29 }
 0x300   : > { %2555 = vst.msk [vmem:[%s4791_s27 + $0x70] sm:$0xff] %vm2540_vm12, %v2538_v3  ;;  %v2469_v60 = vpop.permute.xlu0 %2468 }
 0x301   : > { %2841 = vst.msk [vmem:[%s4791_s27 + $0xf0] sm:$0xff] %vm2540_vm12, %v2538_v3 }
 0x302   : > { %2857 = vst.msk [vmem:[%s4791_s27 + $0x170] sm:$0xff] %vm2540_vm12, %v2538_v3 }
 0x303   : > { %2873 = vst.msk [vmem:[%s4791_s27 + $0x1f0] sm:$0xff] %vm2540_vm12, %v2538_v3  ;;  %v2459_v6 = vpop.permute.xlu1 %2458 }
 0x304   : > { %2889 = vst.msk [vmem:[%s4791_s27 + $0x270] sm:$0xff] %vm2540_vm12, %v2538_v3  ;;  %v2499_v16 = vadd.f32 %v2459_v6, %v4782_v37  ;;  %v2504_v37 = vadd.f32 %v2469_v60, %v4776_v35 }
 0x305   : > { %2545 = vst.msk [vmem:[%s4791_s27 + $0x20] sm:$0xff] %vm2540_vm12, %v2528_v49 }
 0x306   : > { %2831 = vst.msk [vmem:[%s4791_s27 + $0xa0] sm:$0xff] %vm2540_vm12, %v2528_v49  ;;  %v2531_v8 = vadd.f32 %v2515_v57, %v2499_v16  ;;  %v2536_v42 = vadd.f32 %v2520_v61, %v2504_v37 }
 0x307   : > { %2847 = vst.msk [vmem:[%s4791_s27 + $0x120] sm:$0xff] %vm2540_vm12, %v2528_v49 }
 0x308   : > { %2863 = vst.msk [vmem:[%s4791_s27 + $0x1a0] sm:$0xff] %vm2540_vm12, %v2528_v49  ;;  %v2475_v34 = vpop.permute.xlu0 %2474 }
 0x309   : > { %2879 = vst.msk [vmem:[%s4791_s27 + $0x220] sm:$0xff] %vm2540_vm12, %v2528_v49  ;;  %v2507_v48 = vadd.f32 %v2475_v34, %v4780_v5  ;;  %v2521_v5 = vmul.f32 0.9975212, %v5173_v25 }
 0x30a   : > { %2550 = vst.msk [vmem:[%s4791_s27 + $0x48] sm:$0xff] %vm2540_vm12, %v2533_v4 }
 0x30b   : > { %2836 = vst.msk [vmem:[%s4791_s27 + $0xc8] sm:$0xff] %vm2540_vm12, %v2533_v4  ;;  %v2465_v14 = vpop.permute.xlu1 %2464 }
 0x30c   : > { %2852 = vst.msk [vmem:[%s4791_s27 + $0x148] sm:$0xff] %vm2540_vm12, %v2533_v4  ;;  %v2502_v35 = vadd.f32 %v2465_v14, %v4786_v62  ;;  %v2523_v62 = vmul.f32 0.9975212, %v5172_v28 }
 0x30d   : > { %2868 = vst.msk [vmem:[%s4791_s27 + $0x1c8] sm:$0xff] %vm2540_vm12, %v2533_v4 }
 0x30e   : > { %2884 = vst.msk [vmem:[%s4791_s27 + $0x248] sm:$0xff] %vm2540_vm12, %v2533_v4  ;;  %v2534_v26 = vadd.f32 %v2518_v43, %v2502_v35  ;;  %v2539_v41 = vadd.f32 %v2523_v62, %v2507_v48 }
 0x30f   : > { %2548 = vst.msk [vmem:[%s4791_s27 + $0x38] sm:$0xff] %vm2540_vm12, %v2531_v8 }
 0x310   : > { %2834 = vst.msk [vmem:[%s4791_s27 + $0xb8] sm:$0xff] %vm2540_vm12, %v2531_v8 }
 0x311   : > { %2850 = vst.msk [vmem:[%s4791_s27 + $0x138] sm:$0xff] %vm2540_vm12, %v2531_v8 }
 0x312   : > { %2866 = vst.msk [vmem:[%s4791_s27 + $0x1b8] sm:$0xff] %vm2540_vm12, %v2531_v8 }
 0x313   : > { %2882 = vst.msk [vmem:[%s4791_s27 + $0x238] sm:$0xff] %vm2540_vm12, %v2531_v8  ;;  %v2471_v30 = vpop.permute.xlu1 %2470 }
 0x314   : > { %2553 = vst.msk [vmem:[%s4791_s27 + $0x60] sm:$0xff] %vm2540_vm12, %v2536_v42  ;;  %v2505_v50 = vadd.f32 %v2471_v30, %v4805_v19 }
 0x315   : > { %2839 = vst.msk [vmem:[%s4791_s27 + $0xe0] sm:$0xff] %vm2540_vm12, %v2536_v42 }
 0x316   : > { %2855 = vst.msk [vmem:[%s4791_s27 + $0x160] sm:$0xff] %vm2540_vm12, %v2536_v42  ;;  %v2537_v33 = vadd.f32 %v2521_v5, %v2505_v50 }
 0x317   : > { %2871 = vst.msk [vmem:[%s4791_s27 + $0x1e0] sm:$0xff] %vm2540_vm12, %v2536_v42 }
 0x318   : > { %2887 = vst.msk [vmem:[%s4791_s27 + $0x260] sm:$0xff] %vm2540_vm12, %v2536_v42 }
 0x319   : > { %2551 = vst.msk [vmem:[%s4791_s27 + $0x50] sm:$0xff] %vm2540_vm12, %v2534_v26 }
 0x31a   : > { %2837 = vst.msk [vmem:[%s4791_s27 + $0xd0] sm:$0xff] %vm2540_vm12, %v2534_v26 }
 0x31b   : > { %2853 = vst.msk [vmem:[%s4791_s27 + $0x150] sm:$0xff] %vm2540_vm12, %v2534_v26 }
 0x31c   : > { %2869 = vst.msk [vmem:[%s4791_s27 + $0x1d0] sm:$0xff] %vm2540_vm12, %v2534_v26 }
 0x31d   : > { %2885 = vst.msk [vmem:[%s4791_s27 + $0x250] sm:$0xff] %vm2540_vm12, %v2534_v26 }
 0x31e   : > { %2556 = vst.msk [vmem:[%s4791_s27 + $0x78] sm:$0xff] %vm2540_vm12, %v2539_v41 }
 0x31f   : > { %2842 = vst.msk [vmem:[%s4791_s27 + $0xf8] sm:$0xff] %vm2540_vm12, %v2539_v41 }
 0x320   : > { %2858 = vst.msk [vmem:[%s4791_s27 + $0x178] sm:$0xff] %vm2540_vm12, %v2539_v41 }
 0x321   : > { %2874 = vst.msk [vmem:[%s4791_s27 + $0x1f8] sm:$0xff] %vm2540_vm12, %v2539_v41 }
 0x322   : > { %2890 = vst.msk [vmem:[%s4791_s27 + $0x278] sm:$0xff] %vm2540_vm12, %v2539_v41 }
 0x323   : > { %2554 = vst.msk [vmem:[%s4791_s27 + $0x68] sm:$0xff] %vm2540_vm12, %v2537_v33 }
 0x324   : > { %2840 = vst.msk [vmem:[%s4791_s27 + $0xe8] sm:$0xff] %vm2540_vm12, %v2537_v33 }
 0x325   : > { %2856 = vst.msk [vmem:[%s4791_s27 + $0x168] sm:$0xff] %vm2540_vm12, %v2537_v33 }
 0x326   : > { %2872 = vst.msk [vmem:[%s4791_s27 + $0x1e8] sm:$0xff] %vm2540_vm12, %v2537_v33 }
 0x327   : > { %2888 = vst.msk [vmem:[%s4791_s27 + $0x268] sm:$0xff] %vm2540_vm12, %v2537_v33 }
 0x328   : > { %3067 = shalt.err (!%p3064_p13)
}
 0x329   : > { %s3138_s4 = smov 128   ;;  %s3139_s19 = smov 8  }
 0x32a   : > { %2905 = dma.vmem_to_hbm [thread:$0]  (%p3206_p9), %s2641_s12, 10240, %s2643_s6, %s2626_s7, %s3138_s4, %s3138_s4, %s3139_s19  }
 0x32b PF: > { %s2657_s20 = sand.u32 1, %s3106_s9   ;;  %p2915_p0 = pnand %p2759_p12, %p3213_p11 }
 0x32c   : > { %s2658_s26 = scalar_lea.sflag [#allocation5], %s2657_s20 }
 0x32d   : > { %p2916_p1 = pneg %p2915_p0 }
 0x32f   : > { %3101 = dma.done.wait (%p2916_p1), %s2658_s26, 10240  }
 0x330   : > { %3103 = vsyncadd (%p2916_p1), %s2658_s26, 4294957056  ;;  %s21_s14 = sadd.s32 1, %s3126_s14   ;;  %s5174_s9 = smov %s3110_s10 }
 0x331   : > { %p18_p2 = scmp.ge.s32.totalorder %s21_s14, 4   ;;  %s5175_s10 = smov %s3114_s11 }
 0x332   : > { %s5176_s11 = smov %s3211_s23  ;;  %s5177_s12 = smov %s3122_s13 }
 0x333   : > { %s5178_s13 = smov %s5180_s17  ;;  %20 = sbr.rel (!%p18_p2) target bundleno = 8 (0x8), region = 96 }
 0x338   :  { %2664 = vsyncpa [#allocation4], 1 }
 0x339   :  { %2666 = vsyncpa [#allocation4 + $0x1], 1 }
 0x33a   :  { %2667 = vsyncpa [#allocation7], 1 }
 0x33b   :  { %2669 = vsyncpa [#allocation7 + $0x1], 1 }
 0x33c   :  { %2670 = vsyncpa [#allocation5], 1 }
 0x33d   :  { %2672 = vsyncpa [#allocation5 + $0x1], 1 }

</bundles_post_ra>
